<compile_context>
chip_gen: v7x
topology: tpu7x:2x2x1
jax: 0.10.0
libtpu: 0.0.40
codegen_flags: <defaults>
</compile_context>

<pallas_src>
import functools

import jax
import jax.numpy as jnp
from jax.experimental import pallas as pl
from jax.experimental.pallas import tpu as pltpu


def _round_up(x, m):
    return (x + m - 1) // m * m


def _pick_tile(dim_padded, max_tile=512):
    """Largest multiple of 128 that divides dim_padded and is <= max_tile."""
    best = 128
    for t in range(128, max_tile + 1, 128):
        if dim_padded % t == 0:
            best = t
    return best


# --------------------------- Pallas kernel ----------------------------------

def _matmul_bias_kernel(x_ref, w_ref, b_ref, o_ref, acc_ref, *, relu):
    """Tiled Y = X @ W + b (optional ReLU). Grid = (M, N, K); K is reduction."""
    @pl.when(pl.program_id(2) == 0)
    def _():
        acc_ref[...] = jnp.zeros_like(acc_ref)

    # bf16 x bf16 -> f32 accumulation on the MXU.
    acc_ref[...] += jnp.dot(x_ref[...], w_ref[...],
                            preferred_element_type=jnp.float32)

    @pl.when(pl.program_id(2) == pl.num_programs(2) - 1)
    def _():
        y = acc_ref[...] + b_ref[...]          # f32 epilogue
        if relu:
            y = jnp.maximum(y, 0.0)
        o_ref[...] = y.astype(o_ref.dtype)


def matmul_bias(x, w_p, b_p, n_out, *, relu):
    """y = x @ w + b (optionally ReLU).

    x:   (M, K)  float32 activations (unpadded).
    w_p: (Kp, Np) bfloat16, pre-padded weight matrix (Kp, Np multiples of 128).
    b_p: (1, Np)  float32, pre-padded bias.
    Returns (M, n_out) float32.
    """
    M, K = x.shape
    Kp, Np = w_p.shape

    Mp8 = _round_up(M, 8)
    tm = min(256, Mp8)
    Mp = _round_up(Mp8, tm)
    tn = _pick_tile(Np)
    tk = Kp if Kp <= 1024 else _pick_tile(Kp)

    xp = x.astype(jnp.bfloat16)
    if (Mp, Kp) != (M, K):
        xp = jnp.pad(xp, ((0, Mp - M), (0, Kp - K)))

    grid = (Mp // tm, Np // tn, Kp // tk)
    out = pl.pallas_call(
        functools.partial(_matmul_bias_kernel, relu=relu),
        out_shape=jax.ShapeDtypeStruct((Mp, Np), jnp.float32),
        grid_spec=pltpu.PrefetchScalarGridSpec(
            num_scalar_prefetch=0,
            grid=grid,
            in_specs=[
                pl.BlockSpec((tm, tk), lambda m, n, k: (m, k)),
                pl.BlockSpec((tk, tn), lambda m, n, k: (k, n)),
                pl.BlockSpec((1, tn), lambda m, n, k: (0, n)),
            ],
            out_specs=pl.BlockSpec((tm, tn), lambda m, n, k: (m, n)),
            scratch_shapes=[pltpu.VMEM((tm, tn), jnp.float32)],
        ),
        compiler_params=pltpu.CompilerParams(
            dimension_semantics=("parallel", "parallel", "arbitrary")),
    )(xp, w_p, b_p)
    return out[:M, :n_out]


# ------------------------------- Glue ----------------------------------------

def conv2d_relu(x, w_p, b_p, cout, *, stride, pad, ksz=3):
    """x: (N,H,W,Cin) NHWC; w_p: pre-padded (Kp,Np) bf16 from a 3x3 conv."""
    N, H, W, Cin = x.shape
    xp = jnp.pad(x, ((0, 0), (pad, pad), (pad, pad), (0, 0)))
    Ho = (H + 2 * pad - ksz) // stride + 1
    Wo = (W + 2 * pad - ksz) // stride + 1
    cols = []
    for dy in range(ksz):
        for dx in range(ksz):
            cols.append(xp[:, dy:dy + stride * Ho:stride,
                           dx:dx + stride * Wo:stride, :])
    patches = jnp.stack(cols, axis=3)                    # (N,Ho,Wo,kh*kw,Cin)
    patches = patches.reshape(N * Ho * Wo, ksz * ksz * Cin)
    y = matmul_bias(patches, w_p, b_p, cout, relu=True)
    return y.reshape(N, Ho, Wo, cout)


def maxpool2d(x, *, k=3, stride=2):
    """x: (N,H,W,C) NHWC; kernel 3, stride 2, no padding (PyTorch default).

    Plain jnp.maximum reduction tree (per perf review: a grid=(1,) Pallas call
    plus a 9x patch stack was pure overhead for this tiny op).
    """
    N, H, W, C = x.shape
    Ho = (H - k) // stride + 1
    Wo = (W - k) // stride + 1
    out = None
    for dy in range(k):
        for dx in range(k):
            win = x[:, dy:dy + stride * Ho:stride,
                    dx:dx + stride * Wo:stride, :]
            out = win if out is None else jnp.maximum(out, win)
    return out


# ---------------------------- Parameters -------------------------------------

def init_params(key, classes=100):
    def conv(k, cin, cout, ksz=3):
        kw_, _ = jax.random.split(k)
        fan_in = cin * ksz * ksz
        w = jax.random.normal(kw_, (ksz, ksz, cin, cout),
                              jnp.float32) * (2.0 / fan_in) ** 0.5
        b = jnp.zeros((cout,), jnp.float32)
        return w, b

    def lin(k, cin, cout):
        kw_, _ = jax.random.split(k)
        w = jax.random.normal(kw_, (cin, cout),
                              jnp.float32) * (2.0 / cin) ** 0.5
        b = jnp.zeros((cout,), jnp.float32)
        return w, b

    ks = jax.random.split(key, 8)
    return {
        "c1": conv(ks[0], 3, 64),
        "c2": conv(ks[1], 64, 192),
        "c3": conv(ks[2], 192, 384),
        "c4": conv(ks[3], 384, 256),
        "c5": conv(ks[4], 256, 256),
        "fc1": lin(ks[5], 256, 4096),
        "fc2": lin(ks[6], 4096, 4096),
        "fc3": lin(ks[7], 4096, classes),
    }


def prepare_params(params):
    """Pad to 128-multiples and cast weights to bf16 ONCE (not per forward)."""
    def prep(wmat, b):
        K, N = wmat.shape
        Kp, Np = _round_up(K, 128), _round_up(N, 128)
        w_p = jnp.zeros((Kp, Np), jnp.bfloat16).at[:K, :N].set(
            wmat.astype(jnp.bfloat16))
        b_p = jnp.zeros((1, Np), jnp.float32).at[0, :N].set(b)
        return w_p, b_p, N

    def prep_conv(w, b):
        kh, kw, cin, cout = w.shape
        return prep(w.reshape(kh * kw * cin, cout), b)   # (kh,kw,Cin) flatten

    out = {}
    for name in ("c1", "c2", "c3", "c4", "c5"):
        out[name] = prep_conv(*params[name])
    for name in ("fc1", "fc2", "fc3"):
        out[name] = prep(*params[name])
    return out


# ------------------------------ Forward ---------------------------------------

def alexnet_forward(prep, x_nchw):
    # layout: input is NCHW (PyTorch); transpose to NHWC for the kernels.
    x = jnp.transpose(x_nchw, (0, 2, 3, 1)).astype(jnp.float32)

    x = conv2d_relu(x, *prep["c1"], stride=2, pad=1)   # 32 -> 16
    x = maxpool2d(x)                                   # 16 -> 7
    x = conv2d_relu(x, *prep["c2"], stride=1, pad=1)   # 7  -> 7
    x = maxpool2d(x)                                   # 7  -> 3
    x = conv2d_relu(x, *prep["c3"], stride=1, pad=1)   # 3  -> 3
    x = conv2d_relu(x, *prep["c4"], stride=1, pad=1)   # 3  -> 3
    x = conv2d_relu(x, *prep["c5"], stride=1, pad=1)   # 3  -> 3
    x = maxpool2d(x)                                   # 3  -> 1

    n = x.shape[0]
    x = x.reshape(n, -1)  # (N, 256); spatial is 1x1 so NHWC==NCHW flatten

    # TODO(synk): nn.Dropout treated as identity (inference semantics); no stochastic mask.
    x = matmul_bias(x, *prep["fc1"], relu=True)
    x = matmul_bias(x, *prep["fc2"], relu=True)
    x = matmul_bias(x, *prep["fc3"], relu=False)
    return x


if __name__ == "__main__":
    key = jax.random.PRNGKey(0)
    pkey, xkey = jax.random.split(key)
    params = init_params(pkey, classes=100)
    prep = prepare_params(params)            # one-time pad + bf16 cast
    x = jax.random.normal(xkey, (2, 3, 32, 32), jnp.float32)  # NCHW like PyTorch

    fwd = jax.jit(lambda xin: alexnet_forward(prep, xin))
    out = fwd(x)
    out = jax.block_until_ready(out)
    assert out.shape == (2, 100), out.shape
    assert bool(jnp.all(jnp.isfinite(out)))
    print("KERNEL_OK")
</pallas_src>

<mosaic_0001>
module attributes {stable_mosaic.version = 11 : i64} {
  func.func @_matmul_bias_kernel(%arg0: i32, %arg1: i32, %arg2: i32, %arg3: memref<256x128xbf16, #tpu.memory_space<vmem>>, %arg4: memref<128x128xbf16, #tpu.memory_space<vmem>>, %arg5: memref<1x128xf32, #tpu.memory_space<vmem>>, %arg6: memref<256x128xf32, #tpu.memory_space<vmem>>, %arg7: memref<256x128xf32, #tpu.memory_space<vmem>>) attributes {dimension_semantics = [#tpu.dimension_semantics<parallel>, #tpu.dimension_semantics<parallel>, #tpu.dimension_semantics<arbitrary>], iteration_bounds = array<i64: 2, 1, 1>, scalar_prefetch = 0 : i64, scratch_operands = 1 : i64, tpu.core_type = #tpu.core_type<tc>, window_params = [{transform_indices = @transform_0, window_bounds = array<i64: 256, 128>}, {transform_indices = @transform_1, window_bounds = array<i64: 128, 128>}, {transform_indices = @transform_2, window_bounds = array<i64: 1, 128>}, {transform_indices = @transform_3, window_bounds = array<i64: 256, 128>}]} {
    %c0_i32 = arith.constant 0 : i32
    %0 = arith.cmpi eq, %arg2, %c0_i32 : i32
    %1 = arith.extui %0 : i1 to i32
    %c0_i32_0 = arith.constant 0 : i32
    %2 = arith.cmpi ne, %1, %c0_i32_0 : i32
    scf.if %2 {
      %cst_10 = arith.constant 0.000000e+00 : f32
      %12 = vector.broadcast %cst_10 : f32 to vector<256x128xf32>
      %c0_11 = arith.constant 0 : index
      %c0_12 = arith.constant 0 : index
      %13 = vector.load %arg7[%c0_11, %c0_12] : memref<256x128xf32, #tpu.memory_space<vmem>>, vector<256x128xf32>
      tpu.vector_store %arg7[%c0_11, %c0_12], %12 {strides = array<i32>} : memref<256x128xf32, #tpu.memory_space<vmem>>, vector<256x128xf32>,
    } else {
    }
    %c0 = arith.constant 0 : index
    %c0_1 = arith.constant 0 : index
    %3 = vector.load %arg7[%c0, %c0_1] : memref<256x128xf32, #tpu.memory_space<vmem>>, vector<256x128xf32>
    %c0_2 = arith.constant 0 : index
    %c0_3 = arith.constant 0 : index
    %4 = vector.load %arg3[%c0_2, %c0_3] : memref<256x128xbf16, #tpu.memory_space<vmem>>, vector<256x128xbf16>
    %c0_4 = arith.constant 0 : index
    %c0_5 = arith.constant 0 : index
    %5 = vector.load %arg4[%c0_4, %c0_5] : memref<128x128xbf16, #tpu.memory_space<vmem>>, vector<128x128xbf16>
    %cst = arith.constant dense<0.000000e+00> : vector<256x128xf32>
    %6 = tpu.matmul %4, %5, %cst {dimension_numbers = #tpu.dot_dimension_numbers<[1], [0], [0], [1], [0, 0, 1, 1], [], []>} : vector<256x128xbf16>, vector<128x128xbf16>, vector<256x128xf32> -> vector<256x128xf32>
    %7 = arith.addf %3, %6 : vector<256x128xf32>
    %c0_6 = arith.constant 0 : index
    %c0_7 = arith.constant 0 : index
    %8 = vector.load %arg7[%c0_6, %c0_7] : memref<256x128xf32, #tpu.memory_space<vmem>>, vector<256x128xf32>
    tpu.vector_store %arg7[%c0_6, %c0_7], %7 {strides = array<i32>} : memref<256x128xf32, #tpu.memory_space<vmem>>, vector<256x128xf32>,
    %c0_i32_8 = arith.constant 0 : i32
    %9 = arith.cmpi eq, %arg2, %c0_i32_8 : i32
    %10 = arith.extui %9 : i1 to i32
    %c0_i32_9 = arith.constant 0 : i32
    %11 = arith.cmpi ne, %10, %c0_i32_9 : i32
    scf.if %11 {
      %c0_10 = arith.constant 0 : index
      %c0_11 = arith.constant 0 : index
      %12 = vector.load %arg7[%c0_10, %c0_11] : memref<256x128xf32, #tpu.memory_space<vmem>>, vector<256x128xf32>
      %c0_12 = arith.constant 0 : index
      %c0_13 = arith.constant 0 : index
      %13 = vector.load %arg5[%c0_12, %c0_13] : memref<1x128xf32, #tpu.memory_space<vmem>>, vector<1x128xf32>
      %14 = vector.broadcast %13 : vector<1x128xf32> to vector<256x128xf32>
      %15 = arith.addf %12, %14 : vector<256x128xf32>
      %cst_14 = arith.constant 0.000000e+00 : f32
      %16 = vector.broadcast %cst_14 : f32 to vector<256x128xf32>
      %17 = arith.maximumf %15, %16 : vector<256x128xf32>
      %c0_15 = arith.constant 0 : index
      %c0_16 = arith.constant 0 : index
      %18 = vector.load %arg6[%c0_15, %c0_16] : memref<256x128xf32, #tpu.memory_space<vmem>>, vector<256x128xf32>
      tpu.vector_store %arg6[%c0_15, %c0_16], %17 {strides = array<i32>} : memref<256x128xf32, #tpu.memory_space<vmem>>, vector<256x128xf32>,
    } else {
    }
    return
  }
  func.func @transform_0(%arg0: i32, %arg1: i32, %arg2: i32) -> (i32, i32) {
    %c0_i32 = arith.constant 0 : i32
    return %arg0, %arg2 : i32, i32
  }
  func.func @transform_1(%arg0: i32, %arg1: i32, %arg2: i32) -> (i32, i32) {
    %c0_i32 = arith.constant 0 : i32
    return %arg2, %arg1 : i32, i32
  }
  func.func @transform_2(%arg0: i32, %arg1: i32, %arg2: i32) -> (i32, i32) {
    %c0_i32 = arith.constant 0 : i32
    %c0_i32_0 = arith.constant 0 : i32
    return %c0_i32, %arg1 : i32, i32
  }
  func.func @transform_3(%arg0: i32, %arg1: i32, %arg2: i32) -> (i32, i32) {
    %c0_i32 = arith.constant 0 : i32
    return %arg0, %arg1 : i32, i32
  }
}

module attributes {stable_mosaic.version = 11 : i64} {
  func.func @_matmul_bias_kernel(%arg0: i32, %arg1: i32, %arg2: i32, %arg3: memref<104x640xbf16, #tpu.memory_space<vmem>>, %arg4: memref<640x256xbf16, #tpu.memory_space<vmem>>, %arg5: memref<1x256xf32, #tpu.memory_space<vmem>>, %arg6: memref<104x256xf32, #tpu.memory_space<vmem>>, %arg7: memref<104x256xf32, #tpu.memory_space<vmem>>) attributes {dimension_semantics = [#tpu.dimension_semantics<parallel>, #tpu.dimension_semantics<parallel>, #tpu.dimension_semantics<arbitrary>], iteration_bounds = array<i64: 1, 1, 1>, scalar_prefetch = 0 : i64, scratch_operands = 1 : i64, tpu.core_type = #tpu.core_type<tc>, window_params = [{transform_indices = @transform_0, window_bounds = array<i64: 104, 640>}, {transform_indices = @transform_1, window_bounds = array<i64: 640, 256>}, {transform_indices = @transform_2, window_bounds = array<i64: 1, 256>}, {transform_indices = @transform_3, window_bounds = array<i64: 104, 256>}]} {
    %c0_i32 = arith.constant 0 : i32
    %0 = arith.cmpi eq, %arg2, %c0_i32 : i32
    %1 = arith.extui %0 : i1 to i32
    %c0_i32_0 = arith.constant 0 : i32
    %2 = arith.cmpi ne, %1, %c0_i32_0 : i32
    scf.if %2 {
      %cst_10 = arith.constant 0.000000e+00 : f32
      %12 = vector.broadcast %cst_10 : f32 to vector<104x256xf32>
      %c0_11 = arith.constant 0 : index
      %c0_12 = arith.constant 0 : index
      %13 = vector.load %arg7[%c0_11, %c0_12] : memref<104x256xf32, #tpu.memory_space<vmem>>, vector<104x256xf32>
      tpu.vector_store %arg7[%c0_11, %c0_12], %12 {strides = array<i32>} : memref<104x256xf32, #tpu.memory_space<vmem>>, vector<104x256xf32>,
    } else {
    }
    %c0 = arith.constant 0 : index
    %c0_1 = arith.constant 0 : index
    %3 = vector.load %arg7[%c0, %c0_1] : memref<104x256xf32, #tpu.memory_space<vmem>>, vector<104x256xf32>
    %c0_2 = arith.constant 0 : index
    %c0_3 = arith.constant 0 : index
    %4 = vector.load %arg3[%c0_2, %c0_3] : memref<104x640xbf16, #tpu.memory_space<vmem>>, vector<104x640xbf16>
    %c0_4 = arith.constant 0 : index
    %c0_5 = arith.constant 0 : index
    %5 = vector.load %arg4[%c0_4, %c0_5] : memref<640x256xbf16, #tpu.memory_space<vmem>>, vector<640x256xbf16>
    %cst = arith.constant dense<0.000000e+00> : vector<104x256xf32>
    %6 = tpu.matmul %4, %5, %cst {dimension_numbers = #tpu.dot_dimension_numbers<[1], [0], [0], [1], [0, 0, 1, 1], [], []>} : vector<104x640xbf16>, vector<640x256xbf16>, vector<104x256xf32> -> vector<104x256xf32>
    %7 = arith.addf %3, %6 : vector<104x256xf32>
    %c0_6 = arith.constant 0 : index
    %c0_7 = arith.constant 0 : index
    %8 = vector.load %arg7[%c0_6, %c0_7] : memref<104x256xf32, #tpu.memory_space<vmem>>, vector<104x256xf32>
    tpu.vector_store %arg7[%c0_6, %c0_7], %7 {strides = array<i32>} : memref<104x256xf32, #tpu.memory_space<vmem>>, vector<104x256xf32>,
    %c0_i32_8 = arith.constant 0 : i32
    %9 = arith.cmpi eq, %arg2, %c0_i32_8 : i32
    %10 = arith.extui %9 : i1 to i32
    %c0_i32_9 = arith.constant 0 : i32
    %11 = arith.cmpi ne, %10, %c0_i32_9 : i32
    scf.if %11 {
      %c0_10 = arith.constant 0 : index
      %c0_11 = arith.constant 0 : index
      %12 = vector.load %arg7[%c0_10, %c0_11] : memref<104x256xf32, #tpu.memory_space<vmem>>, vector<104x256xf32>
      %c0_12 = arith.constant 0 : index
      %c0_13 = arith.constant 0 : index
      %13 = vector.load %arg5[%c0_12, %c0_13] : memref<1x256xf32, #tpu.memory_space<vmem>>, vector<1x256xf32>
      %14 = vector.broadcast %13 : vector<1x256xf32> to vector<104x256xf32>
      %15 = arith.addf %12, %14 : vector<104x256xf32>
      %cst_14 = arith.constant 0.000000e+00 : f32
      %16 = vector.broadcast %cst_14 : f32 to vector<104x256xf32>
      %17 = arith.maximumf %15, %16 : vector<104x256xf32>
      %c0_15 = arith.constant 0 : index
      %c0_16 = arith.constant 0 : index
      %18 = vector.load %arg6[%c0_15, %c0_16] : memref<104x256xf32, #tpu.memory_space<vmem>>, vector<104x256xf32>
      tpu.vector_store %arg6[%c0_15, %c0_16], %17 {strides = array<i32>} : memref<104x256xf32, #tpu.memory_space<vmem>>, vector<104x256xf32>,
    } else {
    }
    return
  }
  func.func @transform_0(%arg0: i32, %arg1: i32, %arg2: i32) -> (i32, i32) {
    %c0_i32 = arith.constant 0 : i32
    return %arg0, %arg2 : i32, i32
  }
  func.func @transform_1(%arg0: i32, %arg1: i32, %arg2: i32) -> (i32, i32) {
    %c0_i32 = arith.constant 0 : i32
    return %arg2, %arg1 : i32, i32
  }
  func.func @transform_2(%arg0: i32, %arg1: i32, %arg2: i32) -> (i32, i32) {
    %c0_i32 = arith.constant 0 : i32
    %c0_i32_0 = arith.constant 0 : i32
    return %c0_i32, %arg1 : i32, i32
  }
  func.func @transform_3(%arg0: i32, %arg1: i32, %arg2: i32) -> (i32, i32) {
    %c0_i32 = arith.constant 0 : i32
    return %arg0, %arg1 : i32, i32
  }
}

module attributes {stable_mosaic.version = 11 : i64} {
  func.func @_matmul_bias_kernel(%arg0: i32, %arg1: i32, %arg2: i32, %arg3: memref<24x256xbf16, #tpu.memory_space<vmem>>, %arg4: memref<256x384xbf16, #tpu.memory_space<vmem>>, %arg5: memref<1x384xf32, #tpu.memory_space<vmem>>, %arg6: memref<24x384xf32, #tpu.memory_space<vmem>>, %arg7: memref<24x384xf32, #tpu.memory_space<vmem>>) attributes {dimension_semantics = [#tpu.dimension_semantics<parallel>, #tpu.dimension_semantics<parallel>, #tpu.dimension_semantics<arbitrary>], iteration_bounds = array<i64: 1, 1, 7>, scalar_prefetch = 0 : i64, scratch_operands = 1 : i64, tpu.core_type = #tpu.core_type<tc>, window_params = [{transform_indices = @transform_0, window_bounds = array<i64: 24, 256>}, {transform_indices = @transform_1, window_bounds = array<i64: 256, 384>}, {transform_indices = @transform_2, window_bounds = array<i64: 1, 384>}, {transform_indices = @transform_3, window_bounds = array<i64: 24, 384>}]} {
    %c0_i32 = arith.constant 0 : i32
    %0 = arith.cmpi eq, %arg2, %c0_i32 : i32
    %1 = arith.extui %0 : i1 to i32
    %c0_i32_0 = arith.constant 0 : i32
    %2 = arith.cmpi ne, %1, %c0_i32_0 : i32
    scf.if %2 {
      %cst_9 = arith.constant 0.000000e+00 : f32
      %12 = vector.broadcast %cst_9 : f32 to vector<24x384xf32>
      %c0_10 = arith.constant 0 : index
      %c0_11 = arith.constant 0 : index
      %13 = vector.load %arg7[%c0_10, %c0_11] : memref<24x384xf32, #tpu.memory_space<vmem>>, vector<24x384xf32>
      tpu.vector_store %arg7[%c0_10, %c0_11], %12 {strides = array<i32>} : memref<24x384xf32, #tpu.memory_space<vmem>>, vector<24x384xf32>,
    } else {
    }
    %c0 = arith.constant 0 : index
    %c0_1 = arith.constant 0 : index
    %3 = vector.load %arg7[%c0, %c0_1] : memref<24x384xf32, #tpu.memory_space<vmem>>, vector<24x384xf32>
    %c0_2 = arith.constant 0 : index
    %c0_3 = arith.constant 0 : index
    %4 = vector.load %arg3[%c0_2, %c0_3] : memref<24x256xbf16, #tpu.memory_space<vmem>>, vector<24x256xbf16>
    %c0_4 = arith.constant 0 : index
    %c0_5 = arith.constant 0 : index
    %5 = vector.load %arg4[%c0_4, %c0_5] : memref<256x384xbf16, #tpu.memory_space<vmem>>, vector<256x384xbf16>
    %cst = arith.constant dense<0.000000e+00> : vector<24x384xf32>
    %6 = tpu.matmul %4, %5, %cst {dimension_numbers = #tpu.dot_dimension_numbers<[1], [0], [0], [1], [0, 0, 1, 1], [], []>} : vector<24x256xbf16>, vector<256x384xbf16>, vector<24x384xf32> -> vector<24x384xf32>
    %7 = arith.addf %3, %6 : vector<24x384xf32>
    %c0_6 = arith.constant 0 : index
    %c0_7 = arith.constant 0 : index
    %8 = vector.load %arg7[%c0_6, %c0_7] : memref<24x384xf32, #tpu.memory_space<vmem>>, vector<24x384xf32>
    tpu.vector_store %arg7[%c0_6, %c0_7], %7 {strides = array<i32>} : memref<24x384xf32, #tpu.memory_space<vmem>>, vector<24x384xf32>,
    %c6_i32 = arith.constant 6 : i32
    %9 = arith.cmpi eq, %arg2, %c6_i32 : i32
    %10 = arith.extui %9 : i1 to i32
    %c0_i32_8 = arith.constant 0 : i32
    %11 = arith.cmpi ne, %10, %c0_i32_8 : i32
    scf.if %11 {
      %c0_9 = arith.constant 0 : index
      %c0_10 = arith.constant 0 : index
      %12 = vector.load %arg7[%c0_9, %c0_10] : memref<24x384xf32, #tpu.memory_space<vmem>>, vector<24x384xf32>
      %c0_11 = arith.constant 0 : index
      %c0_12 = arith.constant 0 : index
      %13 = vector.load %arg5[%c0_11, %c0_12] : memref<1x384xf32, #tpu.memory_space<vmem>>, vector<1x384xf32>
      %14 = vector.broadcast %13 : vector<1x384xf32> to vector<24x384xf32>
      %15 = arith.addf %12, %14 : vector<24x384xf32>
      %cst_13 = arith.constant 0.000000e+00 : f32
      %16 = vector.broadcast %cst_13 : f32 to vector<24x384xf32>
      %17 = arith.maximumf %15, %16 : vector<24x384xf32>
      %c0_14 = arith.constant 0 : index
      %c0_15 = arith.constant 0 : index
      %18 = vector.load %arg6[%c0_14, %c0_15] : memref<24x384xf32, #tpu.memory_space<vmem>>, vector<24x384xf32>
      tpu.vector_store %arg6[%c0_14, %c0_15], %17 {strides = array<i32>} : memref<24x384xf32, #tpu.memory_space<vmem>>, vector<24x384xf32>,
    } else {
    }
    return
  }
  func.func @transform_0(%arg0: i32, %arg1: i32, %arg2: i32) -> (i32, i32) {
    %c0_i32 = arith.constant 0 : i32
    return %arg0, %arg2 : i32, i32
  }
  func.func @transform_1(%arg0: i32, %arg1: i32, %arg2: i32) -> (i32, i32) {
    %c0_i32 = arith.constant 0 : i32
    return %arg2, %arg1 : i32, i32
  }
  func.func @transform_2(%arg0: i32, %arg1: i32, %arg2: i32) -> (i32, i32) {
    %c0_i32 = arith.constant 0 : i32
    %c0_i32_0 = arith.constant 0 : i32
    return %c0_i32, %arg1 : i32, i32
  }
  func.func @transform_3(%arg0: i32, %arg1: i32, %arg2: i32) -> (i32, i32) {
    %c0_i32 = arith.constant 0 : i32
    return %arg0, %arg1 : i32, i32
  }
}

module attributes {stable_mosaic.version = 11 : i64} {
  func.func @_matmul_bias_kernel(%arg0: i32, %arg1: i32, %arg2: i32, %arg3: memref<24x384xbf16, #tpu.memory_space<vmem>>, %arg4: memref<384x256xbf16, #tpu.memory_space<vmem>>, %arg5: memref<1x256xf32, #tpu.memory_space<vmem>>, %arg6: memref<24x256xf32, #tpu.memory_space<vmem>>, %arg7: memref<24x256xf32, #tpu.memory_space<vmem>>) attributes {dimension_semantics = [#tpu.dimension_semantics<parallel>, #tpu.dimension_semantics<parallel>, #tpu.dimension_semantics<arbitrary>], iteration_bounds = array<i64: 1, 1, 9>, scalar_prefetch = 0 : i64, scratch_operands = 1 : i64, tpu.core_type = #tpu.core_type<tc>, window_params = [{transform_indices = @transform_0, window_bounds = array<i64: 24, 384>}, {transform_indices = @transform_1, window_bounds = array<i64: 384, 256>}, {transform_indices = @transform_2, window_bounds = array<i64: 1, 256>}, {transform_indices = @transform_3, window_bounds = array<i64: 24, 256>}]} {
    %c0_i32 = arith.constant 0 : i32
    %0 = arith.cmpi eq, %arg2, %c0_i32 : i32
    %1 = arith.extui %0 : i1 to i32
    %c0_i32_0 = arith.constant 0 : i32
    %2 = arith.cmpi ne, %1, %c0_i32_0 : i32
    scf.if %2 {
      %cst_9 = arith.constant 0.000000e+00 : f32
      %12 = vector.broadcast %cst_9 : f32 to vector<24x256xf32>
      %c0_10 = arith.constant 0 : index
      %c0_11 = arith.constant 0 : index
      %13 = vector.load %arg7[%c0_10, %c0_11] : memref<24x256xf32, #tpu.memory_space<vmem>>, vector<24x256xf32>
      tpu.vector_store %arg7[%c0_10, %c0_11], %12 {strides = array<i32>} : memref<24x256xf32, #tpu.memory_space<vmem>>, vector<24x256xf32>,
    } else {
    }
    %c0 = arith.constant 0 : index
    %c0_1 = arith.constant 0 : index
    %3 = vector.load %arg7[%c0, %c0_1] : memref<24x256xf32, #tpu.memory_space<vmem>>, vector<24x256xf32>
    %c0_2 = arith.constant 0 : index
    %c0_3 = arith.constant 0 : index
    %4 = vector.load %arg3[%c0_2, %c0_3] : memref<24x384xbf16, #tpu.memory_space<vmem>>, vector<24x384xbf16>
    %c0_4 = arith.constant 0 : index
    %c0_5 = arith.constant 0 : index
    %5 = vector.load %arg4[%c0_4, %c0_5] : memref<384x256xbf16, #tpu.memory_space<vmem>>, vector<384x256xbf16>
    %cst = arith.constant dense<0.000000e+00> : vector<24x256xf32>
    %6 = tpu.matmul %4, %5, %cst {dimension_numbers = #tpu.dot_dimension_numbers<[1], [0], [0], [1], [0, 0, 1, 1], [], []>} : vector<24x384xbf16>, vector<384x256xbf16>, vector<24x256xf32> -> vector<24x256xf32>
    %7 = arith.addf %3, %6 : vector<24x256xf32>
    %c0_6 = arith.constant 0 : index
    %c0_7 = arith.constant 0 : index
    %8 = vector.load %arg7[%c0_6, %c0_7] : memref<24x256xf32, #tpu.memory_space<vmem>>, vector<24x256xf32>
    tpu.vector_store %arg7[%c0_6, %c0_7], %7 {strides = array<i32>} : memref<24x256xf32, #tpu.memory_space<vmem>>, vector<24x256xf32>,
    %c8_i32 = arith.constant 8 : i32
    %9 = arith.cmpi eq, %arg2, %c8_i32 : i32
    %10 = arith.extui %9 : i1 to i32
    %c0_i32_8 = arith.constant 0 : i32
    %11 = arith.cmpi ne, %10, %c0_i32_8 : i32
    scf.if %11 {
      %c0_9 = arith.constant 0 : index
      %c0_10 = arith.constant 0 : index
      %12 = vector.load %arg7[%c0_9, %c0_10] : memref<24x256xf32, #tpu.memory_space<vmem>>, vector<24x256xf32>
      %c0_11 = arith.constant 0 : index
      %c0_12 = arith.constant 0 : index
      %13 = vector.load %arg5[%c0_11, %c0_12] : memref<1x256xf32, #tpu.memory_space<vmem>>, vector<1x256xf32>
      %14 = vector.broadcast %13 : vector<1x256xf32> to vector<24x256xf32>
      %15 = arith.addf %12, %14 : vector<24x256xf32>
      %cst_13 = arith.constant 0.000000e+00 : f32
      %16 = vector.broadcast %cst_13 : f32 to vector<24x256xf32>
      %17 = arith.maximumf %15, %16 : vector<24x256xf32>
      %c0_14 = arith.constant 0 : index
      %c0_15 = arith.constant 0 : index
      %18 = vector.load %arg6[%c0_14, %c0_15] : memref<24x256xf32, #tpu.memory_space<vmem>>, vector<24x256xf32>
      tpu.vector_store %arg6[%c0_14, %c0_15], %17 {strides = array<i32>} : memref<24x256xf32, #tpu.memory_space<vmem>>, vector<24x256xf32>,
    } else {
    }
    return
  }
  func.func @transform_0(%arg0: i32, %arg1: i32, %arg2: i32) -> (i32, i32) {
    %c0_i32 = arith.constant 0 : i32
    return %arg0, %arg2 : i32, i32
  }
  func.func @transform_1(%arg0: i32, %arg1: i32, %arg2: i32) -> (i32, i32) {
    %c0_i32 = arith.constant 0 : i32
    return %arg2, %arg1 : i32, i32
  }
  func.func @transform_2(%arg0: i32, %arg1: i32, %arg2: i32) -> (i32, i32) {
    %c0_i32 = arith.constant 0 : i32
    %c0_i32_0 = arith.constant 0 : i32
    return %c0_i32, %arg1 : i32, i32
  }
  func.func @transform_3(%arg0: i32, %arg1: i32, %arg2: i32) -> (i32, i32) {
    %c0_i32 = arith.constant 0 : i32
    return %arg0, %arg1 : i32, i32
  }
}

module attributes {stable_mosaic.version = 11 : i64} {
  func.func @_matmul_bias_kernel(%arg0: i32, %arg1: i32, %arg2: i32, %arg3: memref<24x384xbf16, #tpu.memory_space<vmem>>, %arg4: memref<384x256xbf16, #tpu.memory_space<vmem>>, %arg5: memref<1x256xf32, #tpu.memory_space<vmem>>, %arg6: memref<24x256xf32, #tpu.memory_space<vmem>>, %arg7: memref<24x256xf32, #tpu.memory_space<vmem>>) attributes {dimension_semantics = [#tpu.dimension_semantics<parallel>, #tpu.dimension_semantics<parallel>, #tpu.dimension_semantics<arbitrary>], iteration_bounds = array<i64: 1, 1, 6>, scalar_prefetch = 0 : i64, scratch_operands = 1 : i64, tpu.core_type = #tpu.core_type<tc>, window_params = [{transform_indices = @transform_0, window_bounds = array<i64: 24, 384>}, {transform_indices = @transform_1, window_bounds = array<i64: 384, 256>}, {transform_indices = @transform_2, window_bounds = array<i64: 1, 256>}, {transform_indices = @transform_3, window_bounds = array<i64: 24, 256>}]} {
    %c0_i32 = arith.constant 0 : i32
    %0 = arith.cmpi eq, %arg2, %c0_i32 : i32
    %1 = arith.extui %0 : i1 to i32
    %c0_i32_0 = arith.constant 0 : i32
    %2 = arith.cmpi ne, %1, %c0_i32_0 : i32
    scf.if %2 {
      %cst_9 = arith.constant 0.000000e+00 : f32
      %12 = vector.broadcast %cst_9 : f32 to vector<24x256xf32>
      %c0_10 = arith.constant 0 : index
      %c0_11 = arith.constant 0 : index
      %13 = vector.load %arg7[%c0_10, %c0_11] : memref<24x256xf32, #tpu.memory_space<vmem>>, vector<24x256xf32>
      tpu.vector_store %arg7[%c0_10, %c0_11], %12 {strides = array<i32>} : memref<24x256xf32, #tpu.memory_space<vmem>>, vector<24x256xf32>,
    } else {
    }
    %c0 = arith.constant 0 : index
    %c0_1 = arith.constant 0 : index
    %3 = vector.load %arg7[%c0, %c0_1] : memref<24x256xf32, #tpu.memory_space<vmem>>, vector<24x256xf32>
    %c0_2 = arith.constant 0 : index
    %c0_3 = arith.constant 0 : index
    %4 = vector.load %arg3[%c0_2, %c0_3] : memref<24x384xbf16, #tpu.memory_space<vmem>>, vector<24x384xbf16>
    %c0_4 = arith.constant 0 : index
    %c0_5 = arith.constant 0 : index
    %5 = vector.load %arg4[%c0_4, %c0_5] : memref<384x256xbf16, #tpu.memory_space<vmem>>, vector<384x256xbf16>
    %cst = arith.constant dense<0.000000e+00> : vector<24x256xf32>
    %6 = tpu.matmul %4, %5, %cst {dimension_numbers = #tpu.dot_dimension_numbers<[1], [0], [0], [1], [0, 0, 1, 1], [], []>} : vector<24x384xbf16>, vector<384x256xbf16>, vector<24x256xf32> -> vector<24x256xf32>
    %7 = arith.addf %3, %6 : vector<24x256xf32>
    %c0_6 = arith.constant 0 : index
    %c0_7 = arith.constant 0 : index
    %8 = vector.load %arg7[%c0_6, %c0_7] : memref<24x256xf32, #tpu.memory_space<vmem>>, vector<24x256xf32>
    tpu.vector_store %arg7[%c0_6, %c0_7], %7 {strides = array<i32>} : memref<24x256xf32, #tpu.memory_space<vmem>>, vector<24x256xf32>,
    %c5_i32 = arith.constant 5 : i32
    %9 = arith.cmpi eq, %arg2, %c5_i32 : i32
    %10 = arith.extui %9 : i1 to i32
    %c0_i32_8 = arith.constant 0 : i32
    %11 = arith.cmpi ne, %10, %c0_i32_8 : i32
    scf.if %11 {
      %c0_9 = arith.constant 0 : index
      %c0_10 = arith.constant 0 : index
      %12 = vector.load %arg7[%c0_9, %c0_10] : memref<24x256xf32, #tpu.memory_space<vmem>>, vector<24x256xf32>
      %c0_11 = arith.constant 0 : index
      %c0_12 = arith.constant 0 : index
      %13 = vector.load %arg5[%c0_11, %c0_12] : memref<1x256xf32, #tpu.memory_space<vmem>>, vector<1x256xf32>
      %14 = vector.broadcast %13 : vector<1x256xf32> to vector<24x256xf32>
      %15 = arith.addf %12, %14 : vector<24x256xf32>
      %cst_13 = arith.constant 0.000000e+00 : f32
      %16 = vector.broadcast %cst_13 : f32 to vector<24x256xf32>
      %17 = arith.maximumf %15, %16 : vector<24x256xf32>
      %c0_14 = arith.constant 0 : index
      %c0_15 = arith.constant 0 : index
      %18 = vector.load %arg6[%c0_14, %c0_15] : memref<24x256xf32, #tpu.memory_space<vmem>>, vector<24x256xf32>
      tpu.vector_store %arg6[%c0_14, %c0_15], %17 {strides = array<i32>} : memref<24x256xf32, #tpu.memory_space<vmem>>, vector<24x256xf32>,
    } else {
    }
    return
  }
  func.func @transform_0(%arg0: i32, %arg1: i32, %arg2: i32) -> (i32, i32) {
    %c0_i32 = arith.constant 0 : i32
    return %arg0, %arg2 : i32, i32
  }
  func.func @transform_1(%arg0: i32, %arg1: i32, %arg2: i32) -> (i32, i32) {
    %c0_i32 = arith.constant 0 : i32
    return %arg2, %arg1 : i32, i32
  }
  func.func @transform_2(%arg0: i32, %arg1: i32, %arg2: i32) -> (i32, i32) {
    %c0_i32 = arith.constant 0 : i32
    %c0_i32_0 = arith.constant 0 : i32
    return %c0_i32, %arg1 : i32, i32
  }
  func.func @transform_3(%arg0: i32, %arg1: i32, %arg2: i32) -> (i32, i32) {
    %c0_i32 = arith.constant 0 : i32
    return %arg0, %arg1 : i32, i32
  }
}

module attributes {stable_mosaic.version = 11 : i64} {
  func.func @_matmul_bias_kernel(%arg0: i32, %arg1: i32, %arg2: i32, %arg3: memref<8x256xbf16, #tpu.memory_space<vmem>>, %arg4: memref<256x512xbf16, #tpu.memory_space<vmem>>, %arg5: memref<1x512xf32, #tpu.memory_space<vmem>>, %arg6: memref<8x512xf32, #tpu.memory_space<vmem>>, %arg7: memref<8x512xf32, #tpu.memory_space<vmem>>) attributes {dimension_semantics = [#tpu.dimension_semantics<parallel>, #tpu.dimension_semantics<parallel>, #tpu.dimension_semantics<arbitrary>], iteration_bounds = array<i64: 1, 8, 1>, scalar_prefetch = 0 : i64, scratch_operands = 1 : i64, tpu.core_type = #tpu.core_type<tc>, window_params = [{transform_indices = @transform_0, window_bounds = array<i64: 8, 256>}, {transform_indices = @transform_1, window_bounds = array<i64: 256, 512>}, {transform_indices = @transform_2, window_bounds = array<i64: 1, 512>}, {transform_indices = @transform_3, window_bounds = array<i64: 8, 512>}]} {
    %c0_i32 = arith.constant 0 : i32
    %0 = arith.cmpi eq, %arg2, %c0_i32 : i32
    %1 = arith.extui %0 : i1 to i32
    %c0_i32_0 = arith.constant 0 : i32
    %2 = arith.cmpi ne, %1, %c0_i32_0 : i32
    scf.if %2 {
      %cst_10 = arith.constant 0.000000e+00 : f32
      %12 = vector.broadcast %cst_10 : f32 to vector<8x512xf32>
      %c0_11 = arith.constant 0 : index
      %c0_12 = arith.constant 0 : index
      %13 = vector.load %arg7[%c0_11, %c0_12] : memref<8x512xf32, #tpu.memory_space<vmem>>, vector<8x512xf32>
      tpu.vector_store %arg7[%c0_11, %c0_12], %12 {strides = array<i32>} : memref<8x512xf32, #tpu.memory_space<vmem>>, vector<8x512xf32>,
    } else {
    }
    %c0 = arith.constant 0 : index
    %c0_1 = arith.constant 0 : index
    %3 = vector.load %arg7[%c0, %c0_1] : memref<8x512xf32, #tpu.memory_space<vmem>>, vector<8x512xf32>
    %c0_2 = arith.constant 0 : index
    %c0_3 = arith.constant 0 : index
    %4 = vector.load %arg3[%c0_2, %c0_3] : memref<8x256xbf16, #tpu.memory_space<vmem>>, vector<8x256xbf16>
    %c0_4 = arith.constant 0 : index
    %c0_5 = arith.constant 0 : index
    %5 = vector.load %arg4[%c0_4, %c0_5] : memref<256x512xbf16, #tpu.memory_space<vmem>>, vector<256x512xbf16>
    %cst = arith.constant dense<0.000000e+00> : vector<8x512xf32>
    %6 = tpu.matmul %4, %5, %cst {dimension_numbers = #tpu.dot_dimension_numbers<[1], [0], [0], [1], [0, 0, 1, 1], [], []>} : vector<8x256xbf16>, vector<256x512xbf16>, vector<8x512xf32> -> vector<8x512xf32>
    %7 = arith.addf %3, %6 : vector<8x512xf32>
    %c0_6 = arith.constant 0 : index
    %c0_7 = arith.constant 0 : index
    %8 = vector.load %arg7[%c0_6, %c0_7] : memref<8x512xf32, #tpu.memory_space<vmem>>, vector<8x512xf32>
    tpu.vector_store %arg7[%c0_6, %c0_7], %7 {strides = array<i32>} : memref<8x512xf32, #tpu.memory_space<vmem>>, vector<8x512xf32>,
    %c0_i32_8 = arith.constant 0 : i32
    %9 = arith.cmpi eq, %arg2, %c0_i32_8 : i32
    %10 = arith.extui %9 : i1 to i32
    %c0_i32_9 = arith.constant 0 : i32
    %11 = arith.cmpi ne, %10, %c0_i32_9 : i32
    scf.if %11 {
      %c0_10 = arith.constant 0 : index
      %c0_11 = arith.constant 0 : index
      %12 = vector.load %arg7[%c0_10, %c0_11] : memref<8x512xf32, #tpu.memory_space<vmem>>, vector<8x512xf32>
      %c0_12 = arith.constant 0 : index
      %c0_13 = arith.constant 0 : index
      %13 = vector.load %arg5[%c0_12, %c0_13] : memref<1x512xf32, #tpu.memory_space<vmem>>, vector<1x512xf32>
      %14 = vector.broadcast %13 : vector<1x512xf32> to vector<8x512xf32>
      %15 = arith.addf %12, %14 : vector<8x512xf32>
      %cst_14 = arith.constant 0.000000e+00 : f32
      %16 = vector.broadcast %cst_14 : f32 to vector<8x512xf32>
      %17 = arith.maximumf %15, %16 : vector<8x512xf32>
      %c0_15 = arith.constant 0 : index
      %c0_16 = arith.constant 0 : index
      %18 = vector.load %arg6[%c0_15, %c0_16] : memref<8x512xf32, #tpu.memory_space<vmem>>, vector<8x512xf32>
      tpu.vector_store %arg6[%c0_15, %c0_16], %17 {strides = array<i32>} : memref<8x512xf32, #tpu.memory_space<vmem>>, vector<8x512xf32>,
    } else {
    }
    return
  }
  func.func @transform_0(%arg0: i32, %arg1: i32, %arg2: i32) -> (i32, i32) {
    %c0_i32 = arith.constant 0 : i32
    return %arg0, %arg2 : i32, i32
  }
  func.func @transform_1(%arg0: i32, %arg1: i32, %arg2: i32) -> (i32, i32) {
    %c0_i32 = arith.constant 0 : i32
    return %arg2, %arg1 : i32, i32
  }
  func.func @transform_2(%arg0: i32, %arg1: i32, %arg2: i32) -> (i32, i32) {
    %c0_i32 = arith.constant 0 : i32
    %c0_i32_0 = arith.constant 0 : i32
    return %c0_i32, %arg1 : i32, i32
  }
  func.func @transform_3(%arg0: i32, %arg1: i32, %arg2: i32) -> (i32, i32) {
    %c0_i32 = arith.constant 0 : i32
    return %arg0, %arg1 : i32, i32
  }
}

module attributes {stable_mosaic.version = 11 : i64} {
  func.func @_matmul_bias_kernel(%arg0: i32, %arg1: i32, %arg2: i32, %arg3: memref<8x512xbf16, #tpu.memory_space<vmem>>, %arg4: memref<512x512xbf16, #tpu.memory_space<vmem>>, %arg5: memref<1x512xf32, #tpu.memory_space<vmem>>, %arg6: memref<8x512xf32, #tpu.memory_space<vmem>>, %arg7: memref<8x512xf32, #tpu.memory_space<vmem>>) attributes {dimension_semantics = [#tpu.dimension_semantics<parallel>, #tpu.dimension_semantics<parallel>, #tpu.dimension_semantics<arbitrary>], iteration_bounds = array<i64: 1, 8, 8>, scalar_prefetch = 0 : i64, scratch_operands = 1 : i64, tpu.core_type = #tpu.core_type<tc>, window_params = [{transform_indices = @transform_0, window_bounds = array<i64: 8, 512>}, {transform_indices = @transform_1, window_bounds = array<i64: 512, 512>}, {transform_indices = @transform_2, window_bounds = array<i64: 1, 512>}, {transform_indices = @transform_3, window_bounds = array<i64: 8, 512>}]} {
    %c0_i32 = arith.constant 0 : i32
    %0 = arith.cmpi eq, %arg2, %c0_i32 : i32
    %1 = arith.extui %0 : i1 to i32
    %c0_i32_0 = arith.constant 0 : i32
    %2 = arith.cmpi ne, %1, %c0_i32_0 : i32
    scf.if %2 {
      %cst_9 = arith.constant 0.000000e+00 : f32
      %12 = vector.broadcast %cst_9 : f32 to vector<8x512xf32>
      %c0_10 = arith.constant 0 : index
      %c0_11 = arith.constant 0 : index
      %13 = vector.load %arg7[%c0_10, %c0_11] : memref<8x512xf32, #tpu.memory_space<vmem>>, vector<8x512xf32>
      tpu.vector_store %arg7[%c0_10, %c0_11], %12 {strides = array<i32>} : memref<8x512xf32, #tpu.memory_space<vmem>>, vector<8x512xf32>,
    } else {
    }
    %c0 = arith.constant 0 : index
    %c0_1 = arith.constant 0 : index
    %3 = vector.load %arg7[%c0, %c0_1] : memref<8x512xf32, #tpu.memory_space<vmem>>, vector<8x512xf32>
    %c0_2 = arith.constant 0 : index
    %c0_3 = arith.constant 0 : index
    %4 = vector.load %arg3[%c0_2, %c0_3] : memref<8x512xbf16, #tpu.memory_space<vmem>>, vector<8x512xbf16>
    %c0_4 = arith.constant 0 : index
    %c0_5 = arith.constant 0 : index
    %5 = vector.load %arg4[%c0_4, %c0_5] : memref<512x512xbf16, #tpu.memory_space<vmem>>, vector<512x512xbf16>
    %cst = arith.constant dense<0.000000e+00> : vector<8x512xf32>
    %6 = tpu.matmul %4, %5, %cst {dimension_numbers = #tpu.dot_dimension_numbers<[1], [0], [0], [1], [0, 0, 1, 1], [], []>} : vector<8x512xbf16>, vector<512x512xbf16>, vector<8x512xf32> -> vector<8x512xf32>
    %7 = arith.addf %3, %6 : vector<8x512xf32>
    %c0_6 = arith.constant 0 : index
    %c0_7 = arith.constant 0 : index
    %8 = vector.load %arg7[%c0_6, %c0_7] : memref<8x512xf32, #tpu.memory_space<vmem>>, vector<8x512xf32>
    tpu.vector_store %arg7[%c0_6, %c0_7], %7 {strides = array<i32>} : memref<8x512xf32, #tpu.memory_space<vmem>>, vector<8x512xf32>,
    %c7_i32 = arith.constant 7 : i32
    %9 = arith.cmpi eq, %arg2, %c7_i32 : i32
    %10 = arith.extui %9 : i1 to i32
    %c0_i32_8 = arith.constant 0 : i32
    %11 = arith.cmpi ne, %10, %c0_i32_8 : i32
    scf.if %11 {
      %c0_9 = arith.constant 0 : index
      %c0_10 = arith.constant 0 : index
      %12 = vector.load %arg7[%c0_9, %c0_10] : memref<8x512xf32, #tpu.memory_space<vmem>>, vector<8x512xf32>
      %c0_11 = arith.constant 0 : index
      %c0_12 = arith.constant 0 : index
      %13 = vector.load %arg5[%c0_11, %c0_12] : memref<1x512xf32, #tpu.memory_space<vmem>>, vector<1x512xf32>
      %14 = vector.broadcast %13 : vector<1x512xf32> to vector<8x512xf32>
      %15 = arith.addf %12, %14 : vector<8x512xf32>
      %cst_13 = arith.constant 0.000000e+00 : f32
      %16 = vector.broadcast %cst_13 : f32 to vector<8x512xf32>
      %17 = arith.maximumf %15, %16 : vector<8x512xf32>
      %c0_14 = arith.constant 0 : index
      %c0_15 = arith.constant 0 : index
      %18 = vector.load %arg6[%c0_14, %c0_15] : memref<8x512xf32, #tpu.memory_space<vmem>>, vector<8x512xf32>
      tpu.vector_store %arg6[%c0_14, %c0_15], %17 {strides = array<i32>} : memref<8x512xf32, #tpu.memory_space<vmem>>, vector<8x512xf32>,
    } else {
    }
    return
  }
  func.func @transform_0(%arg0: i32, %arg1: i32, %arg2: i32) -> (i32, i32) {
    %c0_i32 = arith.constant 0 : i32
    return %arg0, %arg2 : i32, i32
  }
  func.func @transform_1(%arg0: i32, %arg1: i32, %arg2: i32) -> (i32, i32) {
    %c0_i32 = arith.constant 0 : i32
    return %arg2, %arg1 : i32, i32
  }
  func.func @transform_2(%arg0: i32, %arg1: i32, %arg2: i32) -> (i32, i32) {
    %c0_i32 = arith.constant 0 : i32
    %c0_i32_0 = arith.constant 0 : i32
    return %c0_i32, %arg1 : i32, i32
  }
  func.func @transform_3(%arg0: i32, %arg1: i32, %arg2: i32) -> (i32, i32) {
    %c0_i32 = arith.constant 0 : i32
    return %arg0, %arg1 : i32, i32
  }
}

module attributes {stable_mosaic.version = 11 : i64} {
  func.func @_matmul_bias_kernel(%arg0: i32, %arg1: i32, %arg2: i32, %arg3: memref<8x512xbf16, #tpu.memory_space<vmem>>, %arg4: memref<512x128xbf16, #tpu.memory_space<vmem>>, %arg5: memref<1x128xf32, #tpu.memory_space<vmem>>, %arg6: memref<8x128xf32, #tpu.memory_space<vmem>>, %arg7: memref<8x128xf32, #tpu.memory_space<vmem>>) attributes {dimension_semantics = [#tpu.dimension_semantics<parallel>, #tpu.dimension_semantics<parallel>, #tpu.dimension_semantics<arbitrary>], iteration_bounds = array<i64: 1, 1, 8>, scalar_prefetch = 0 : i64, scratch_operands = 1 : i64, tpu.core_type = #tpu.core_type<tc>, window_params = [{transform_indices = @transform_0, window_bounds = array<i64: 8, 512>}, {transform_indices = @transform_1, window_bounds = array<i64: 512, 128>}, {transform_indices = @transform_2, window_bounds = array<i64: 1, 128>}, {transform_indices = @transform_3, window_bounds = array<i64: 8, 128>}]} {
    %c0_i32 = arith.constant 0 : i32
    %0 = arith.cmpi eq, %arg2, %c0_i32 : i32
    %1 = arith.extui %0 : i1 to i32
    %c0_i32_0 = arith.constant 0 : i32
    %2 = arith.cmpi ne, %1, %c0_i32_0 : i32
    scf.if %2 {
      %cst_9 = arith.constant 0.000000e+00 : f32
      %12 = vector.broadcast %cst_9 : f32 to vector<8x128xf32>
      %c0_10 = arith.constant 0 : index
      %c0_11 = arith.constant 0 : index
      %13 = vector.load %arg7[%c0_10, %c0_11] : memref<8x128xf32, #tpu.memory_space<vmem>>, vector<8x128xf32>
      tpu.vector_store %arg7[%c0_10, %c0_11], %12 {strides = array<i32>} : memref<8x128xf32, #tpu.memory_space<vmem>>, vector<8x128xf32>,
    } else {
    }
    %c0 = arith.constant 0 : index
    %c0_1 = arith.constant 0 : index
    %3 = vector.load %arg7[%c0, %c0_1] : memref<8x128xf32, #tpu.memory_space<vmem>>, vector<8x128xf32>
    %c0_2 = arith.constant 0 : index
    %c0_3 = arith.constant 0 : index
    %4 = vector.load %arg3[%c0_2, %c0_3] : memref<8x512xbf16, #tpu.memory_space<vmem>>, vector<8x512xbf16>
    %c0_4 = arith.constant 0 : index
    %c0_5 = arith.constant 0 : index
    %5 = vector.load %arg4[%c0_4, %c0_5] : memref<512x128xbf16, #tpu.memory_space<vmem>>, vector<512x128xbf16>
    %cst = arith.constant dense<0.000000e+00> : vector<8x128xf32>
    %6 = tpu.matmul %4, %5, %cst {dimension_numbers = #tpu.dot_dimension_numbers<[1], [0], [0], [1], [0, 0, 1, 1], [], []>} : vector<8x512xbf16>, vector<512x128xbf16>, vector<8x128xf32> -> vector<8x128xf32>
    %7 = arith.addf %3, %6 : vector<8x128xf32>
    %c0_6 = arith.constant 0 : index
    %c0_7 = arith.constant 0 : index
    %8 = vector.load %arg7[%c0_6, %c0_7] : memref<8x128xf32, #tpu.memory_space<vmem>>, vector<8x128xf32>
    tpu.vector_store %arg7[%c0_6, %c0_7], %7 {strides = array<i32>} : memref<8x128xf32, #tpu.memory_space<vmem>>, vector<8x128xf32>,
    %c7_i32 = arith.constant 7 : i32
    %9 = arith.cmpi eq, %arg2, %c7_i32 : i32
    %10 = arith.extui %9 : i1 to i32
    %c0_i32_8 = arith.constant 0 : i32
    %11 = arith.cmpi ne, %10, %c0_i32_8 : i32
    scf.if %11 {
      %c0_9 = arith.constant 0 : index
      %c0_10 = arith.constant 0 : index
      %12 = vector.load %arg7[%c0_9, %c0_10] : memref<8x128xf32, #tpu.memory_space<vmem>>, vector<8x128xf32>
      %c0_11 = arith.constant 0 : index
      %c0_12 = arith.constant 0 : index
      %13 = vector.load %arg5[%c0_11, %c0_12] : memref<1x128xf32, #tpu.memory_space<vmem>>, vector<1x128xf32>
      %14 = vector.broadcast %13 : vector<1x128xf32> to vector<8x128xf32>
      %15 = arith.addf %12, %14 : vector<8x128xf32>
      %c0_13 = arith.constant 0 : index
      %c0_14 = arith.constant 0 : index
      %16 = vector.load %arg6[%c0_13, %c0_14] : memref<8x128xf32, #tpu.memory_space<vmem>>, vector<8x128xf32>
      tpu.vector_store %arg6[%c0_13, %c0_14], %15 {strides = array<i32>} : memref<8x128xf32, #tpu.memory_space<vmem>>, vector<8x128xf32>,
    } else {
    }
    return
  }
  func.func @transform_0(%arg0: i32, %arg1: i32, %arg2: i32) -> (i32, i32) {
    %c0_i32 = arith.constant 0 : i32
    return %arg0, %arg2 : i32, i32
  }
  func.func @transform_1(%arg0: i32, %arg1: i32, %arg2: i32) -> (i32, i32) {
    %c0_i32 = arith.constant 0 : i32
    return %arg2, %arg1 : i32, i32
  }
  func.func @transform_2(%arg0: i32, %arg1: i32, %arg2: i32) -> (i32, i32) {
    %c0_i32 = arith.constant 0 : i32
    %c0_i32_0 = arith.constant 0 : i32
    return %c0_i32, %arg1 : i32, i32
  }
  func.func @transform_3(%arg0: i32, %arg1: i32, %arg2: i32) -> (i32, i32) {
    %c0_i32 = arith.constant 0 : i32
    return %arg0, %arg1 : i32, i32
  }
}

</mosaic_0001>

<bundles_post_ra>
// kernel: _lambda_.8
= control target key start
LH: loop header
LB: loop body
LE: loop exit
PB: predicated region body
PF: predicated region fallthrough
CT: control target
= control target key end

     0   :  { %s1212_s12 = smov 0   ;;  %s1214_s13 = smov 0   ;;  %s1362_s0 = inlined_call_operand.vmem [shape: bf16[512,128], index: 0, kind: input, shape index: {}]   ;;  %s1363_s1 = inlined_call_operand.vmem [shape: bf16[128,128], index: 1, kind: input, shape index: {}]   ;;  %s1364_s2 = inlined_call_operand.vmem [shape: f32[1,128], index: 2, kind: input, shape index: {}]   ;;  %s1365_s3 = inlined_call_operand.vmem [shape: f32[512,128], index: 3, kind: output, shape index: {}]  }
   0x1   :  { %s1216_s14 = smov 0  }
   0x2 LB: > { %s32_s15 = sadd.s32 1, %s1186_s13  ;;  %p1000_p0 = scmp.ge.s32.totalorder %s1190_s14, 1  ;;  %s1190_s14 = sphi %s1216_s14, %s13_s14   ;;  %s1186_s13 = sphi %s1214_s13, %s1367_s13   ;;  %s1182_s12 = sphi %s1212_s12, %s1366_s12  }
   0x3   : > { %p34_p1 = scmp.ge.s32.totalorder %s32_s15, 2  ;;  %p188_p2 = scmp.lt.s32.totalorder %s1190_s14, 3 }
   0x5   : > { %s1369_s15 = smov (%p34_p1, %s32_s15), 0  ;;  %p189_p3 = pnand %p1000_p0, %p188_p2 }
   0x6   : > { %v1144_v0 = vld [vmem:[%s1363_s1] sm:$0xff] (!%p189_p3)   ;;  %s1001_s18 = sshll.u32 (!%p189_p3), %s1182_s12, 5  ;;  %v1145_v1 = vld [vmem:[%s1363_s1 + $0x8] sm:$0xff] (!%p189_p3)   ;;  %v1146_v2 = vld [vmem:[%s1363_s1 + $0x10] sm:$0xff] (!%p189_p3)  }
   0x7   : > { %192 = sbr.rel (%p189_p3) target bundleno = 283 (0x11b), region = 32  ;;  %p230_p4 = scmp.lt.s32.totalorder (!%p189_p3), %s1001_s18, 63  ;;  %1056 = vmatprep.subr.bf16.mxu0 (!%p189_p3), %v1144_v0  ;;  %1104 = vmatprep.subr.bf16.mxu1 (!%p189_p3), %v1144_v0  ;;  %v1147_v3 = vld [vmem:[%s1363_s1 + $0x18] sm:$0xff] (!%p189_p3)   ;;  %v1148_v6 = vld [vmem:[%s1363_s1 + $0x20] sm:$0xff] (!%p189_p3)   ;;  %v1149_v7 = vld [vmem:[%s1363_s1 + $0x28] sm:$0xff] (!%p189_p3)  }
   0x8   : > { %1057 = vmatpush3.bf16.msra.mxu0 (!%p189_p3), %v1144_v0  ;;  %1112 = vmatpush3.bf16.msra.mxu1 (!%p189_p3), %v1144_v0  ;;  %v1150_v8 = vld [vmem:[%s1363_s1 + $0x30] sm:$0xff] (!%p189_p3)   ;;  %v1151_v9 = vld [vmem:[%s1363_s1 + $0x38] sm:$0xff] (!%p189_p3)   ;;  %v1281_v24 = vld [vmem:[%s1364_s2] ss:$0 sm:$0xff] (!%p189_p3) }
   0x9   : > { %1058 = vmatprep.subr.bf16.mxu0 (!%p189_p3), %v1145_v1  ;;  %1105 = vmatprep.subr.bf16.mxu1 (!%p189_p3), %v1145_v1 }
   0xc   : > { %1059 = vmatpush3.bf16.msra.mxu0 (!%p189_p3), %v1145_v1  ;;  %1113 = vmatpush3.bf16.msra.mxu1 (!%p189_p3), %v1145_v1 }
   0xd   : > { %1060 = vmatprep.subr.bf16.mxu0 (!%p189_p3), %v1146_v2  ;;  %1106 = vmatprep.subr.bf16.mxu1 (!%p189_p3), %v1146_v2 }
   0xe   : > { %s1371_s18 = smov (!%p230_p4, %s1001_s18), 63 }
   0xf   : > { %s1002_s23 = sshll.u32 %s1371_s18, 2  ;;  %s1004_s12 = sshll.u32 %s1371_s18, 3 }
  0x10   : > { %s1245_s26 = scalar_lea.vmem %s1362_s0, %s1002_s23  ;;  %1061 = vmatpush3.bf16.msra.mxu0 %v1146_v2  ;;  %1114 = vmatpush3.bf16.msra.mxu1 %v1146_v2  ;;  %s1289_s19 = scalar_lea.vmem %s1365_s3, %s1004_s12 }
  0x11   : > { %v1152_v4 = vld [vmem:[%s1245_s26] sm:$0xff]   ;;  %1062 = vmatprep.subr.bf16.mxu0 %v1147_v3  ;;  %1107 = vmatprep.subr.bf16.mxu1 %v1147_v3  ;;  %v1154_v10 = vld [vmem:[%s1245_s26 + $0x8] sm:$0xff]   ;;  %v1156_v12 = vld [vmem:[%s1245_s26 + $0x10] sm:$0xff]  }
  0x12   : > { %v1153_v5 = vld [vmem:[%s1245_s26 + $0x40] sm:$0xff]   ;;  %1072 = vmatprep.mubr.bf16.mxu0 %v1152_v4  ;;  %v1155_v11 = vld [vmem:[%s1245_s26 + $0x48] sm:$0xff]   ;;  %v1157_v13 = vld [vmem:[%s1245_s26 + $0x50] sm:$0xff]  }
  0x13   : > { %1088 = vmatprep.mubr.bf16.mxu1 %v1153_v5  ;;  %v1158_v14 = vld [vmem:[%s1245_s26 + $0x18] sm:$0xff]   ;;  %v1160_v16 = vld [vmem:[%s1245_s26 + $0x20] sm:$0xff]   ;;  %v1162_v18 = vld [vmem:[%s1245_s26 + $0x28] sm:$0xff]  }
  0x14   : > { %1063 = vmatpush3.bf16.msra.mxu0 %v1147_v3  ;;  %1115 = vmatpush3.bf16.msra.mxu1 %v1147_v3  ;;  %v1159_v15 = vld [vmem:[%s1245_s26 + $0x58] sm:$0xff]   ;;  %v1161_v17 = vld [vmem:[%s1245_s26 + $0x60] sm:$0xff]   ;;  %v1163_v19 = vld [vmem:[%s1245_s26 + $0x68] sm:$0xff]  }
  0x15   : > { %1064 = vmatprep.subr.bf16.mxu0 %v1148_v6  ;;  %1108 = vmatprep.subr.bf16.mxu1 %v1148_v6  ;;  %v1164_v20 = vld [vmem:[%s1245_s26 + $0x30] sm:$0xff]   ;;  %v1166_v22 = vld [vmem:[%s1245_s26 + $0x38] sm:$0xff]  }
  0x16   : > { %v1165_v21 = vld [vmem:[%s1245_s26 + $0x70] sm:$0xff]   ;;  %v1167_v23 = vld [vmem:[%s1245_s26 + $0x78] sm:$0xff]  }
  0x18   : > { %1065 = vmatpush3.bf16.msra.mxu0 %v1148_v6  ;;  %1116 = vmatpush3.bf16.msra.mxu1 %v1148_v6 }
  0x19   : > { %1066 = vmatprep.subr.bf16.mxu0 %v1149_v7  ;;  %1109 = vmatprep.subr.bf16.mxu1 %v1149_v7 }
  0x1c   : > { %1067 = vmatpush3.bf16.msra.mxu0 %v1149_v7  ;;  %1117 = vmatpush3.bf16.msra.mxu1 %v1149_v7 }
  0x1d   : > { %1068 = vmatprep.subr.bf16.mxu0 %v1150_v8  ;;  %1110 = vmatprep.subr.bf16.mxu1 %v1150_v8 }
  0x20   : > { %1069 = vmatpush3.bf16.msra.mxu0 %v1150_v8  ;;  %1118 = vmatpush3.bf16.msra.mxu1 %v1150_v8 }
  0x21   : > { %1070 = vmatprep.subr.bf16.mxu0 %v1151_v9  ;;  %1111 = vmatprep.subr.bf16.mxu1 %v1151_v9 }
  0x24   : > { %1071 = vmatpush3.bf16.msra.mxu0 %v1151_v9  ;;  %1119 = vmatpush3.bf16.msra.mxu1 %v1151_v9 }
  0x27   : > { %1073 = vmatmul.mubr.bf16.vlgmr.msra.gmra.mrb[0].mxu0 %v1154_v10  ;;  %1089 = vmatmul.mubr.bf16.vlgmr.msra.gmra.mrb[0].mxu1 %v1155_v11 }
  0x28   : > { %1076 = vmatprep.mubr.bf16.mxu0 %v1156_v12  ;;  %1092 = vmatprep.mubr.bf16.mxu1 %v1157_v13 }
  0x2f   : > { %1077 = vmatmul.mubr.bf16.gmra.mrb[4].mxu0 %v1158_v14  ;;  %1093 = vmatmul.mubr.bf16.gmra.mrb[4].mxu1 %v1159_v15 }
  0x30   : > { %1080 = vmatprep.mubr.bf16.mxu0 %v1160_v16  ;;  %1096 = vmatprep.mubr.bf16.mxu1 %v1161_v17 }
  0x37   : > { %1081 = vmatmul.mubr.bf16.gmra.mrb[8].mxu0 %v1162_v18  ;;  %1097 = vmatmul.mubr.bf16.gmra.mrb[8].mxu1 %v1163_v19 }
  0x38   : > { %1084 = vmatprep.mubr.bf16.mxu0 %v1164_v20  ;;  %1100 = vmatprep.mubr.bf16.mxu1 %v1165_v21 }
  0x3f   : > { %1085 = vmatmul.mubr.bf16.gmra.mrb[12].mxu0 %v1166_v22  ;;  %1101 = vmatmul.mubr.bf16.gmra.mrb[12].mxu1 %v1167_v23 }
  0xfa   : > { %v1074_v25 = vpop.f32.mrb[0].mxu0  ;;  %v1090_v26 = vpop.f32.mrb[0].mxu1 }
  0xfb   : > { %v789_v27 = vadd.f32 %v1074_v25, %v1281_v24  ;;  %v805_v28 = vadd.f32 %v1090_v26, %v1281_v24  ;;  %v554_v29 = vpop.f32.mrb[1].mxu0  ;;  %v618_v30 = vpop.f32.mrb[1].mxu1 }
  0xfc   : > { %v787_v31 = vadd.f32 %v1281_v24, %v554_v29  ;;  %v803_v32 = vadd.f32 %v1281_v24, %v618_v30  ;;  %v1075_v33 = vpop.f32.mrb[2].mxu0  ;;  %v1091_v34 = vpop.f32.mrb[2].mxu1 }
  0xfd   : > { %v821_v35 = vmax.f32 %v789_v27, 0.0  ;;  %v837_v36 = vmax.f32 %v805_v28, 0.0  ;;  %v790_v37 = vadd.f32 %v1075_v33, %v1281_v24  ;;  %v806_v38 = vadd.f32 %v1091_v34, %v1281_v24  ;;  %v557_v39 = vpop.f32.mrb[3].mxu0  ;;  %v621_v40 = vpop.f32.mrb[3].mxu1 }
  0xfe   : > { %v819_v41 = vmax.f32 %v787_v31, 0.0  ;;  %v835_v42 = vmax.f32 %v803_v32, 0.0  ;;  %v788_v43 = vadd.f32 %v1281_v24, %v557_v39  ;;  %v804_v44 = vadd.f32 %v1281_v24, %v621_v40 }
  0xff   : > { %853 = vst [vmem:[%s1289_s19 + $0x10] sm:$0xff] %v821_v35  ;;  %869 = vst [vmem:[%s1289_s19 + $0x90] sm:$0xff] %v837_v36  ;;  %v822_v45 = vmax.f32 %v790_v37, 0.0  ;;  %v838_v46 = vmax.f32 %v806_v38, 0.0 }
 0x100   : > { %851 = vst [vmem:[%s1289_s19] sm:$0xff] %v819_v41  ;;  %867 = vst [vmem:[%s1289_s19 + $0x80] sm:$0xff] %v835_v42  ;;  %v820_v47 = vmax.f32 %v788_v43, 0.0  ;;  %v836_v48 = vmax.f32 %v804_v44, 0.0 }
 0x101   : > { %854 = vst [vmem:[%s1289_s19 + $0x18] sm:$0xff] %v822_v45  ;;  %870 = vst [vmem:[%s1289_s19 + $0x98] sm:$0xff] %v838_v46 }
 0x102   : > { %852 = vst [vmem:[%s1289_s19 + $0x8] sm:$0xff] %v820_v47  ;;  %868 = vst [vmem:[%s1289_s19 + $0x88] sm:$0xff] %v836_v48  ;;  %v1078_v49 = vpop.f32.mrb[4].mxu0  ;;  %v1094_v50 = vpop.f32.mrb[4].mxu1 }
 0x103   : > { %v793_v51 = vadd.f32 %v1078_v49, %v1281_v24  ;;  %v809_v52 = vadd.f32 %v1094_v50, %v1281_v24  ;;  %v570_v53 = vpop.f32.mrb[5].mxu0  ;;  %v634_v54 = vpop.f32.mrb[5].mxu1 }
 0x104   : > { %v791_v55 = vadd.f32 %v1281_v24, %v570_v53  ;;  %v807_v56 = vadd.f32 %v1281_v24, %v634_v54  ;;  %v1079_v57 = vpop.f32.mrb[6].mxu0  ;;  %v1095_v58 = vpop.f32.mrb[6].mxu1 }
 0x105   : > { %v825_v59 = vmax.f32 %v793_v51, 0.0  ;;  %v841_v60 = vmax.f32 %v809_v52, 0.0  ;;  %v794_v61 = vadd.f32 %v1079_v57, %v1281_v24  ;;  %v810_v62 = vadd.f32 %v1095_v58, %v1281_v24  ;;  %v573_v63 = vpop.f32.mrb[7].mxu0  ;;  %v637_v0 = vpop.f32.mrb[7].mxu1 }
 0x106   : > { %v823_v1 = vmax.f32 %v791_v55, 0.0  ;;  %v839_v2 = vmax.f32 %v807_v56, 0.0  ;;  %v792_v3 = vadd.f32 %v1281_v24, %v573_v63  ;;  %v808_v4 = vadd.f32 %v1281_v24, %v637_v0 }
 0x107   : > { %857 = vst [vmem:[%s1289_s19 + $0x30] sm:$0xff] %v825_v59  ;;  %873 = vst [vmem:[%s1289_s19 + $0xb0] sm:$0xff] %v841_v60  ;;  %v826_v5 = vmax.f32 %v794_v61, 0.0  ;;  %v842_v6 = vmax.f32 %v810_v62, 0.0 }
 0x108   : > { %855 = vst [vmem:[%s1289_s19 + $0x20] sm:$0xff] %v823_v1  ;;  %871 = vst [vmem:[%s1289_s19 + $0xa0] sm:$0xff] %v839_v2  ;;  %v824_v7 = vmax.f32 %v792_v3, 0.0  ;;  %v840_v8 = vmax.f32 %v808_v4, 0.0 }
 0x109   : > { %858 = vst [vmem:[%s1289_s19 + $0x38] sm:$0xff] %v826_v5  ;;  %874 = vst [vmem:[%s1289_s19 + $0xb8] sm:$0xff] %v842_v6 }
 0x10a   : > { %856 = vst [vmem:[%s1289_s19 + $0x28] sm:$0xff] %v824_v7  ;;  %872 = vst [vmem:[%s1289_s19 + $0xa8] sm:$0xff] %v840_v8  ;;  %v1082_v9 = vpop.f32.mrb[8].mxu0  ;;  %v1098_v10 = vpop.f32.mrb[8].mxu1 }
 0x10b   : > { %v797_v11 = vadd.f32 %v1082_v9, %v1281_v24  ;;  %v813_v12 = vadd.f32 %v1098_v10, %v1281_v24  ;;  %v586_v13 = vpop.f32.mrb[9].mxu0  ;;  %v650_v14 = vpop.f32.mrb[9].mxu1 }
 0x10c   : > { %v795_v15 = vadd.f32 %v1281_v24, %v586_v13  ;;  %v811_v16 = vadd.f32 %v1281_v24, %v650_v14  ;;  %v1083_v17 = vpop.f32.mrb[10].mxu0  ;;  %v1099_v18 = vpop.f32.mrb[10].mxu1 }
 0x10d   : > { %v829_v19 = vmax.f32 %v797_v11, 0.0  ;;  %v845_v20 = vmax.f32 %v813_v12, 0.0  ;;  %v798_v21 = vadd.f32 %v1083_v17, %v1281_v24  ;;  %v814_v22 = vadd.f32 %v1099_v18, %v1281_v24  ;;  %v589_v23 = vpop.f32.mrb[11].mxu0  ;;  %v653_v25 = vpop.f32.mrb[11].mxu1 }
 0x10e   : > { %v827_v26 = vmax.f32 %v795_v15, 0.0  ;;  %v843_v27 = vmax.f32 %v811_v16, 0.0  ;;  %v796_v28 = vadd.f32 %v1281_v24, %v589_v23  ;;  %v812_v29 = vadd.f32 %v1281_v24, %v653_v25 }
 0x10f   : > { %861 = vst [vmem:[%s1289_s19 + $0x50] sm:$0xff] %v829_v19  ;;  %877 = vst [vmem:[%s1289_s19 + $0xd0] sm:$0xff] %v845_v20  ;;  %v830_v30 = vmax.f32 %v798_v21, 0.0  ;;  %v846_v31 = vmax.f32 %v814_v22, 0.0 }
 0x110   : > { %859 = vst [vmem:[%s1289_s19 + $0x40] sm:$0xff] %v827_v26  ;;  %875 = vst [vmem:[%s1289_s19 + $0xc0] sm:$0xff] %v843_v27  ;;  %v828_v32 = vmax.f32 %v796_v28, 0.0  ;;  %v844_v33 = vmax.f32 %v812_v29, 0.0 }
 0x111   : > { %862 = vst [vmem:[%s1289_s19 + $0x58] sm:$0xff] %v830_v30  ;;  %878 = vst [vmem:[%s1289_s19 + $0xd8] sm:$0xff] %v846_v31 }
 0x112   : > { %860 = vst [vmem:[%s1289_s19 + $0x48] sm:$0xff] %v828_v32  ;;  %876 = vst [vmem:[%s1289_s19 + $0xc8] sm:$0xff] %v844_v33  ;;  %v1086_v34 = vpop.f32.mrb[12].mxu0  ;;  %v1102_v35 = vpop.f32.mrb[12].mxu1 }
 0x113   : > { %v801_v36 = vadd.f32 %v1086_v34, %v1281_v24  ;;  %v817_v37 = vadd.f32 %v1102_v35, %v1281_v24  ;;  %v602_v38 = vpop.f32.mrb[13].mxu0  ;;  %v666_v39 = vpop.f32.mrb[13].mxu1 }
 0x114   : > { %v799_v40 = vadd.f32 %v1281_v24, %v602_v38  ;;  %v815_v41 = vadd.f32 %v1281_v24, %v666_v39  ;;  %v1087_v42 = vpop.f32.mrb[14].mxu0  ;;  %v1103_v43 = vpop.f32.mrb[14].mxu1 }
 0x115   : > { %v833_v44 = vmax.f32 %v801_v36, 0.0  ;;  %v849_v45 = vmax.f32 %v817_v37, 0.0  ;;  %v802_v46 = vadd.f32 %v1087_v42, %v1281_v24  ;;  %v818_v47 = vadd.f32 %v1103_v43, %v1281_v24  ;;  %v605_v48 = vpop.f32.mrb[15].mxu0  ;;  %v669_v49 = vpop.f32.mrb[15].mxu1 }
 0x116   : > { %v831_v50 = vmax.f32 %v799_v40, 0.0  ;;  %v847_v51 = vmax.f32 %v815_v41, 0.0  ;;  %v800_v52 = vadd.f32 %v1281_v24, %v605_v48  ;;  %v816_v53 = vadd.f32 %v1281_v24, %v669_v49 }
 0x117   : > { %865 = vst [vmem:[%s1289_s19 + $0x70] sm:$0xff] %v833_v44  ;;  %881 = vst [vmem:[%s1289_s19 + $0xf0] sm:$0xff] %v849_v45  ;;  %v834_v54 = vmax.f32 %v802_v46, 0.0  ;;  %v850_v55 = vmax.f32 %v818_v47, 0.0 }
 0x118   : > { %863 = vst [vmem:[%s1289_s19 + $0x60] sm:$0xff] %v831_v50  ;;  %879 = vst [vmem:[%s1289_s19 + $0xe0] sm:$0xff] %v847_v51  ;;  %v832_v56 = vmax.f32 %v800_v52, 0.0  ;;  %v848_v57 = vmax.f32 %v816_v53, 0.0 }
 0x119   : > { %866 = vst [vmem:[%s1289_s19 + $0x78] sm:$0xff] %v834_v54  ;;  %882 = vst [vmem:[%s1289_s19 + $0xf8] sm:$0xff] %v850_v55 }
 0x11a   : > { %864 = vst [vmem:[%s1289_s19 + $0x68] sm:$0xff] %v832_v56  ;;  %880 = vst [vmem:[%s1289_s19 + $0xe8] sm:$0xff] %v848_v57 }
 0x11b PF: > { %s13_s14 = sadd.s32 1, %s1190_s14   ;;  %s1366_s12 = smov %s1186_s13 }
 0x11c   : > { %p10_p5 = scmp.ge.s32.totalorder %s13_s14, 4   ;;  %s1367_s13 = smov %s1369_s15 }
 0x11e   :  { %12 = sbr.rel (!%p10_p5) target bundleno = 2 (0x2), region = 76 }

// kernel: _lambda_.9
= control target key start
LH: loop header
LB: loop body
LE: loop exit
PB: predicated region body
PF: predicated region fallthrough
CT: control target
= control target key end

     0   :  { %s2228_s1 = inlined_call_operand.vmem [shape: bf16[640,256], index: 1, kind: input, shape index: {}]   ;;  %s2229_s0 = inlined_call_operand.vmem [shape: bf16[104,640], index: 0, kind: input, shape index: {}]   ;;  %s2230_s2 = inlined_call_operand.vmem [shape: f32[1,256], index: 2, kind: input, shape index: {}]   ;;  %s2231_s3 = inlined_call_operand.vmem [shape: f32[104,256], index: 3, kind: output, shape index: {}]  }
   0x1   :  { %v1438_v0 = vld [vmem:[%s2228_s1 + $0x4] ss:$8 sps:$4 sm:$0xff]   ;;  %v1442_v2 = vld [vmem:[%s2228_s1] ss:$8 sps:$4 sm:$0xff]   ;;  %v1444_v4 = vld [vmem:[%s2228_s1 + $0x14] ss:$8 sps:$4 sm:$0xff]  }
   0x2   :  { %v1632_v1 = vld [vmem:[%s2228_s1 + $0x104] ss:$8 sps:$4 sm:$0xff]   ;;  %764 = vmatprep.subr.bf16.mxu1 %v1438_v0  ;;  %v1640_v3 = vld [vmem:[%s2228_s1 + $0x100] ss:$8 sps:$4 sm:$0xff]   ;;  %v1650_v5 = vld [vmem:[%s2228_s1 + $0x114] ss:$8 sps:$4 sm:$0xff]  }
   0x3   :  { %865 = vmatprep.subr.bf16.mxu0 %v1632_v1  ;;  %765 = vmatpush1.bf16.msra.mxu1 %v1442_v2  ;;  %v1448_v6 = vld [vmem:[%s2228_s1 + $0x10] ss:$8 sps:$4 sm:$0xff]   ;;  %v1450_v8 = vld [vmem:[%s2228_s1 + $0x24] ss:$8 sps:$4 sm:$0xff]   ;;  %v1454_v10 = vld [vmem:[%s2228_s1 + $0x20] ss:$8 sps:$4 sm:$0xff]  }
   0x4   :  { %866 = vmatpush1.bf16.msra.mxu0 %v1640_v3  ;;  %766 = vmatprep.subr.bf16.mxu1 %v1444_v4  ;;  %v1658_v7 = vld [vmem:[%s2228_s1 + $0x110] ss:$8 sps:$4 sm:$0xff]   ;;  %v1667_v9 = vld [vmem:[%s2228_s1 + $0x124] ss:$8 sps:$4 sm:$0xff]   ;;  %v1675_v11 = vld [vmem:[%s2228_s1 + $0x120] ss:$8 sps:$4 sm:$0xff]  }
   0x5   :  { %867 = vmatprep.subr.bf16.mxu0 %v1650_v5  ;;  %v1456_v12 = vld [vmem:[%s2228_s1 + $0x34] ss:$8 sps:$4 sm:$0xff]   ;;  %v1460_v14 = vld [vmem:[%s2228_s1 + $0x30] ss:$8 sps:$4 sm:$0xff]   ;;  %v1462_v16 = vld [vmem:[%s2228_s1 + $0x44] ss:$8 sps:$4 sm:$0xff]  }
   0x6   :  { %v1685_v13 = vld [vmem:[%s2228_s1 + $0x134] ss:$8 sps:$4 sm:$0xff]   ;;  %v1694_v15 = vld [vmem:[%s2228_s1 + $0x130] ss:$8 sps:$4 sm:$0xff]   ;;  %v1703_v17 = vld [vmem:[%s2228_s1 + $0x144] ss:$8 sps:$4 sm:$0xff]  }
   0x7   :  { %767 = vmatpush1.bf16.msra.mxu1 %v1448_v6  ;;  %v1466_v18 = vld [vmem:[%s2228_s1 + $0x40] ss:$8 sps:$4 sm:$0xff]   ;;  %v1468_v20 = vld [vmem:[%s2228_s1 + $0x54] ss:$8 sps:$4 sm:$0xff]   ;;  %v1472_v22 = vld [vmem:[%s2228_s1 + $0x50] ss:$8 sps:$4 sm:$0xff]  }
   0x8   :  { %868 = vmatpush1.bf16.msra.mxu0 %v1658_v7  ;;  %768 = vmatprep.subr.bf16.mxu1 %v1450_v8  ;;  %v1711_v19 = vld [vmem:[%s2228_s1 + $0x140] ss:$8 sps:$4 sm:$0xff]   ;;  %v1721_v21 = vld [vmem:[%s2228_s1 + $0x154] ss:$8 sps:$4 sm:$0xff]   ;;  %v1730_v23 = vld [vmem:[%s2228_s1 + $0x150] ss:$8 sps:$4 sm:$0xff]  }
   0x9   :  { %869 = vmatprep.subr.bf16.mxu0 %v1667_v9  ;;  %v1474_v24 = vld [vmem:[%s2228_s1 + $0x64] ss:$8 sps:$4 sm:$0xff]   ;;  %v1478_v26 = vld [vmem:[%s2228_s1 + $0x60] ss:$8 sps:$4 sm:$0xff]   ;;  %v1480_v28 = vld [vmem:[%s2228_s1 + $0x74] ss:$8 sps:$4 sm:$0xff]  }
   0xa   :  { %v1739_v25 = vld [vmem:[%s2228_s1 + $0x164] ss:$8 sps:$4 sm:$0xff]   ;;  %v1747_v27 = vld [vmem:[%s2228_s1 + $0x160] ss:$8 sps:$4 sm:$0xff]   ;;  %v1757_v29 = vld [vmem:[%s2228_s1 + $0x174] ss:$8 sps:$4 sm:$0xff]  }
   0xb   :  { %769 = vmatpush1.bf16.msra.mxu1 %v1454_v10  ;;  %v1484_v30 = vld [vmem:[%s2228_s1 + $0x70] ss:$8 sps:$4 sm:$0xff]   ;;  %v1486_v32 = vld [vmem:[%s2228_s1 + $0x84] ss:$8 sps:$4 sm:$0xff]   ;;  %v1490_v34 = vld [vmem:[%s2228_s1 + $0x80] ss:$8 sps:$4 sm:$0xff]  }
   0xc   :  { %870 = vmatpush1.bf16.msra.mxu0 %v1675_v11  ;;  %770 = vmatprep.subr.bf16.mxu1 %v1456_v12  ;;  %v1766_v31 = vld [vmem:[%s2228_s1 + $0x170] ss:$8 sps:$4 sm:$0xff]   ;;  %v1775_v33 = vld [vmem:[%s2228_s1 + $0x184] ss:$8 sps:$4 sm:$0xff]   ;;  %v1783_v35 = vld [vmem:[%s2228_s1 + $0x180] ss:$8 sps:$4 sm:$0xff]  }
   0xd   :  { %871 = vmatprep.subr.bf16.mxu0 %v1685_v13  ;;  %v1492_v36 = vld [vmem:[%s2228_s1 + $0x94] ss:$8 sps:$4 sm:$0xff]   ;;  %v1496_v38 = vld [vmem:[%s2228_s1 + $0x90] ss:$8 sps:$4 sm:$0xff]   ;;  %v1498_v40 = vld [vmem:[%s2228_s1 + $0xa4] ss:$8 sps:$4 sm:$0xff]  }
   0xe   :  { %v1793_v37 = vld [vmem:[%s2228_s1 + $0x194] ss:$8 sps:$4 sm:$0xff]   ;;  %v1802_v39 = vld [vmem:[%s2228_s1 + $0x190] ss:$8 sps:$4 sm:$0xff]   ;;  %v1811_v41 = vld [vmem:[%s2228_s1 + $0x1a4] ss:$8 sps:$4 sm:$0xff]  }
   0xf   :  { %771 = vmatpush1.bf16.msra.mxu1 %v1460_v14  ;;  %v1502_v42 = vld [vmem:[%s2228_s1 + $0xa0] ss:$8 sps:$4 sm:$0xff]   ;;  %v1504_v44 = vld [vmem:[%s2228_s1 + $0xb4] ss:$8 sps:$4 sm:$0xff]   ;;  %v1508_v46 = vld [vmem:[%s2228_s1 + $0xb0] ss:$8 sps:$4 sm:$0xff]  }
  0x10   :  { %872 = vmatpush1.bf16.msra.mxu0 %v1694_v15  ;;  %772 = vmatprep.subr.bf16.mxu1 %v1462_v16  ;;  %v1819_v43 = vld [vmem:[%s2228_s1 + $0x1a0] ss:$8 sps:$4 sm:$0xff]   ;;  %v1829_v45 = vld [vmem:[%s2228_s1 + $0x1b4] ss:$8 sps:$4 sm:$0xff]   ;;  %v1837_v47 = vld [vmem:[%s2228_s1 + $0x1b0] ss:$8 sps:$4 sm:$0xff]  }
  0x11   :  { %873 = vmatprep.subr.bf16.mxu0 %v1703_v17  ;;  %v1510_v48 = vld [vmem:[%s2228_s1 + $0xc4] ss:$8 sps:$4 sm:$0xff]   ;;  %v1514_v52 = vld [vmem:[%s2228_s1 + $0xc0] ss:$8 sps:$4 sm:$0xff]   ;;  %v1516_v54 = vld [vmem:[%s2228_s1 + $0xd4] ss:$8 sps:$4 sm:$0xff]  }
  0x12   :  { %v1536_v49 = vld [vmem:[%s2229_s0 + $0x4] ss:$20 sps:$4 sm:$0xff]   ;;  %v1539_v51 = vld [vmem:[%s2229_s0 + $0xc] ss:$20 sps:$4 sm:$0xff]   ;;  %v1871_v55 = vld [vmem:[%s2228_s1 + $0x1d4] ss:$8 sps:$4 sm:$0xff]  }
  0x13   :  { %773 = vmatpush1.bf16.msra.mxu1 %v1466_v18  ;;  %v1849_v50 = vld [vmem:[%s2228_s1 + $0x1c4] ss:$8 sps:$4 sm:$0xff]   ;;  %796 = vmatprep.mubr.bf16.mxu1 %v1536_v49  ;;  %v1861_v53 = vld [vmem:[%s2228_s1 + $0x1c0] ss:$8 sps:$4 sm:$0xff]   ;;  %v1520_v56 = vld [vmem:[%s2228_s1 + $0xd0] ss:$8 sps:$4 sm:$0xff]  }
  0x14   :  { %874 = vmatpush1.bf16.msra.mxu0 %v1711_v19  ;;  %774 = vmatprep.subr.bf16.mxu1 %v1468_v20  ;;  %v1880_v57 = vld [vmem:[%s2228_s1 + $0x1d0] ss:$8 sps:$4 sm:$0xff]   ;;  %v1522_v58 = vld [vmem:[%s2228_s1 + $0xe4] ss:$8 sps:$4 sm:$0xff]   ;;  %v1526_v60 = vld [vmem:[%s2228_s1 + $0xe0] ss:$8 sps:$4 sm:$0xff]  }
  0x15   :  { %875 = vmatprep.subr.bf16.mxu0 %v1721_v21  ;;  %897 = vmatprep.mubr.bf16.mxu0 %v1539_v51  ;;  %v1889_v59 = vld [vmem:[%s2228_s1 + $0x1e4] ss:$8 sps:$4 sm:$0xff]   ;;  %v1897_v61 = vld [vmem:[%s2228_s1 + $0x1e0] ss:$8 sps:$4 sm:$0xff]   ;;  %v1528_v62 = vld [vmem:[%s2228_s1 + $0xf4] ss:$8 sps:$4 sm:$0xff]  }
  0x16   :  { %v1907_v63 = vld [vmem:[%s2228_s1 + $0x1f4] ss:$8 sps:$4 sm:$0xff]   ;;  %v1532_v0 = vld [vmem:[%s2228_s1 + $0xf0] ss:$8 sps:$4 sm:$0xff]   ;;  %v1542_v4 = vld [vmem:[%s2228_s1 + $0x204] ss:$8 sps:$4 sm:$0xff]  }
  0x17   :  { %775 = vmatpush1.bf16.msra.mxu1 %v1472_v22  ;;  %v1916_v2 = vld [vmem:[%s2228_s1 + $0x1f0] ss:$8 sps:$4 sm:$0xff]   ;;  %v1534_v6 = vld [vmem:[%s2229_s0] ss:$20 sps:$4 sm:$0xff]   ;;  %v1537_v8 = vld [vmem:[%s2229_s0 + $0x8] ss:$20 sps:$4 sm:$0xff]  }
  0x18   :  { %876 = vmatpush1.bf16.msra.mxu0 %v1730_v23  ;;  %776 = vmatprep.subr.bf16.mxu1 %v1474_v24  ;;  %v1540_v10 = vld [vmem:[%s2228_s1 + $0x200] ss:$8 sps:$4 sm:$0xff]   ;;  %v1545_v12 = vld [vmem:[%s2228_s1 + $0x214] ss:$8 sps:$4 sm:$0xff]   ;;  %v1543_v18 = vld [vmem:[%s2228_s1 + $0x210] ss:$8 sps:$4 sm:$0xff]  }
  0x19   :  { %877 = vmatprep.subr.bf16.mxu0 %v1739_v25  ;;  %v1546_v14 = vld [vmem:[%s2229_s0 + $0x34] ss:$20 sps:$4 sm:$0xff]   ;;  %v1552_v16 = vld [vmem:[%s2229_s0 + $0x2c] ss:$20 sps:$4 sm:$0xff]   ;;  %v1548_v20 = vld [vmem:[%s2229_s0 + $0x30] ss:$20 sps:$4 sm:$0xff]  }
  0x1a   :  { %v1556_v22 = vld [vmem:[%s2228_s1 + $0x234] ss:$8 sps:$4 sm:$0xff]   ;;  %v1600_v49 = vld [vmem:[%s2229_s0 + $0xd0] ss:$20 sps:$4 sm:$0xff]  }
  0x1b   :  { %777 = vmatpush1.bf16.msra.mxu1 %v1478_v26  ;;  %v1558_v24 = vld [vmem:[%s2229_s0 + $0x5c] ss:$20 sps:$4 sm:$0xff]   ;;  %v1563_v26 = vld [vmem:[%s2228_s1 + $0x244] ss:$8 sps:$4 sm:$0xff]  }
  0x1c   :  { %878 = vmatpush1.bf16.msra.mxu0 %v1747_v27  ;;  %778 = vmatprep.subr.bf16.mxu1 %v1480_v28  ;;  %v1560_v28 = vld [vmem:[%s2229_s0 + $0x58] ss:$20 sps:$4 sm:$0xff]  }
  0x1d   :  { %879 = vmatprep.subr.bf16.mxu0 %v1757_v29 }
  0x1f   :  { %779 = vmatpush1.bf16.msra.mxu1 %v1484_v30  ;;  %v1568_v30 = vld [vmem:[%s2228_s1 + $0x254] ss:$8 sps:$4 sm:$0xff]  }
  0x20   :  { %880 = vmatpush1.bf16.msra.mxu0 %v1766_v31  ;;  %780 = vmatprep.subr.bf16.mxu1 %v1486_v32  ;;  %v1570_v32 = vld [vmem:[%s2229_s0 + $0x84] ss:$20 sps:$4 sm:$0xff]  }
  0x21   :  { %881 = vmatprep.subr.bf16.mxu0 %v1775_v33 }
  0x23   :  { %781 = vmatpush1.bf16.msra.mxu1 %v1490_v34  ;;  %v1575_v34 = vld [vmem:[%s2228_s1 + $0x264] ss:$8 sps:$4 sm:$0xff]  }
  0x24   :  { %882 = vmatpush1.bf16.msra.mxu0 %v1783_v35  ;;  %782 = vmatprep.subr.bf16.mxu1 %v1492_v36  ;;  %v1572_v36 = vld [vmem:[%s2229_s0 + $0x80] ss:$20 sps:$4 sm:$0xff]  }
  0x25   :  { %883 = vmatprep.subr.bf16.mxu0 %v1793_v37 }
  0x27   :  { %783 = vmatpush1.bf16.msra.mxu1 %v1496_v38  ;;  %v1580_v38 = vld [vmem:[%s2228_s1 + $0x274] ss:$8 sps:$4 sm:$0xff]  }
  0x28   :  { %884 = vmatpush1.bf16.msra.mxu0 %v1802_v39  ;;  %784 = vmatprep.subr.bf16.mxu1 %v1498_v40  ;;  %v1583_v40 = vld [vmem:[%s2229_s0 + $0xa4] ss:$20 sps:$4 sm:$0xff]  }
  0x29   :  { %885 = vmatprep.subr.bf16.mxu0 %v1811_v41 }
  0x2b   :  { %785 = vmatpush1.bf16.msra.mxu1 %v1502_v42  ;;  %v1582_v42 = vld [vmem:[%s2229_s0 + $0x10] ss:$20 sps:$4 sm:$0xff]  }
  0x2c   :  { %886 = vmatpush1.bf16.msra.mxu0 %v1819_v43  ;;  %786 = vmatprep.subr.bf16.mxu1 %v1504_v44  ;;  %v1585_v44 = vld [vmem:[%s2229_s0 + $0xa0] ss:$20 sps:$4 sm:$0xff]  }
  0x2d   :  { %887 = vmatprep.subr.bf16.mxu0 %v1829_v45 }
  0x2f   :  { %787 = vmatpush1.bf16.msra.mxu1 %v1508_v46 }
  0x30   :  { %888 = vmatpush1.bf16.msra.mxu0 %v1837_v47  ;;  %788 = vmatprep.subr.bf16.mxu1 %v1510_v48  ;;  %v108_v48 = vld [vmem:[%s2229_s0 + $0xf8] sm:$0xff] }
  0x31   :  { %889 = vmatprep.subr.bf16.mxu0 %v1849_v50  ;;  %v1275_v51 = vcombine.high %v108_v48, %v108_v48 }
  0x33   :  { %789 = vmatpush1.bf16.msra.mxu1 %v1514_v52  ;;  %v1274_v52 = vcombine.low %v108_v48, %v108_v48 }
  0x34   :  { %890 = vmatpush1.bf16.msra.mxu0 %v1861_v53  ;;  %790 = vmatprep.subr.bf16.mxu1 %v1516_v54 }
  0x35   :  { %891 = vmatprep.subr.bf16.mxu0 %v1871_v55 }
  0x37   :  { %791 = vmatpush1.bf16.msra.mxu1 %v1520_v56 }
  0x38   :  { %892 = vmatpush1.bf16.msra.mxu0 %v1880_v57  ;;  %792 = vmatprep.subr.bf16.mxu1 %v1522_v58 }
  0x39   :  { %893 = vmatprep.subr.bf16.mxu0 %v1889_v59 }
  0x3b   :  { %793 = vmatpush1.bf16.msra.mxu1 %v1526_v60 }
  0x3c   :  { %894 = vmatpush1.bf16.msra.mxu0 %v1897_v61  ;;  %794 = vmatprep.subr.bf16.mxu1 %v1528_v62 }
  0x3d   :  { %895 = vmatprep.subr.bf16.mxu0 %v1907_v63 }
  0x3f   :  { %795 = vmatpush1.bf16.msra.mxu1 %v1532_v0 }
  0x40   :  { %896 = vmatpush1.bf16.msra.mxu0 %v1916_v2  ;;  %1357 = vmatprep.subr.bf16.mxu1 %v1632_v1  ;;  %v1551_v1 = vld [vmem:[%s2228_s1 + $0x224] ss:$8 sps:$4 sm:$0xff]  }
  0x41   :  { %966 = vmatprep.subr.bf16.mxu0 %v1542_v4  ;;  %v1150_v4 = vlaneseq }
  0x42   :  { %797 = vmatmul.mubr.bf16.vlgmr.msra.gmra.mrb[0].mxu1 %v1534_v6 }
  0x43   :  { %898 = vmatmul.mubr.bf16.vlgmr.msra.gmra.mrb[0].mxu0 %v1537_v8  ;;  %1373 = vmatpush1.bf16.msra.mxu1 %v1640_v3  ;;  %v1557_v3 = vld [vmem:[%s2229_s0 + $0x28] ss:$20 sps:$4 sm:$0xff]   ;;  %v1151_v6 = vshrl.u32 %v1150_v4, 7 }
  0x44   :  { %967 = vmatpush1.bf16.msra.mxu0 %v1540_v10  ;;  %1358 = vmatprep.subr.bf16.mxu1 %v1650_v5  ;;  %v1549_v5 = vld [vmem:[%s2228_s1 + $0x220] ss:$8 sps:$4 sm:$0xff]  }
  0x45   :  { %968 = vmatprep.subr.bf16.mxu0 %v1545_v12  ;;  %907 = vmatprep.mubr.bf16.mxu0 %v1546_v14 }
  0x46   :  { %806 = vmatprep.mubr.bf16.mxu1 %v1552_v16  ;;  %v1152_v16 = vsub.s32 0, %v1151_v6 }
  0x47   :  { %1374 = vmatpush1.bf16.msra.mxu1 %v1658_v7  ;;  %v1564_v7 = vld [vmem:[%s2229_s0 + $0x54] ss:$20 sps:$4 sm:$0xff]  }
  0x48   :  { %969 = vmatpush1.bf16.msra.mxu0 %v1543_v18  ;;  %1359 = vmatprep.subr.bf16.mxu1 %v1667_v9  ;;  %v1554_v9 = vld [vmem:[%s2228_s1 + $0x230] ss:$8 sps:$4 sm:$0xff]   ;;  %v1148_v18 = vld [vmem:[%s2230_s2] sm:$0x3] }
  0x49   :  { %970 = vmatprep.subr.bf16.mxu0 %v1551_v1  ;;  %v1156_v1 = vsub.s32 1, %v1151_v6 }
  0x4a   :  { %807 = vmatmul.mubr.bf16.gmra.mrb[4].mxu1 %v1557_v3 }
  0x4b   :  { %908 = vmatmul.mubr.bf16.gmra.mrb[4].mxu0 %v1548_v20  ;;  %1375 = vmatpush1.bf16.msra.mxu1 %v1675_v11  ;;  %v1569_v11 = vld [vmem:[%s2229_s0 + $0x50] ss:$20 sps:$4 sm:$0xff]   ;;  %v2108_v20 = vrot.slane %v1148_v18, %v1152_v16 }
  0x4c   :  { %971 = vmatpush1.bf16.msra.mxu0 %v1549_v5  ;;  %1360 = vmatprep.subr.bf16.mxu1 %v1685_v13  ;;  %v1561_v13 = vld [vmem:[%s2228_s1 + $0x240] ss:$8 sps:$4 sm:$0xff]   ;;  %v2110_v5 = vrot.slane %v1148_v18, %v1156_v1 }
  0x4d   :  { %972 = vmatprep.subr.bf16.mxu0 %v1556_v22  ;;  %917 = vmatprep.mubr.bf16.mxu0 %v1558_v24 }
  0x4e   :  { %816 = vmatprep.mubr.bf16.mxu1 %v1564_v7 }
  0x4f   :  { %1376 = vmatpush1.bf16.msra.mxu1 %v1694_v15  ;;  %v1576_v15 = vld [vmem:[%s2229_s0 + $0x7c] ss:$20 sps:$4 sm:$0xff]  }
  0x50   :  { %973 = vmatpush1.bf16.msra.mxu0 %v1554_v9  ;;  %1361 = vmatprep.subr.bf16.mxu1 %v1703_v17  ;;  %v1566_v17 = vld [vmem:[%s2228_s1 + $0x250] ss:$8 sps:$4 sm:$0xff]  }
  0x51   :  { %974 = vmatprep.subr.bf16.mxu0 %v1563_v26 }
  0x52   :  { %817 = vmatmul.mubr.bf16.gmra.mrb[8].mxu1 %v1569_v11 }
  0x53   :  { %918 = vmatmul.mubr.bf16.gmra.mrb[8].mxu0 %v1560_v28  ;;  %1377 = vmatpush1.bf16.msra.mxu1 %v1711_v19  ;;  %v1581_v19 = vld [vmem:[%s2229_s0 + $0x78] ss:$20 sps:$4 sm:$0xff]  }
  0x54   :  { %975 = vmatpush1.bf16.msra.mxu0 %v1561_v13  ;;  %1362 = vmatprep.subr.bf16.mxu1 %v1721_v21  ;;  %v1573_v21 = vld [vmem:[%s2228_s1 + $0x260] ss:$8 sps:$4 sm:$0xff]  }
  0x55   :  { %976 = vmatprep.subr.bf16.mxu0 %v1568_v30  ;;  %927 = vmatprep.mubr.bf16.mxu0 %v1570_v32 }
  0x56   :  { %826 = vmatprep.mubr.bf16.mxu1 %v1576_v15 }
  0x57   :  { %1378 = vmatpush1.bf16.msra.mxu1 %v1730_v23  ;;  %v1578_v23 = vld [vmem:[%s2228_s1 + $0x270] ss:$8 sps:$4 sm:$0xff]  }
  0x58   :  { %977 = vmatpush1.bf16.msra.mxu0 %v1566_v17  ;;  %1363 = vmatprep.subr.bf16.mxu1 %v1739_v25  ;;  %v1605_v25 = vmov 0  }
  0x59   :  { %978 = vmatprep.subr.bf16.mxu0 %v1575_v34 }
  0x5a   :  { %827 = vmatmul.mubr.bf16.gmra.mrb[12].mxu1 %v1581_v19 }
  0x5b   :  { %928 = vmatmul.mubr.bf16.gmra.mrb[12].mxu0 %v1572_v36  ;;  %1379 = vmatpush1.bf16.msra.mxu1 %v1747_v27  ;;  %v1587_v27 = vld [vmem:[%s2229_s0 + $0xcc] ss:$20 sps:$4 sm:$0xff]  }
  0x5c   :  { %979 = vmatpush1.bf16.msra.mxu0 %v1573_v21  ;;  %1364 = vmatprep.subr.bf16.mxu1 %v1757_v29  ;;  %v107_v29 = vld [vmem:[%s2229_s0 + $0xf0] sm:$0xff] }
  0x5d   :  { %980 = vmatprep.subr.bf16.mxu0 %v1580_v38  ;;  %998 = vmatprep.mubr.bf16.mxu0 %v1605_v25  ;;  %v1272_v46 = vcombine.low %v107_v29, %v107_v29 }
  0x5e   :  { %836 = vmatprep.mubr.bf16.mxu1 %v1583_v40 }
  0x5f   :  { %1380 = vmatpush1.bf16.msra.mxu1 %v1766_v31  ;;  %v1586_v31 = vld [vmem:[%s2229_s0 + $0x38] ss:$20 sps:$4 sm:$0xff]  }
  0x60   :  { %981 = vmatpush1.bf16.msra.mxu0 %v1578_v23  ;;  %1365 = vmatprep.subr.bf16.mxu1 %v1775_v33  ;;  %v1589_v33 = vld [vmem:[%s2229_s0 + $0xc8] ss:$20 sps:$4 sm:$0xff]  }
  0x62   :  { %837 = vmatmul.mubr.bf16.gmra.mrb[16].mxu1 %v1585_v44 }
  0x63   :  { %999 = vmatmul.mubr.bf16.vlgmr.msra.gmra.mrb[0].mxu0 %v1582_v42  ;;  %1381 = vmatpush1.bf16.msra.mxu1 %v1783_v35  ;;  %v1273_v35 = vcombine.high %v107_v29, %v107_v29 }
  0x64   :  { %1008 = vmatprep.mubr.bf16.mxu0 %v1605_v25  ;;  %1366 = vmatprep.subr.bf16.mxu1 %v1793_v37  ;;  %v1590_v37 = vld [vmem:[%s2229_s0 + $0x60] ss:$20 sps:$4 sm:$0xff]  }
  0x65   :  { %846 = vmatprep.mubr.bf16.mxu1 %v1587_v27 }
  0x67   :  { %1382 = vmatpush1.bf16.msra.mxu1 %v1802_v39  ;;  %v1596_v39 = vld [vmem:[%s2229_s0 + $0xac] ss:$20 sps:$4 sm:$0xff]  }
  0x68   :  { %1367 = vmatprep.subr.bf16.mxu1 %v1811_v41  ;;  %v1593_v41 = vld [vmem:[%s2229_s0 + $0x88] ss:$20 sps:$4 sm:$0xff]  }
  0x6a   :  { %847 = vmatmul.mubr.bf16.gmra.mrb[20].mxu1 %v1589_v33 }
  0x6b   :  { %1009 = vmatmul.mubr.bf16.gmra.mrb[4].mxu0 %v1586_v31  ;;  %1383 = vmatpush1.bf16.msra.mxu1 %v1819_v43  ;;  %v1594_v43 = vld [vmem:[%s2229_s0 + $0xa8] ss:$20 sps:$4 sm:$0xff]  }
  0x6c   :  { %1018 = vmatprep.mubr.bf16.mxu0 %v1605_v25  ;;  %1368 = vmatprep.subr.bf16.mxu1 %v1829_v45  ;;  %v1597_v45 = vld [vmem:[%s2229_s0 + $0xb0] ss:$20 sps:$4 sm:$0xff]  }
  0x6d   :  { %856 = vmatprep.mubr.bf16.mxu1 %v1273_v35 }
  0x6f   :  { %1384 = vmatpush1.bf16.msra.mxu1 %v1837_v47  ;;  %v1598_v47 = vld [vmem:[%s2229_s0 + $0xd4] ss:$20 sps:$4 sm:$0xff]  }
  0x70   :  { %1369 = vmatprep.subr.bf16.mxu1 %v1849_v50  ;;  %v1601_v50 = vld [vmem:[%s2229_s0 + $0xd8] ss:$20 sps:$4 sm:$0xff]  }
  0x72   :  { %857 = vmatmul.mubr.bf16.gmra.mrb[24].mxu1 %v1272_v46 }
  0x73   :  { %1019 = vmatmul.mubr.bf16.gmra.mrb[8].mxu0 %v1590_v37  ;;  %1385 = vmatpush1.bf16.msra.mxu1 %v1861_v53  ;;  %v1604_v53 = vld [vmem:[%s2229_s0 + $0x100] ss:$0 sps:$4 sm:$0xff]  }
  0x74   :  { %1028 = vmatprep.mubr.bf16.mxu0 %v1605_v25  ;;  %1370 = vmatprep.subr.bf16.mxu1 %v1871_v55 }
  0x75   :  { %937 = vmatprep.mubr.bf16.mxu1 %v1596_v39 }
  0x77   :  { %1386 = vmatpush1.bf16.msra.mxu1 %v1880_v57 }
  0x78   :  { %1371 = vmatprep.subr.bf16.mxu1 %v1889_v59 }
  0x7b   :  { %1029 = vmatmul.mubr.bf16.gmra.mrb[12].mxu0 %v1593_v41  ;;  %1387 = vmatpush1.bf16.msra.mxu1 %v1897_v61 }
  0x7c   :  { %1038 = vmatprep.mubr.bf16.mxu0 %v1605_v25  ;;  %1372 = vmatprep.subr.bf16.mxu1 %v1907_v63 }
  0x7f   :  { %1388 = vmatpush1.bf16.msra.mxu1 %v1916_v2 }
  0x82   :  { %938 = vmatmul.mubr.bf16.vlgmr.msra.gmra.mrb[16].mxu1 %v1594_v43 }
  0x83   :  { %1039 = vmatmul.mubr.bf16.gmra.mrb[16].mxu0 %v1597_v45  ;;  %947 = vmatprep.mubr.bf16.mxu1 %v1598_v47 }
  0x84   :  { %1048 = vmatprep.mubr.bf16.mxu0 %v1605_v25 }
  0x8a   :  { %948 = vmatmul.mubr.bf16.gmra.mrb[20].mxu1 %v1600_v49 }
  0x8b   :  { %1049 = vmatmul.mubr.bf16.gmra.mrb[20].mxu0 %v1601_v50  ;;  %957 = vmatprep.mubr.bf16.mxu1 %v1275_v51 }
  0x8c   :  { %1058 = vmatprep.mubr.bf16.mxu0 %v1605_v25 }
  0x92   :  { %958 = vmatmul.mubr.bf16.gmra.mrb[28].mxu1 %v1274_v52 }
  0x93   :  { %1059 = vmatmul.mubr.bf16.gmra.mrb[24].mxu0 %v1604_v53 }
 0x115   :  { %v798_v54 = vpop.f32.mrb[0].mxu1 }
 0x116   :  { %v800_v55 = vpop.f32.mrb[1].mxu1 }
 0x117   :  { %v802_v56 = vpop.f32.mrb[2].mxu1 }
 0x118   :  { %v804_v57 = vpop.f32.mrb[3].mxu1 }
 0x11d   :  { %v808_v58 = vpop.f32.mrb[4].mxu1 }
 0x11e   :  { %v810_v59 = vpop.f32.mrb[5].mxu1 }
 0x11f   :  { %v812_v60 = vpop.f32.mrb[6].mxu1 }
 0x120   :  { %v814_v61 = vpop.f32.mrb[7].mxu1 }
 0x125   :  { %v818_v62 = vpop.f32.mrb[8].mxu1 }
 0x126   :  { %v820_v63 = vpop.f32.mrb[9].mxu1 }
 0x127   :  { %v2093_v0 = vpop.f32.mrb[10].mxu1 }
 0x128   :  { %v2095_v2 = vpop.f32.mrb[11].mxu1 }
 0x12d   :  { %v2097_v8 = vpop.f32.mrb[12].mxu1 }
 0x12e   :  { %v2099_v10 = vpop.f32.mrb[13].mxu1 }
 0x12f   :  { %v2101_v12 = vpop.f32.mrb[14].mxu1 }
 0x130   :  { %v2103_v14 = vpop.f32.mrb[15].mxu1 }
 0x136   :  { %v1000_v3 = vpop.f32.mrb[0].mxu0 }
 0x137   :  { %v1389_v22 = vadd.f32 %v1000_v3, %v798_v54  ;;  %v1002_v24 = vpop.f32.mrb[1].mxu0 }
 0x138   :  { %v1390_v7 = vadd.f32 %v1002_v24, %v800_v55  ;;  %v1004_v9 = vpop.f32.mrb[2].mxu0 }
 0x139   :  { %v1160_v26 = vadd.f32 %v1389_v22, %v2108_v20  ;;  %v1391_v28 = vadd.f32 %v1004_v9, %v802_v56  ;;  %v1006_v11 = vpop.f32.mrb[3].mxu0 }
 0x13a   :  { %v1161_v13 = vadd.f32 %v1390_v7, %v2110_v5  ;;  %v1392_v30 = vadd.f32 %v1006_v11, %v804_v57 }
 0x13b   :  { %v1186_v32 = vmax.f32 %v1160_v26, 0.0  ;;  %v1162_v15 = vadd.f32 %v1391_v28, %v2108_v20 }
 0x13c   :  { %v1187_v17 = vmax.f32 %v1161_v13, 0.0  ;;  %v1163_v34 = vadd.f32 %v1392_v30, %v2110_v5 }
 0x13d   :  { %1212 = vst [vmem:[%s2231_s3] sm:$0xff] %v1186_v32  ;;  %v1188_v36 = vmax.f32 %v1162_v15, 0.0 }
 0x13e   :  { %1213 = vst [vmem:[%s2231_s3 + $0x8] sm:$0xff] %v1187_v17  ;;  %v1189_v19 = vmax.f32 %v1163_v34, 0.0  ;;  %v1010_v21 = vpop.f32.mrb[4].mxu0 }
 0x13f   :  { %1214 = vst [vmem:[%s2231_s3 + $0x10] sm:$0xff] %v1188_v36  ;;  %v1393_v38 = vadd.f32 %v1010_v21, %v808_v58  ;;  %v1012_v40 = vpop.f32.mrb[5].mxu0 }
 0x140   :  { %1215 = vst [vmem:[%s2231_s3 + $0x18] sm:$0xff] %v1189_v19  ;;  %v1394_v23 = vadd.f32 %v1012_v40, %v810_v59  ;;  %v1014_v25 = vpop.f32.mrb[6].mxu0 }
 0x141   :  { %v1164_v42 = vadd.f32 %v1393_v38, %v2108_v20  ;;  %v1395_v44 = vadd.f32 %v1014_v25, %v812_v60  ;;  %v1016_v27 = vpop.f32.mrb[7].mxu0 }
 0x142   :  { %v1165_v29 = vadd.f32 %v1394_v23, %v2110_v5  ;;  %v1396_v31 = vadd.f32 %v1016_v27, %v814_v61 }
 0x143   :  { %v1190_v33 = vmax.f32 %v1164_v42, 0.0  ;;  %v1166_v35 = vadd.f32 %v1395_v44, %v2108_v20 }
 0x144   :  { %v1191_v37 = vmax.f32 %v1165_v29, 0.0  ;;  %v1167_v46 = vadd.f32 %v1396_v31, %v2110_v5 }
 0x145   :  { %1216 = vst [vmem:[%s2231_s3 + $0x20] sm:$0xff] %v1190_v33  ;;  %v1192_v39 = vmax.f32 %v1166_v35, 0.0  ;;  %v2138_v45 = vpop.f32.mrb[24].mxu1 }
 0x146   :  { %1217 = vst [vmem:[%s2231_s3 + $0x28] sm:$0xff] %v1191_v37  ;;  %v1193_v41 = vmax.f32 %v1167_v46, 0.0  ;;  %v1020_v43 = vpop.f32.mrb[8].mxu0  ;;  %v2143_v49 = vpop.f32.mrb[25].mxu1 }
 0x147   :  { %1218 = vst [vmem:[%s2231_s3 + $0x30] sm:$0xff] %v1192_v39  ;;  %v1397_v47 = vadd.f32 %v1020_v43, %v818_v62  ;;  %v1022_v48 = vpop.f32.mrb[9].mxu0  ;;  %v862_v52 = vpop.f32.mrb[26].mxu1 }
 0x148   :  { %1219 = vst [vmem:[%s2231_s3 + $0x38] sm:$0xff] %v1193_v41  ;;  %v1398_v50 = vadd.f32 %v1022_v48, %v820_v63  ;;  %v1024_v51 = vpop.f32.mrb[10].mxu0  ;;  %v863_v56 = vpop.f32.mrb[27].mxu1 }
 0x149   :  { %v1168_v53 = vadd.f32 %v1397_v47, %v2108_v20  ;;  %v1399_v54 = vadd.f32 %v1024_v51, %v2093_v0  ;;  %v1026_v55 = vpop.f32.mrb[11].mxu0 }
 0x14a   :  { %v1169_v57 = vadd.f32 %v1398_v50, %v2110_v5  ;;  %v1400_v58 = vadd.f32 %v1026_v55, %v2095_v2 }
 0x14b   :  { %v1194_v59 = vmax.f32 %v1168_v53, 0.0  ;;  %v1170_v60 = vadd.f32 %v1399_v54, %v2108_v20 }
 0x14c   :  { %v1195_v61 = vmax.f32 %v1169_v57, 0.0  ;;  %v1171_v62 = vadd.f32 %v1400_v58, %v2110_v5 }
 0x14d   :  { %1220 = vst [vmem:[%s2231_s3 + $0x40] sm:$0xff] %v1194_v59  ;;  %v1196_v63 = vmax.f32 %v1170_v60, 0.0 }
 0x14e   :  { %1221 = vst [vmem:[%s2231_s3 + $0x48] sm:$0xff] %v1195_v61  ;;  %v1197_v0 = vmax.f32 %v1171_v62, 0.0  ;;  %v1030_v4 = vpop.f32.mrb[12].mxu0 }
 0x14f   :  { %1222 = vst [vmem:[%s2231_s3 + $0x50] sm:$0xff] %v1196_v63  ;;  %v1401_v2 = vadd.f32 %v1030_v4, %v2097_v8  ;;  %v1032_v6 = vpop.f32.mrb[13].mxu0 }
 0x150   :  { %1223 = vst [vmem:[%s2231_s3 + $0x58] sm:$0xff] %v1197_v0  ;;  %v1402_v16 = vadd.f32 %v1032_v6, %v2099_v10  ;;  %v1034_v18 = vpop.f32.mrb[14].mxu0 }
 0x151   :  { %v1172_v1 = vadd.f32 %v1401_v2, %v2108_v20  ;;  %v1403_v3 = vadd.f32 %v1034_v18, %v2101_v12  ;;  %v1036_v22 = vpop.f32.mrb[15].mxu0 }
 0x152   :  { %v1173_v24 = vadd.f32 %v1402_v16, %v2110_v5  ;;  %v1404_v7 = vadd.f32 %v1036_v22, %v2103_v14 }
 0x153   :  { %v1198_v9 = vmax.f32 %v1172_v1, 0.0  ;;  %v1174_v8 = vadd.f32 %v1403_v3, %v2108_v20 }
 0x154   :  { %v1199_v26 = vmax.f32 %v1173_v24, 0.0  ;;  %v1175_v28 = vadd.f32 %v1404_v7, %v2110_v5 }
 0x155   :  { %1224 = vst [vmem:[%s2231_s3 + $0x60] sm:$0xff] %v1198_v9  ;;  %v1200_v10 = vmax.f32 %v1174_v8, 0.0  ;;  %v939_v11 = vpop.f32.mrb[16].mxu1 }
 0x156   :  { %1225 = vst [vmem:[%s2231_s3 + $0x68] sm:$0xff] %v1199_v26  ;;  %v1201_v12 = vmax.f32 %v1175_v28, 0.0  ;;  %v1040_v13 = vpop.f32.mrb[16].mxu0  ;;  %v941_v30 = vpop.f32.mrb[17].mxu1 }
 0x157   :  { %1226 = vst [vmem:[%s2231_s3 + $0x70] sm:$0xff] %v1200_v10  ;;  %v1405_v14 = vadd.f32 %v1040_v13, %v939_v11  ;;  %v1042_v32 = vpop.f32.mrb[17].mxu0  ;;  %v943_v17 = vpop.f32.mrb[18].mxu1 }
 0x158   :  { %1227 = vst [vmem:[%s2231_s3 + $0x78] sm:$0xff] %v1201_v12  ;;  %v1406_v15 = vadd.f32 %v1042_v32, %v941_v30  ;;  %v1044_v34 = vpop.f32.mrb[18].mxu0  ;;  %v945_v21 = vpop.f32.mrb[19].mxu1 }
 0x159   :  { %v1176_v36 = vadd.f32 %v1405_v14, %v2108_v20  ;;  %v1407_v19 = vadd.f32 %v1044_v34, %v943_v17  ;;  %v1046_v38 = vpop.f32.mrb[19].mxu0 }
 0x15a   :  { %v1177_v40 = vadd.f32 %v1406_v15, %v2110_v5  ;;  %v1408_v23 = vadd.f32 %v1046_v38, %v945_v21 }
 0x15b   :  { %v1202_v25 = vmax.f32 %v1176_v36, 0.0  ;;  %v1178_v42 = vadd.f32 %v1407_v19, %v2108_v20 }
 0x15c   :  { %v1203_v44 = vmax.f32 %v1177_v40, 0.0  ;;  %v1179_v27 = vadd.f32 %v1408_v23, %v2110_v5 }
 0x15d   :  { %1228 = vst [vmem:[%s2231_s3 + $0x80] sm:$0xff] %v1202_v25  ;;  %v1204_v29 = vmax.f32 %v1178_v42, 0.0  ;;  %v949_v33 = vpop.f32.mrb[20].mxu1 }
 0x15e   :  { %1229 = vst [vmem:[%s2231_s3 + $0x88] sm:$0xff] %v1203_v44  ;;  %v1205_v31 = vmax.f32 %v1179_v27, 0.0  ;;  %v1050_v35 = vpop.f32.mrb[20].mxu0  ;;  %v951_v46 = vpop.f32.mrb[21].mxu1 }
 0x15f   :  { %1230 = vst [vmem:[%s2231_s3 + $0x90] sm:$0xff] %v1204_v29  ;;  %v1409_v37 = vadd.f32 %v1050_v35, %v949_v33  ;;  %v1052_v39 = vpop.f32.mrb[21].mxu0  ;;  %v953_v43 = vpop.f32.mrb[22].mxu1 }
 0x160   :  { %1231 = vst [vmem:[%s2231_s3 + $0x98] sm:$0xff] %v1205_v31  ;;  %v1410_v41 = vadd.f32 %v1052_v39, %v951_v46  ;;  %v1054_v47 = vpop.f32.mrb[22].mxu0  ;;  %v955_v51 = vpop.f32.mrb[23].mxu1 }
 0x161   :  { %v1180_v48 = vadd.f32 %v1409_v37, %v2108_v20  ;;  %v1411_v50 = vadd.f32 %v1054_v47, %v953_v43  ;;  %v1056_v52 = vpop.f32.mrb[23].mxu0 }
 0x162   :  { %v1181_v53 = vadd.f32 %v1410_v41, %v2110_v5  ;;  %v1412_v54 = vadd.f32 %v1056_v52, %v955_v51 }
 0x163   :  { %v1206_v55 = vmax.f32 %v1180_v48, 0.0  ;;  %v1182_v56 = vadd.f32 %v1411_v50, %v2108_v20 }
 0x164   :  { %v1207_v57 = vmax.f32 %v1181_v53, 0.0  ;;  %v1183_v58 = vadd.f32 %v1412_v54, %v2110_v5 }
 0x165   :  { %1232 = vst [vmem:[%s2231_s3 + $0xa0] sm:$0xff] %v1206_v55  ;;  %v1208_v59 = vmax.f32 %v1182_v56, 0.0  ;;  %v959_v61 = vpop.f32.mrb[28].mxu1 }
 0x166   :  { %1233 = vst [vmem:[%s2231_s3 + $0xa8] sm:$0xff] %v1207_v57  ;;  %v1209_v60 = vmax.f32 %v1183_v58, 0.0  ;;  %v1060_v62 = vpop.f32.mrb[24].mxu0  ;;  %v960_v63 = vadd.f32 %v959_v61, %v2138_v45  ;;  %v961_v0 = vpop.f32.mrb[29].mxu1 }
 0x167   :  { %1234 = vst [vmem:[%s2231_s3 + $0xb0] sm:$0xff] %v1208_v59  ;;  %v1062_v4 = vpop.f32.mrb[25].mxu0  ;;  %v962_v2 = vadd.f32 %v961_v0, %v2143_v49  ;;  %v963_v6 = vpop.f32.mrb[30].mxu1 }
 0x168   :  { %1235 = vst [vmem:[%s2231_s3 + $0xb8] sm:$0xff] %v1209_v60  ;;  %v1064_v16 = vpop.f32.mrb[26].mxu0  ;;  %v1061_v18 = vadd.f32 %v1060_v62, %v960_v63  ;;  %v964_v1 = vpop.f32.mrb[31].mxu1 }
 0x169   :  { %v1065_v3 = vpop.f32.mrb[27].mxu0  ;;  %v1063_v22 = vadd.f32 %v1062_v4, %v962_v2 }
 0x16a   :  { %v1184_v24 = vadd.f32 %v2108_v20, %v1061_v18 }
 0x16b   :  { %v1185_v7 = vadd.f32 %v2110_v5, %v1063_v22 }
 0x16c   :  { %v1210_v9 = vmax.f32 %v1184_v24, 0.0 }
 0x16d   :  { %v1211_v45 = vmax.f32 %v1185_v7, 0.0 }
 0x16e   :  { %1236 = vst [vmem:[%s2231_s3 + $0xc0] sm:$0xff] %v1210_v9 }
 0x16f   :  { %1237 = vst [vmem:[%s2231_s3 + $0xc8] sm:$0xff] %v1211_v45 }

// kernel: _lambda_.10
= control target key start
LH: loop header
LB: loop body
LE: loop exit
PB: predicated region body
PF: predicated region fallthrough
CT: control target
= control target key end

     0   :  { %s1244_s12 = smov 0   ;;  %s1246_s13 = smov 0   ;;  %s1396_s0 = inlined_call_operand.vmem [shape: bf16[24,1792], index: 0, kind: input, shape index: {}]   ;;  %s1397_s1 = inlined_call_operand.vmem [shape: bf16[1792,384], index: 1, kind: input, shape index: {}]   ;;  %s1398_s2 = inlined_call_operand.vmem [shape: f32[1,384], index: 2, kind: input, shape index: {}]   ;;  %s1399_s3 = inlined_call_operand.vmem [shape: f32[24,384], index: 3, kind: output, shape index: {}]  }
   0x1   :  { %s1248_s14 = smov 0   ;;  %s1250_s15 = smov 0  }
   0x2   :  { %s1252_s16 = smov 0  }
   0x3 LB: > { %s25_s17 = sadd.s32 1, %s1217_s15  ;;  %p48_p1 = scmp.ne.s32.totalorder %s1209_s13, %s1205_s12  ;;  %s1221_s16 = sphi %s1252_s16, %s13_s16   ;;  %s1217_s15 = sphi %s1250_s15, %s1403_s15   ;;  %s1213_s14 = sphi %s1248_s14, %s1402_s14   ;;  %s1209_s13 = sphi %s1246_s13, %s1401_s13   ;;  %s1205_s12 = sphi %s1244_s12, %s1400_s12  }
   0x4   : > { %p26_p0 = scmp.ge.s32.totalorder %s25_s17, 7  ;;  %p49_p2 = scmp.eq.s32.totalorder %s1221_s16, 0 }
   0x5   : > { %s41_s19 = sadd.s32 1, %s1209_s13  ;;  %p977_p5 = scmp.ge.s32.totalorder %s1221_s16, 7 }
   0x6   : > { %s1405_s17 = smov (%p26_p0, %s25_s17), 0  ;;  %p50_p3 = por %p49_p2, %p48_p1 }
   0x7   : > { %s37_s18 = ssub.s32 %s1217_s15, %s1405_s17  ;;  %164 = sbr.rel (%p977_p5) target bundleno = 21 (0x15), region = 20 }
   0x8   : > { %p39_p4 = scmp.eq.s32.totalorder %s37_s18, 0 }
   0xa   : > { %s1279_s20 = scalar_select %p39_p4, %s1209_s13, %s41_s19  }
   0xe   : > { %167 = sbr.rel (!%p50_p3) target bundleno = 21 (0x15), region = 24  ;;  %s169_s21 = sand.u32 (%p50_p3), 1, %s1209_s13  }
   0xf   : > { %s1041_s22 = sshll.u32 (%p50_p3), %s1217_s15, 3  ;;  %s1070_s23 = smul.u32 (%p50_p3), 24, %s169_s21 }
  0x10   : > { %s177_s26 = scalar_lea.vmem (%p50_p3), %s1396_s0, %s1041_s22 }
  0x11   : > { %v209_v0 = vld [vmem:[%s177_s26] sm:$0xff] (%p50_p3)  ;;  %v211_v1 = vld [vmem:[%s177_s26 + $0x38] sm:$0xff] (%p50_p3)  ;;  %v213_v2 = vld [vmem:[%s177_s26 + $0x70] sm:$0xff] (%p50_p3)  ;;  %s171_s27 = scalar_lea.vmem (%p50_p3), [#allocation3], %s1070_s23 }
  0x12   : > { %210 = vst [vmem:[%s171_s27] sm:$0xff] (%p50_p3), %v209_v0  ;;  %212 = vst [vmem:[%s171_s27 + $0x8] sm:$0xff] (%p50_p3), %v211_v1 }
  0x13   : > { %214 = vst [vmem:[%s171_s27 + $0x10] sm:$0xff] (%p50_p3), %v213_v2 }
  0x15 PF: > { %p980_p6 = scmp.ge.s32.totalorder %s1221_s16, 1  ;;  %p234_p7 = scmp.lt.s32.totalorder %s1221_s16, 8 }
  0x17   : > { %p235_p8 = pnand %p980_p6, %p234_p7 }
  0x18   : > { %s241_s28 = sand.u32 (!%p235_p8), 1, %s1205_s12   ;;  %s981_s29 = sshll.u32 (!%p235_p8), %s1213_s14, 5 }
  0x19   : > { %238 = sbr.rel (%p235_p8) target bundleno = 340 (0x154), region = 66  ;;  %p287_p9 = scmp.lt.s32.totalorder (!%p235_p8), %s981_s29, 223 }
  0x1a   : > { %s1071_s30 = smul.u32 (!%p235_p8), 24, %s241_s28  ;;  %p983_p10 = scmp.ne.s32.totalorder (!%p235_p8), %s1213_s14, 0 }
  0x1c   : > { %s1296_s8 = scalar_lea.vmem (!%p235_p8), [#allocation3], %s1071_s30 }
  0x20   : > { %s1407_s29 = smov (!%p287_p9, %s981_s29), 223  ;;  %318 = sbr.rel (%p983_p10) target bundleno = 39 (0x27), region = 74 }
  0x21   : > { %s1072_s4 = smul.u32 12, %s1407_s29  ;;  %v1223_v3 = vmov (!%p983_p10), 0.0  }
  0x22   : > { %319 = vst [vmem:[#allocation2] sm:$0xff] (!%p983_p10), %v1223_v3  ;;  %320 = vst [vmem:[#allocation2 + $0x8] sm:$0xff] (!%p983_p10), %v1223_v3 }
  0x23   : > { %s1294_s7 = scalar_lea.vmem %s1397_s1, %s1072_s4  ;;  %321 = vst [vmem:[#allocation2 + $0x10] sm:$0xff] (!%p983_p10), %v1223_v3  ;;  %322 = vst [vmem:[#allocation2 + $0x18] sm:$0xff] (!%p983_p10), %v1223_v3 }
  0x24   : > { %323 = vst [vmem:[#allocation2 + $0x20] sm:$0xff] (!%p983_p10), %v1223_v3  ;;  %324 = vst [vmem:[#allocation2 + $0x28] sm:$0xff] (!%p983_p10), %v1223_v3 }
  0x25   : > { %325 = vst [vmem:[#allocation2 + $0x30] sm:$0xff] (!%p983_p10), %v1223_v3  ;;  %326 = vst [vmem:[#allocation2 + $0x38] sm:$0xff] (!%p983_p10), %v1223_v3 }
  0x26   : > { %327 = vst [vmem:[#allocation2 + $0x40] sm:$0xff] (!%p983_p10), %v1223_v3 }
  0x27 PF: > { %v1114_v4 = vld [vmem:[%s1294_s7 + $0x4] ss:$12 sps:$4 sm:$0xff]   ;;  %v1116_v5 = vld [vmem:[%s1294_s7] ss:$12 sps:$4 sm:$0xff]   ;;  %v1117_v6 = vld [vmem:[%s1294_s7 + $0x1c] ss:$12 sps:$4 sm:$0xff]  }
  0x28   : > { %677 = vmatprep.subr.bf16.mxu0 %v1114_v4  ;;  %v1119_v7 = vld [vmem:[%s1294_s7 + $0x18] ss:$12 sps:$4 sm:$0xff]   ;;  %v1120_v8 = vld [vmem:[%s1294_s7 + $0x34] ss:$12 sps:$4 sm:$0xff]   ;;  %v1122_v9 = vld [vmem:[%s1294_s7 + $0x30] ss:$12 sps:$4 sm:$0xff]  }
  0x29   : > { %678 = vmatpush1.bf16.msra.mxu0 %v1116_v5  ;;  %v1123_v10 = vld [vmem:[%s1294_s7 + $0x4c] ss:$12 sps:$4 sm:$0xff]   ;;  %v1135_v11 = vld [vmem:[%s1294_s7 + $0xc8] ss:$12 sps:$4 sm:$0xff]   ;;  %v1126_v13 = vld [vmem:[%s1294_s7 + $0x64] ss:$12 sps:$4 sm:$0xff]  }
  0x2a   : > { %679 = vmatprep.subr.bf16.mxu0 %v1117_v6  ;;  %v1125_v12 = vld [vmem:[%s1294_s7 + $0x48] ss:$12 sps:$4 sm:$0xff]   ;;  %1042 = vmatprep.subr.bf16.mxu1 %v1135_v11  ;;  %v1140_v15 = vld [vmem:[%s1294_s7 + $0xe0] ss:$12 sps:$4 sm:$0xff]   ;;  %v1145_v19 = vld [vmem:[%s1294_s7 + $0xf8] ss:$12 sps:$4 sm:$0xff]  }
  0x2b   : > { %v1138_v14 = vld [vmem:[%s1294_s7 + $0x8] ss:$12 sps:$4 sm:$0xff]   ;;  %v1128_v16 = vld [vmem:[%s1294_s7 + $0x60] ss:$12 sps:$4 sm:$0xff]   ;;  %v1131_v20 = vld [vmem:[%s1294_s7 + $0x78] ss:$12 sps:$4 sm:$0xff]  }
  0x2c   : > { %1043 = vmatpush3.bf16.msra.mxu1 %v1138_v14  ;;  %v1129_v17 = vld [vmem:[%s1294_s7 + $0x7c] ss:$12 sps:$4 sm:$0xff]   ;;  %v1143_v18 = vld [vmem:[%s1294_s7 + $0x20] ss:$12 sps:$4 sm:$0xff]   ;;  %v1148_v21 = vld [vmem:[%s1294_s7 + $0x38] ss:$12 sps:$4 sm:$0xff]  }
  0x2d   : > { %680 = vmatpush1.bf16.msra.mxu0 %v1119_v7  ;;  %1044 = vmatprep.subr.bf16.mxu1 %v1140_v15  ;;  %v1132_v22 = vld [vmem:[%s1294_s7 + $0x94] ss:$12 sps:$4 sm:$0xff]   ;;  %v1150_v23 = vld [vmem:[%s1294_s7 + $0x110] ss:$12 sps:$4 sm:$0xff]   ;;  %v1136_v27 = vld [vmem:[%s1294_s7 + $0xac] ss:$12 sps:$4 sm:$0xff]  }
  0x2e   : > { %681 = vmatprep.subr.bf16.mxu0 %v1120_v8  ;;  %v1134_v24 = vld [vmem:[%s1294_s7 + $0x90] ss:$12 sps:$4 sm:$0xff]   ;;  %v1155_v26 = vld [vmem:[%s1294_s7 + $0x128] ss:$12 sps:$4 sm:$0xff]   ;;  %v1160_v30 = vld [vmem:[%s1294_s7 + $0x140] ss:$12 sps:$4 sm:$0xff]  }
  0x2f   : > { %v1153_v25 = vld [vmem:[%s1294_s7 + $0x50] ss:$12 sps:$4 sm:$0xff]   ;;  %v1139_v28 = vld [vmem:[%s1294_s7 + $0xa8] ss:$12 sps:$4 sm:$0xff]   ;;  %v1144_v32 = vld [vmem:[%s1294_s7 + $0xc0] ss:$12 sps:$4 sm:$0xff]  }
  0x30   : > { %1045 = vmatpush3.bf16.msra.mxu1 %v1143_v18  ;;  %v1158_v29 = vld [vmem:[%s1294_s7 + $0x68] ss:$12 sps:$4 sm:$0xff]   ;;  %v1141_v31 = vld [vmem:[%s1294_s7 + $0xc4] ss:$12 sps:$4 sm:$0xff]   ;;  %v1163_v33 = vld [vmem:[%s1294_s7 + $0x80] ss:$12 sps:$4 sm:$0xff]  }
  0x31   : > { %682 = vmatpush1.bf16.msra.mxu0 %v1122_v9  ;;  %1046 = vmatprep.subr.bf16.mxu1 %v1145_v19  ;;  %v1165_v34 = vld [vmem:[%s1294_s7 + $0x158] ss:$12 sps:$4 sm:$0xff]   ;;  %v1146_v35 = vld [vmem:[%s1294_s7 + $0xdc] ss:$12 sps:$4 sm:$0xff]   ;;  %v1151_v39 = vld [vmem:[%s1294_s7 + $0xf4] ss:$12 sps:$4 sm:$0xff]  }
  0x32   : > { %683 = vmatprep.subr.bf16.mxu0 %v1123_v10  ;;  %v1168_v36 = vld [vmem:[%s1294_s7 + $0x98] ss:$12 sps:$4 sm:$0xff]   ;;  %v1170_v38 = vld [vmem:[%s1294_s7 + $0x170] ss:$12 sps:$4 sm:$0xff]   ;;  %v1159_v47 = vld [vmem:[%s1294_s7 + $0x108] ss:$12 sps:$4 sm:$0xff]  }
  0x33   : > { %v1149_v37 = vld [vmem:[%s1294_s7 + $0xd8] ss:$12 sps:$4 sm:$0xff]   ;;  %v1173_v41 = vld [vmem:[%s1294_s7 + $0xb0] ss:$12 sps:$4 sm:$0xff]   ;;  %v1164_v49 = vld [vmem:[%s1294_s7 + $0x120] ss:$12 sps:$4 sm:$0xff]  }
  0x34   : > { %1047 = vmatpush3.bf16.msra.mxu1 %v1148_v21  ;;  %v1177_v40 = vld [vmem:[%s1296_s8 + $0x4] ss:$8 sps:$4 sm:$0xff]   ;;  %v1154_v42 = vld [vmem:[%s1294_s7 + $0xf0] ss:$12 sps:$4 sm:$0xff]   ;;  %p1036_p11 = scmp.ne.s32.totalorder %s1213_s14, 6 }
  0x35   : > { %684 = vmatpush1.bf16.msra.mxu0 %v1125_v12  ;;  %1048 = vmatprep.subr.bf16.mxu1 %v1150_v23  ;;  %v339_v43 = vld [vmem:[%s1296_s8 + $0x10] sm:$0xff]  ;;  %v1175_v45 = vld [vmem:[%s1296_s8] ss:$8 sps:$4 sm:$0xff]  }
  0x36   : > { %685 = vmatprep.subr.bf16.mxu0 %v1126_v13  ;;  %v1156_v44 = vld [vmem:[%s1294_s7 + $0x10c] ss:$12 sps:$4 sm:$0xff]   ;;  %760 = vmatprep.mubr.bf16.mxu1 %v1177_v40  ;;  %v987_v46 = vcombine.high %v339_v43, %v339_v43  ;;  %v1161_v48 = vld [vmem:[%s1294_s7 + $0x124] ss:$12 sps:$4 sm:$0xff]   ;;  %v1166_v50 = vld [vmem:[%s1294_s7 + $0x13c] ss:$12 sps:$4 sm:$0xff]   ;;  %v986_v51 = vcombine.low %v339_v43, %v339_v43 }
  0x37   : > { %709 = vmatprep.mubr.bf16.mxu0 %v1177_v40  ;;  %v1169_v52 = vld [vmem:[%s1294_s7 + $0x138] ss:$12 sps:$4 sm:$0xff]   ;;  %v1171_v53 = vld [vmem:[%s1294_s7 + $0x154] ss:$12 sps:$4 sm:$0xff]   ;;  %v1174_v54 = vld [vmem:[%s1294_s7 + $0x150] ss:$12 sps:$4 sm:$0xff]  }
  0x38   : > { %1049 = vmatpush3.bf16.msra.mxu1 %v1153_v25  ;;  %v1178_v55 = vld [vmem:[%s1294_s7 + $0x16c] ss:$12 sps:$4 sm:$0xff]   ;;  %v1180_v56 = vld [vmem:[%s1294_s7 + $0x168] ss:$12 sps:$4 sm:$0xff]   ;;  %v336_v4 = vld [vmem:[#allocation2 + $0x40] sm:$0xff] }
  0x39   : > { %686 = vmatpush1.bf16.msra.mxu0 %v1128_v16  ;;  %1050 = vmatprep.subr.bf16.mxu1 %v1155_v26  ;;  %v330_v58 = vld [vmem:[#allocation2 + $0x10] sm:$0xff]  ;;  %v333_v62 = vld [vmem:[#allocation2 + $0x28] sm:$0xff]  ;;  %v328_v10 = vld [vmem:[#allocation2] sm:$0xff] }
  0x3a   : > { %687 = vmatprep.subr.bf16.mxu0 %v1129_v17  ;;  %v329_v11 = vld [vmem:[#allocation2 + $0x8] sm:$0xff]  ;;  %v331_v13 = vld [vmem:[#allocation2 + $0x18] sm:$0xff]  ;;  %v332_v16 = vld [vmem:[#allocation2 + $0x20] sm:$0xff] }
  0x3b   : > { %v335_v23 = vld [vmem:[#allocation2 + $0x38] sm:$0xff] }
  0x3c   : > { %1051 = vmatpush3.bf16.msra.mxu1 %v1158_v29 }
  0x3d   : > { %688 = vmatpush1.bf16.msra.mxu0 %v1131_v20  ;;  %1052 = vmatprep.subr.bf16.mxu1 %v1160_v30  ;;  %v809_v30 = vlaneseq (!%p1036_p11) }
  0x3e   : > { %689 = vmatprep.subr.bf16.mxu0 %v1132_v22  ;;  %v334_v22 = vld [vmem:[#allocation2 + $0x30] sm:$0xff] }
  0x40   : > { %1053 = vmatpush3.bf16.msra.mxu1 %v1163_v33 }
  0x41   : > { %690 = vmatpush1.bf16.msra.mxu0 %v1134_v24  ;;  %1054 = vmatprep.subr.bf16.mxu1 %v1165_v34 }
  0x42   : > { %691 = vmatprep.subr.bf16.mxu0 %v1136_v27 }
  0x44   : > { %1055 = vmatpush3.bf16.msra.mxu1 %v1168_v36 }
  0x45   : > { %692 = vmatpush1.bf16.msra.mxu0 %v1139_v28  ;;  %1056 = vmatprep.subr.bf16.mxu1 %v1170_v38 }
  0x46   : > { %693 = vmatprep.subr.bf16.mxu0 %v1141_v31  ;;  %v810_v31 = vshrl.u32 (!%p1036_p11), %v809_v30, 7 }
  0x48   : > { %1057 = vmatpush3.bf16.msra.mxu1 %v1173_v41  ;;  %v811_v34 = vsub.s32 (!%p1036_p11), 0, %v810_v31  ;;  %v815_v36 = vsub.s32 (!%p1036_p11), 1, %v810_v31 }
  0x49   : > { %694 = vmatpush1.bf16.msra.mxu0 %v1144_v32  ;;  %v807_v32 = vld [vmem:[%s1398_s2] sm:$0x7] (!%p1036_p11) }
  0x4a   : > { %695 = vmatprep.subr.bf16.mxu0 %v1146_v35  ;;  %v812_v41 = vrot.slane (!%p1036_p11), %v807_v32, %v811_v34 }
  0x4b   : > { %761 = vmatmul.mubr.bf16.vlgmr.msra.gmra.mrb[0].mxu1 %v1175_v45 }
  0x4c   : > { %768 = vmatprep.mubr.bf16.mxu1 %v987_v46 }
  0x4d   : > { %696 = vmatpush1.bf16.msra.mxu0 %v1149_v37  ;;  %v819_v37 = vsub.s32 (!%p1036_p11), 2, %v810_v31 }
  0x4e   : > { %697 = vmatprep.subr.bf16.mxu0 %v1151_v39 }
  0x4f   : > { %v820_v43 = vrot.slane (!%p1036_p11), %v807_v32, %v819_v37 }
  0x51   : > { %698 = vmatpush1.bf16.msra.mxu0 %v1154_v42  ;;  %v816_v42 = vrot.slane (!%p1036_p11), %v807_v32, %v815_v36 }
  0x52   : > { %699 = vmatprep.subr.bf16.mxu0 %v1156_v44 }
  0x53   : > { %769 = vmatmul.mubr.bf16.gmra.mrb[4].mxu1 %v986_v51 }
  0x55   : > { %700 = vmatpush1.bf16.msra.mxu0 %v1159_v47 }
  0x56   : > { %701 = vmatprep.subr.bf16.mxu0 %v1161_v48 }
  0x59   : > { %702 = vmatpush1.bf16.msra.mxu0 %v1164_v49 }
  0x5a   : > { %703 = vmatprep.subr.bf16.mxu0 %v1166_v50 }
  0x5d   : > { %704 = vmatpush1.bf16.msra.mxu0 %v1169_v52 }
  0x5e   : > { %705 = vmatprep.subr.bf16.mxu0 %v1171_v53 }
  0x61   : > { %706 = vmatpush1.bf16.msra.mxu0 %v1174_v54 }
  0x62   : > { %707 = vmatprep.subr.bf16.mxu0 %v1178_v55 }
  0x65   : > { %708 = vmatpush1.bf16.msra.mxu0 %v1180_v56 }
  0x68   : > { %710 = vmatmul.mubr.bf16.vlgmr.msra.gmra.mrb[0].mxu0 %v1175_v45 }
  0x69   : > { %719 = vmatprep.mubr.bf16.mxu0 %v987_v46 }
  0x70   : > { %720 = vmatmul.mubr.bf16.gmra.mrb[4].mxu0 %v986_v51 }
 0x11e   : > { %v1058_v57 = vpop.f32.mrb[0].mxu1 }
 0x11f   : > { %v1059_v59 = vpop.f32.mrb[1].mxu1 }
 0x120   : > { %v1060_v60 = vadd.f32 %v1059_v59, %v1058_v57  ;;  %v1061_v61 = vpop.f32.mrb[2].mxu1 }
 0x121   : > { %v1062_v63 = vpop.f32.mrb[3].mxu1 }
 0x122   : > { %v778_v0 = vadd.f32 %v1060_v60, %v330_v58  ;;  %v1063_v1 = vadd.f32 %v1062_v63, %v1061_v61 }
 0x124   : > { %787 = vst [vmem:[#allocation2 + $0x10] sm:$0xff] %v778_v0  ;;  %v781_v2 = vadd.f32 %v1063_v1, %v333_v62 }
 0x126   : > { %790 = vst [vmem:[#allocation2 + $0x28] sm:$0xff] %v781_v2  ;;  %v1064_v3 = vpop.f32.mrb[4].mxu1 }
 0x127   : > { %v1065_v5 = vpop.f32.mrb[5].mxu1 }
 0x128   : > { %v1066_v6 = vadd.f32 %v1065_v5, %v1064_v3  ;;  %v1067_v7 = vpop.f32.mrb[6].mxu1 }
 0x129   : > { %v1068_v8 = vpop.f32.mrb[7].mxu1 }
 0x12a   : > { %v784_v9 = vadd.f32 %v1066_v6, %v336_v4 }
 0x12b   : > { %v800_v38 = vld [vmem:[#allocation2 + $0x10] sm:$0xff] (!%p1036_p11) }
 0x12c   : > { %793 = vst [vmem:[#allocation2 + $0x40] sm:$0xff] %v784_v9  ;;  %v826_v49 = vadd.f32 (!%p1036_p11), %v820_v43, %v800_v38 }
 0x12d   : > { %v803_v44 = vld [vmem:[#allocation2 + $0x28] sm:$0xff] (!%p1036_p11) }
 0x12e   : > { %v829_v52 = vadd.f32 (!%p1036_p11), %v820_v43, %v803_v44  ;;  %v835_v58 = vmax.f32 (!%p1036_p11), %v826_v49, 0.0 }
 0x130   : > { %v838_v61 = vmax.f32 (!%p1036_p11), %v829_v52, 0.0  ;;  %844 = vst [vmem:[%s1399_s3 + $0x10] sm:$0xff] (!%p1036_p11), %v835_v58 }
 0x132   : > { %847 = vst [vmem:[%s1399_s3 + $0x28] sm:$0xff] (!%p1036_p11), %v838_v61 }
 0x133   : > { %v806_v55 = vld [vmem:[#allocation2 + $0x40] sm:$0xff] (!%p1036_p11) }
 0x134   : > { %v832_v0 = vadd.f32 (!%p1036_p11), %v820_v43, %v806_v55 }
 0x136   : > { %v841_v1 = vmax.f32 (!%p1036_p11), %v832_v0, 0.0 }
 0x138   : > { %850 = vst [vmem:[%s1399_s3 + $0x40] sm:$0xff] (!%p1036_p11), %v841_v1 }
 0x13b   : > { %v711_v12 = vpop.f32.mrb[0].mxu0 }
 0x13c   : > { %v776_v14 = vadd.f32 %v711_v12, %v328_v10  ;;  %v713_v15 = vpop.f32.mrb[1].mxu0 }
 0x13d   : > { %v777_v17 = vadd.f32 %v713_v15, %v329_v11  ;;  %v715_v18 = vpop.f32.mrb[2].mxu0 }
 0x13e   : > { %785 = vst [vmem:[#allocation2] sm:$0xff] %v776_v14  ;;  %v779_v19 = vadd.f32 %v715_v18, %v331_v13  ;;  %v717_v20 = vpop.f32.mrb[3].mxu0 }
 0x13f   : > { %786 = vst [vmem:[#allocation2 + $0x8] sm:$0xff] %v777_v17  ;;  %v780_v21 = vadd.f32 %v717_v20, %v332_v16 }
 0x140   : > { %788 = vst [vmem:[#allocation2 + $0x18] sm:$0xff] %v779_v19 }
 0x141   : > { %789 = vst [vmem:[#allocation2 + $0x20] sm:$0xff] %v780_v21  ;;  %797 = sbr.rel (%p1036_p11) target bundleno = 340 (0x154), region = 78 }
 0x143   : > { %v721_v24 = vpop.f32.mrb[4].mxu0 }
 0x144   : > { %v782_v25 = vadd.f32 %v721_v24, %v334_v22  ;;  %v723_v26 = vpop.f32.mrb[5].mxu0 }
 0x145   : > { %v783_v27 = vadd.f32 %v723_v26, %v335_v23  ;;  %v725_v28 = vpop.f32.mrb[6].mxu0  ;;  %v798_v33 = vld [vmem:[#allocation2] sm:$0xff] (!%p1036_p11) }
 0x146   : > { %791 = vst [vmem:[#allocation2 + $0x30] sm:$0xff] %v782_v25  ;;  %v726_v29 = vpop.f32.mrb[7].mxu0  ;;  %v799_v35 = vld [vmem:[#allocation2 + $0x8] sm:$0xff] (!%p1036_p11)  ;;  %v824_v47 = vadd.f32 (!%p1036_p11), %v812_v41, %v798_v33 }
 0x147   : > { %792 = vst [vmem:[#allocation2 + $0x38] sm:$0xff] %v783_v27  ;;  %v801_v39 = vld [vmem:[#allocation2 + $0x18] sm:$0xff] (!%p1036_p11)  ;;  %v825_v48 = vadd.f32 (!%p1036_p11), %v816_v42, %v799_v35 }
 0x148   : > { %v802_v40 = vld [vmem:[#allocation2 + $0x20] sm:$0xff]  ;;  %v827_v50 = vadd.f32 %v812_v41, %v801_v39  ;;  %v833_v56 = vmax.f32 %v824_v47, 0.0 }
 0x149   : > { %v828_v51 = vadd.f32 %v816_v42, %v802_v40  ;;  %v834_v57 = vmax.f32 %v825_v48, 0.0 }
 0x14a   : > { %v836_v59 = vmax.f32 %v827_v50, 0.0  ;;  %842 = vst [vmem:[%s1399_s3] sm:$0xff] %v833_v56 }
 0x14b   : > { %v837_v60 = vmax.f32 %v828_v51, 0.0  ;;  %843 = vst [vmem:[%s1399_s3 + $0x8] sm:$0xff] %v834_v57 }
 0x14c   : > { %845 = vst [vmem:[%s1399_s3 + $0x18] sm:$0xff] %v836_v59 }
 0x14d   : > { %v804_v45 = vld [vmem:[#allocation2 + $0x30] sm:$0xff]  ;;  %846 = vst [vmem:[%s1399_s3 + $0x20] sm:$0xff] %v837_v60 }
 0x14e   : > { %v805_v46 = vld [vmem:[#allocation2 + $0x38] sm:$0xff]  ;;  %v830_v53 = vadd.f32 %v812_v41, %v804_v45 }
 0x14f   : > { %v831_v54 = vadd.f32 %v816_v42, %v805_v46 }
 0x150   : > { %v839_v62 = vmax.f32 %v830_v53, 0.0 }
 0x151   : > { %v840_v63 = vmax.f32 %v831_v54, 0.0 }
 0x152   : > { %848 = vst [vmem:[%s1399_s3 + $0x30] sm:$0xff] %v839_v62 }
 0x153   : > { %849 = vst [vmem:[%s1399_s3 + $0x38] sm:$0xff] %v840_v63 }
 0x154 PF: > { %s13_s16 = sadd.s32 1, %s1221_s16   ;;  %s1400_s12 = smov %s1209_s13 }
 0x155   : > { %p10_p12 = scmp.ge.s32.totalorder %s13_s16, 9   ;;  %s1401_s13 = smov %s1279_s20 }
 0x156   : > { %s1402_s14 = smov %s1217_s15  ;;  %s1403_s15 = smov %s1405_s17 }
 0x157   :  { %12 = sbr.rel (!%p10_p12) target bundleno = 3 (0x3), region = 119 }

// kernel: _lambda_.11
= control target key start
LH: loop header
LB: loop body
LE: loop exit
PB: predicated region body
PF: predicated region fallthrough
CT: control target
= control target key end

     0   :  { %s1194_s12 = smov 0   ;;  %s1196_s13 = smov 0   ;;  %s1341_s0 = inlined_call_operand.vmem [shape: bf16[24,3456], index: 0, kind: input, shape index: {}]   ;;  %s1342_s1 = inlined_call_operand.vmem [shape: bf16[3456,256], index: 1, kind: input, shape index: {}]   ;;  %s1343_s2 = inlined_call_operand.vmem [shape: f32[1,256], index: 2, kind: input, shape index: {}]   ;;  %s1344_s3 = inlined_call_operand.vmem [shape: f32[24,256], index: 3, kind: output, shape index: {}]  }
   0x1   :  { %s1198_s14 = smov 0   ;;  %s1200_s15 = smov 0  }
   0x2   :  { %s1202_s16 = smov 0  }
   0x3 LB: > { %s25_s17 = sadd.s32 1, %s1166_s15  ;;  %p48_p1 = scmp.ne.s32.totalorder %s1158_s13, %s1154_s12  ;;  %s1170_s16 = sphi %s1202_s16, %s13_s16   ;;  %s1166_s15 = sphi %s1200_s15, %s1348_s15   ;;  %s1162_s14 = sphi %s1198_s14, %s1347_s14   ;;  %s1158_s13 = sphi %s1196_s13, %s1346_s13   ;;  %s1154_s12 = sphi %s1194_s12, %s1345_s12  }
   0x4   : > { %p26_p0 = scmp.ge.s32.totalorder %s25_s17, 9  ;;  %p49_p2 = scmp.eq.s32.totalorder %s1170_s16, 0 }
   0x5   : > { %s41_s19 = sadd.s32 1, %s1158_s13  ;;  %p932_p5 = scmp.ge.s32.totalorder %s1170_s16, 9 }
   0x6   : > { %s1350_s17 = smov (%p26_p0, %s25_s17), 0  ;;  %p50_p3 = por %p49_p2, %p48_p1 }
   0x7   : > { %s37_s18 = ssub.s32 %s1166_s15, %s1350_s17  ;;  %164 = sbr.rel (%p932_p5) target bundleno = 22 (0x16), region = 20 }
   0x8   : > { %p39_p4 = scmp.eq.s32.totalorder %s37_s18, 0 }
   0xa   : > { %s1229_s20 = scalar_select %p39_p4, %s1158_s13, %s41_s19  }
   0xe   : > { %167 = sbr.rel (!%p50_p3) target bundleno = 22 (0x16), region = 24  ;;  %s169_s21 = sand.u32 (%p50_p3), 1, %s1158_s13  }
   0xf   : > { %s1003_s22 = smul.u32 (%p50_p3), 12, %s1166_s15 }
  0x10   : > { %s1009_s23 = smul.u32 (%p50_p3), 36, %s169_s21 }
  0x11   : > { %s177_s26 = scalar_lea.vmem (%p50_p3), %s1341_s0, %s1003_s22 }
  0x12   : > { %v192_v0 = vld [vmem:[%s177_s26] sm:$0xff] (%p50_p3)  ;;  %v194_v1 = vld [vmem:[%s177_s26 + $0x6c] sm:$0xff] (%p50_p3)  ;;  %v196_v2 = vld [vmem:[%s177_s26 + $0xd8] sm:$0xff] (%p50_p3)  ;;  %s171_s27 = scalar_lea.vmem (%p50_p3), [#allocation3], %s1009_s23 }
  0x13   : > { %193 = vst [vmem:[%s171_s27] sm:$0xff] (%p50_p3), %v192_v0  ;;  %195 = vst [vmem:[%s171_s27 + $0xc] sm:$0xff] (%p50_p3), %v194_v1  ;;  %v934_v3 = vld [vmem:[%s177_s26 + $0x8] sm:$0xf] (%p50_p3)  ;;  %v936_v4 = vld [vmem:[%s177_s26 + $0x74] sm:$0xf] (%p50_p3) }
  0x14   : > { %197 = vst [vmem:[%s171_s27 + $0x18] sm:$0xff] (%p50_p3), %v196_v2  ;;  %v938_v5 = vld [vmem:[%s177_s26 + $0xe0] sm:$0xf] (%p50_p3)  ;;  %935 = vst [vmem:[%s171_s27 + $0x8] sm:$0xf] (%p50_p3), %v934_v3 }
  0x15   : > { %937 = vst [vmem:[%s171_s27 + $0x14] sm:$0xf] %v936_v4  ;;  %939 = vst [vmem:[%s171_s27 + $0x20] sm:$0xf] %v938_v5 }
  0x16 PF: > { %p940_p6 = scmp.ge.s32.totalorder %s1170_s16, 1  ;;  %p230_p7 = scmp.lt.s32.totalorder %s1170_s16, 10 }
  0x18   : > { %p231_p8 = pnand %p940_p6, %p230_p7 }
  0x19   : > { %s237_s28 = sand.u32 (!%p231_p8), 1, %s1154_s12   ;;  %s281_s29 = smul.u32 (!%p231_p8), 48, %s1162_s14 }
  0x1a   : > { %234 = sbr.rel (%p231_p8) target bundleno = 343 (0x157), region = 54  ;;  %p943_p10 = scmp.ne.s32.totalorder (!%p231_p8), %s1162_s14, 0 }
  0x1b   : > { %s1010_s30 = smul.u32 (!%p231_p8), 36, %s237_s28  ;;  %p283_p9 = scmp.lt.s32.totalorder (!%p231_p8), %s281_s29, 431 }
  0x1d   : > { %s1246_s8 = scalar_lea.vmem (!%p231_p8), [#allocation3], %s1010_s30 }
  0x21   : > { %s1352_s29 = smov (!%p283_p9, %s281_s29), 431  ;;  %314 = sbr.rel (%p943_p10) target bundleno = 40 (0x28), region = 62 }
  0x22   : > { %s1004_s4 = sshll.u32 %s1352_s29, 3  ;;  %v1172_v6 = vmov (!%p943_p10), 0.0  }
  0x23   : > { %s1244_s7 = scalar_lea.vmem %s1342_s1, %s1004_s4  ;;  %315 = vst [vmem:[#allocation2] sm:$0xff] (!%p943_p10), %v1172_v6  ;;  %316 = vst [vmem:[#allocation2 + $0x8] sm:$0xff] (!%p943_p10), %v1172_v6 }
  0x24   : > { %317 = vst [vmem:[#allocation2 + $0x10] sm:$0xff] (!%p943_p10), %v1172_v6  ;;  %318 = vst [vmem:[#allocation2 + $0x18] sm:$0xff] (!%p943_p10), %v1172_v6 }
  0x25   : > { %319 = vst [vmem:[#allocation2 + $0x20] sm:$0xff] (!%p943_p10), %v1172_v6  ;;  %320 = vst [vmem:[#allocation2 + $0x28] sm:$0xff] (!%p943_p10), %v1172_v6 }
  0x28 PF: > { %v1053_v7 = vld [vmem:[%s1244_s7 + $0x4] ss:$8 sps:$4 sm:$0xff]   ;;  %v1055_v8 = vld [vmem:[%s1244_s7] ss:$8 sps:$4 sm:$0xff]   ;;  %v1173_v9 = vmov 0   ;;  %p998_p11 = scmp.ne.s32.totalorder %s1162_s14, 8 }
  0x29   : > { %731 = vmatprep.mubr.bf16.mxu0 %v1173_v9  ;;  %648 = vmatprep.subr.bf16.mxu1 %v1053_v7  ;;  %v1056_v10 = vld [vmem:[%s1244_s7 + $0x14] ss:$8 sps:$4 sm:$0xff]   ;;  %v1058_v11 = vld [vmem:[%s1244_s7 + $0x10] ss:$8 sps:$4 sm:$0xff]   ;;  %v1059_v12 = vld [vmem:[%s1244_s7 + $0x24] ss:$8 sps:$4 sm:$0xff]  }
  0x2a   : > { %649 = vmatpush1.bf16.msra.mxu1 %v1055_v8  ;;  %v1061_v13 = vld [vmem:[%s1244_s7 + $0x20] ss:$8 sps:$4 sm:$0xff]   ;;  %v1062_v14 = vld [vmem:[%s1244_s7 + $0x34] ss:$8 sps:$4 sm:$0xff]   ;;  %v1064_v15 = vld [vmem:[%s1244_s7 + $0x30] ss:$8 sps:$4 sm:$0xff]  }
  0x2b   : > { %650 = vmatprep.subr.bf16.mxu1 %v1056_v10  ;;  %v1077_v16 = vld [vmem:[%s1244_s7 + $0x104] ss:$8 sps:$4 sm:$0xff]   ;;  %v1079_v17 = vld [vmem:[%s1244_s7 + $0x100] ss:$8 sps:$4 sm:$0xff]   ;;  %v1083_v19 = vld [vmem:[%s1244_s7 + $0x114] ss:$8 sps:$4 sm:$0xff]  }
  0x2c   : > { %v1065_v18 = vld [vmem:[%s1244_s7 + $0x44] ss:$8 sps:$4 sm:$0xff]   ;;  %699 = vmatprep.subr.bf16.mxu0 %v1077_v16  ;;  %v1085_v20 = vld [vmem:[%s1244_s7 + $0x110] ss:$8 sps:$4 sm:$0xff]   ;;  %v1067_v21 = vld [vmem:[%s1244_s7 + $0x40] ss:$8 sps:$4 sm:$0xff]  }
  0x2d   : > { %700 = vmatpush1.bf16.msra.mxu0 %v1079_v17  ;;  %v1068_v22 = vld [vmem:[%s1244_s7 + $0x54] ss:$8 sps:$4 sm:$0xff]   ;;  %v1089_v23 = vld [vmem:[%s1244_s7 + $0x124] ss:$8 sps:$4 sm:$0xff]   ;;  %v1091_v24 = vld [vmem:[%s1244_s7 + $0x120] ss:$8 sps:$4 sm:$0xff]  }
  0x2e   : > { %651 = vmatpush1.bf16.msra.mxu1 %v1058_v11  ;;  %701 = vmatprep.subr.bf16.mxu0 %v1083_v19  ;;  %v1070_v25 = vld [vmem:[%s1244_s7 + $0x50] ss:$8 sps:$4 sm:$0xff]   ;;  %v1095_v26 = vld [vmem:[%s1244_s7 + $0x134] ss:$8 sps:$4 sm:$0xff]   ;;  %v1071_v27 = vld [vmem:[%s1244_s7 + $0x64] ss:$8 sps:$4 sm:$0xff]  }
  0x2f   : > { %652 = vmatprep.subr.bf16.mxu1 %v1059_v12  ;;  %v1097_v28 = vld [vmem:[%s1244_s7 + $0x130] ss:$8 sps:$4 sm:$0xff]   ;;  %v1073_v29 = vld [vmem:[%s1244_s7 + $0x60] ss:$8 sps:$4 sm:$0xff]   ;;  %v1101_v30 = vld [vmem:[%s1244_s7 + $0x144] ss:$8 sps:$4 sm:$0xff]  }
  0x30   : > { %v1074_v31 = vld [vmem:[%s1244_s7 + $0x74] ss:$8 sps:$4 sm:$0xff]   ;;  %v1103_v32 = vld [vmem:[%s1244_s7 + $0x140] ss:$8 sps:$4 sm:$0xff]   ;;  %v1076_v33 = vld [vmem:[%s1244_s7 + $0x70] ss:$8 sps:$4 sm:$0xff]  }
  0x31   : > { %702 = vmatpush1.bf16.msra.mxu0 %v1085_v20  ;;  %v1107_v34 = vld [vmem:[%s1244_s7 + $0x154] ss:$8 sps:$4 sm:$0xff]   ;;  %v1080_v35 = vld [vmem:[%s1244_s7 + $0x84] ss:$8 sps:$4 sm:$0xff]   ;;  %v1109_v36 = vld [vmem:[%s1244_s7 + $0x150] ss:$8 sps:$4 sm:$0xff]  }
  0x32   : > { %653 = vmatpush1.bf16.msra.mxu1 %v1061_v13  ;;  %703 = vmatprep.subr.bf16.mxu0 %v1089_v23  ;;  %v1082_v37 = vld [vmem:[%s1244_s7 + $0x80] ss:$8 sps:$4 sm:$0xff]   ;;  %v1113_v38 = vld [vmem:[%s1244_s7 + $0x164] ss:$8 sps:$4 sm:$0xff]   ;;  %v1086_v39 = vld [vmem:[%s1244_s7 + $0x94] ss:$8 sps:$4 sm:$0xff]  }
  0x33   : > { %654 = vmatprep.subr.bf16.mxu1 %v1062_v14  ;;  %v1115_v40 = vld [vmem:[%s1244_s7 + $0x160] ss:$8 sps:$4 sm:$0xff]   ;;  %v1088_v42 = vld [vmem:[%s1244_s7 + $0x90] ss:$8 sps:$4 sm:$0xff]   ;;  %v1119_v43 = vld [vmem:[%s1244_s7 + $0x174] ss:$8 sps:$4 sm:$0xff]  }
  0x34   : > { %v1128_v41 = vld [vmem:[%s1246_s8 + $0x4] ss:$12 sps:$4 sm:$0xff]   ;;  %v1125_v48 = vld [vmem:[%s1246_s8 + $0x8] ss:$12 sps:$4 sm:$0xff]   ;;  %v1129_v53 = vld [vmem:[%s1246_s8 + $0x20] ss:$0 sps:$4 sm:$0xff]  }
  0x35   : > { %704 = vmatpush1.bf16.msra.mxu0 %v1091_v24  ;;  %v1092_v44 = vld [vmem:[%s1244_s7 + $0xa4] ss:$8 sps:$4 sm:$0xff]   ;;  %680 = vmatprep.mubr.bf16.mxu1 %v1128_v41  ;;  %v1121_v45 = vld [vmem:[%s1244_s7 + $0x170] ss:$8 sps:$4 sm:$0xff]   ;;  %v1094_v46 = vld [vmem:[%s1244_s7 + $0xa0] ss:$8 sps:$4 sm:$0xff]  }
  0x36   : > { %655 = vmatpush1.bf16.msra.mxu1 %v1064_v15  ;;  %705 = vmatprep.subr.bf16.mxu0 %v1095_v26  ;;  %v1098_v47 = vld [vmem:[%s1244_s7 + $0xb4] ss:$8 sps:$4 sm:$0xff]   ;;  %v1100_v49 = vld [vmem:[%s1244_s7 + $0xb0] ss:$8 sps:$4 sm:$0xff]   ;;  %v1104_v50 = vld [vmem:[%s1244_s7 + $0xc4] ss:$8 sps:$4 sm:$0xff]  }
  0x37   : > { %656 = vmatprep.subr.bf16.mxu1 %v1065_v18  ;;  %v1106_v51 = vld [vmem:[%s1244_s7 + $0xc0] ss:$8 sps:$4 sm:$0xff]   ;;  %v1110_v52 = vld [vmem:[%s1244_s7 + $0xd4] ss:$8 sps:$4 sm:$0xff]   ;;  %v1112_v54 = vld [vmem:[%s1244_s7 + $0xd0] ss:$8 sps:$4 sm:$0xff]  }
  0x38   : > { %v1116_v55 = vld [vmem:[%s1244_s7 + $0xe4] ss:$8 sps:$4 sm:$0xff]   ;;  %v1118_v56 = vld [vmem:[%s1244_s7 + $0xe0] ss:$8 sps:$4 sm:$0xff]   ;;  %v1122_v57 = vld [vmem:[%s1244_s7 + $0xf4] ss:$8 sps:$4 sm:$0xff]  }
  0x39   : > { %706 = vmatpush1.bf16.msra.mxu0 %v1097_v28  ;;  %v1124_v58 = vld [vmem:[%s1244_s7 + $0xf0] ss:$8 sps:$4 sm:$0xff]   ;;  %v321_v7 = vld [vmem:[#allocation2] sm:$0xff]  ;;  %v322_v10 = vld [vmem:[#allocation2 + $0x8] sm:$0xff] }
  0x3a   : > { %657 = vmatpush1.bf16.msra.mxu1 %v1067_v21  ;;  %707 = vmatprep.subr.bf16.mxu0 %v1101_v30  ;;  %v331_v59 = vld [vmem:[%s1246_s8 + $0x18] sm:$0xff]  ;;  %v1126_v60 = vld [vmem:[%s1246_s8] ss:$12 sps:$4 sm:$0xff]  }
  0x3b   : > { %658 = vmatprep.subr.bf16.mxu1 %v1068_v22  ;;  %v948_v61 = vcombine.high %v331_v59, %v331_v59  ;;  %v947_v62 = vcombine.low %v331_v59, %v331_v59  ;;  %v323_v13 = vld [vmem:[#allocation2 + $0x10] sm:$0xff]  ;;  %v324_v17 = vld [vmem:[#allocation2 + $0x18] sm:$0xff]  ;;  %v325_v23 = vld [vmem:[#allocation2 + $0x20] sm:$0xff] }
  0x3c   : > { %v326_v26 = vld [vmem:[#allocation2 + $0x28] sm:$0xff] }
  0x3d   : > { %708 = vmatpush1.bf16.msra.mxu0 %v1103_v32 }
  0x3e   : > { %659 = vmatpush1.bf16.msra.mxu1 %v1070_v25  ;;  %709 = vmatprep.subr.bf16.mxu0 %v1107_v34 }
  0x3f   : > { %660 = vmatprep.subr.bf16.mxu1 %v1071_v27 }
  0x41   : > { %710 = vmatpush1.bf16.msra.mxu0 %v1109_v36 }
  0x42   : > { %661 = vmatpush1.bf16.msra.mxu1 %v1073_v29  ;;  %711 = vmatprep.subr.bf16.mxu0 %v1113_v38 }
  0x43   : > { %662 = vmatprep.subr.bf16.mxu1 %v1074_v31 }
  0x45   : > { %712 = vmatpush1.bf16.msra.mxu0 %v1115_v40 }
  0x46   : > { %663 = vmatpush1.bf16.msra.mxu1 %v1076_v33  ;;  %713 = vmatprep.subr.bf16.mxu0 %v1119_v43  ;;  %v774_v33 = vlaneseq (!%p998_p11) }
  0x47   : > { %664 = vmatprep.subr.bf16.mxu1 %v1080_v35  ;;  %v772_v35 = vld [vmem:[%s1343_s2] sm:$0x3] (!%p998_p11) }
  0x48   : > { %v775_v34 = vshrl.u32 (!%p998_p11), %v774_v33, 7 }
  0x49   : > { %714 = vmatpush1.bf16.msra.mxu0 %v1121_v45 }
  0x4a   : > { %665 = vmatpush1.bf16.msra.mxu1 %v1082_v37  ;;  %v776_v37 = vsub.s32 (!%p998_p11), 0, %v775_v34  ;;  %v780_v38 = vsub.s32 (!%p998_p11), 1, %v775_v34 }
  0x4b   : > { %666 = vmatprep.subr.bf16.mxu1 %v1086_v39 }
  0x4c   : > { %732 = vmatmul.mubr.bf16.vlgmr.msra.gmra.mrb[0].mxu0 %v1125_v48  ;;  %v781_v43 = vrot.slane (!%p998_p11), %v772_v35, %v780_v38 }
  0x4d   : > { %741 = vmatprep.mubr.bf16.mxu0 %v1173_v9 }
  0x4e   : > { %667 = vmatpush1.bf16.msra.mxu1 %v1088_v42  ;;  %v777_v42 = vrot.slane (!%p998_p11), %v772_v35, %v776_v37 }
  0x4f   : > { %668 = vmatprep.subr.bf16.mxu1 %v1092_v44 }
  0x52   : > { %669 = vmatpush1.bf16.msra.mxu1 %v1094_v46 }
  0x53   : > { %670 = vmatprep.subr.bf16.mxu1 %v1098_v47 }
  0x54   : > { %742 = vmatmul.mubr.bf16.gmra.mrb[4].mxu0 %v1129_v53 }
  0x56   : > { %671 = vmatpush1.bf16.msra.mxu1 %v1100_v49 }
  0x57   : > { %672 = vmatprep.subr.bf16.mxu1 %v1104_v50 }
  0x5a   : > { %673 = vmatpush1.bf16.msra.mxu1 %v1106_v51 }
  0x5b   : > { %674 = vmatprep.subr.bf16.mxu1 %v1110_v52 }
  0x5e   : > { %675 = vmatpush1.bf16.msra.mxu1 %v1112_v54 }
  0x5f   : > { %676 = vmatprep.subr.bf16.mxu1 %v1116_v55 }
  0x62   : > { %677 = vmatpush1.bf16.msra.mxu1 %v1118_v56 }
  0x63   : > { %678 = vmatprep.subr.bf16.mxu1 %v1122_v57 }
  0x66   : > { %679 = vmatpush1.bf16.msra.mxu1 %v1124_v58 }
  0x69   : > { %681 = vmatmul.mubr.bf16.vlgmr.msra.gmra.mrb[0].mxu1 %v1126_v60 }
  0x6a   : > { %690 = vmatprep.mubr.bf16.mxu1 %v948_v61 }
  0x71   : > { %691 = vmatmul.mubr.bf16.gmra.mrb[4].mxu1 %v947_v62 }
 0x11f   : > { %v733_v63 = vpop.f32.mrb[0].mxu0 }
 0x120   : > { %v735_v0 = vpop.f32.mrb[1].mxu0 }
 0x121   : > { %v737_v1 = vpop.f32.mrb[2].mxu0 }
 0x122   : > { %v739_v2 = vpop.f32.mrb[3].mxu0 }
 0x127   : > { %v743_v3 = vpop.f32.mrb[4].mxu0 }
 0x128   : > { %v745_v4 = vpop.f32.mrb[5].mxu0 }
 0x129   : > { %v747_v5 = vpop.f32.mrb[6].mxu0 }
 0x12a   : > { %v748_v6 = vpop.f32.mrb[7].mxu0 }
 0x13c   : > { %v682_v8 = vpop.f32.mrb[0].mxu1 }
 0x13d   : > { %v734_v9 = vadd.f32 %v733_v63, %v682_v8  ;;  %v684_v11 = vpop.f32.mrb[1].mxu1 }
 0x13e   : > { %v736_v12 = vadd.f32 %v735_v0, %v684_v11  ;;  %v686_v14 = vpop.f32.mrb[2].mxu1 }
 0x13f   : > { %v750_v15 = vadd.f32 %v734_v9, %v321_v7  ;;  %v738_v16 = vadd.f32 %v737_v1, %v686_v14  ;;  %v688_v18 = vpop.f32.mrb[3].mxu1 }
 0x140   : > { %v751_v19 = vadd.f32 %v736_v12, %v322_v10  ;;  %v740_v20 = vadd.f32 %v739_v2, %v688_v18 }
 0x141   : > { %756 = vst [vmem:[#allocation2] sm:$0xff] %v750_v15  ;;  %v752_v21 = vadd.f32 %v738_v16, %v323_v13 }
 0x142   : > { %757 = vst [vmem:[#allocation2 + $0x8] sm:$0xff] %v751_v19  ;;  %v753_v22 = vadd.f32 %v740_v20, %v324_v17 }
 0x143   : > { %758 = vst [vmem:[#allocation2 + $0x10] sm:$0xff] %v752_v21 }
 0x144   : > { %759 = vst [vmem:[#allocation2 + $0x18] sm:$0xff] %v753_v22  ;;  %v692_v24 = vpop.f32.mrb[4].mxu1  ;;  %765 = sbr.rel (%p998_p11) target bundleno = 343 (0x157), region = 66 }
 0x145   : > { %v744_v25 = vadd.f32 %v743_v3, %v692_v24  ;;  %v694_v27 = vpop.f32.mrb[5].mxu1 }
 0x146   : > { %v746_v28 = vadd.f32 %v745_v4, %v694_v27  ;;  %v696_v29 = vpop.f32.mrb[6].mxu1 }
 0x147   : > { %v754_v30 = vadd.f32 %v744_v25, %v325_v23  ;;  %v697_v31 = vpop.f32.mrb[7].mxu1 }
 0x148   : > { %v755_v32 = vadd.f32 %v746_v28, %v326_v26  ;;  %v766_v36 = vld [vmem:[#allocation2] sm:$0xff] (!%p998_p11) }
 0x149   : > { %760 = vst [vmem:[#allocation2 + $0x20] sm:$0xff] %v754_v30  ;;  %v767_v39 = vld [vmem:[#allocation2 + $0x8] sm:$0xff] (!%p998_p11)  ;;  %v784_v46 = vadd.f32 (!%p998_p11), %v777_v42, %v766_v36 }
 0x14a   : > { %761 = vst [vmem:[#allocation2 + $0x28] sm:$0xff] %v755_v32  ;;  %v768_v40 = vld [vmem:[#allocation2 + $0x10] sm:$0xff] (!%p998_p11)  ;;  %v785_v47 = vadd.f32 (!%p998_p11), %v781_v43, %v767_v39 }
 0x14b   : > { %v769_v41 = vld [vmem:[#allocation2 + $0x18] sm:$0xff]  ;;  %v786_v48 = vadd.f32 %v777_v42, %v768_v40  ;;  %v790_v52 = vmax.f32 %v784_v46, 0.0 }
 0x14c   : > { %v787_v49 = vadd.f32 %v781_v43, %v769_v41  ;;  %v791_v53 = vmax.f32 %v785_v47, 0.0 }
 0x14d   : > { %v792_v54 = vmax.f32 %v786_v48, 0.0  ;;  %796 = vst [vmem:[%s1344_s3] sm:$0xff] %v790_v52 }
 0x14e   : > { %v793_v55 = vmax.f32 %v787_v49, 0.0  ;;  %797 = vst [vmem:[%s1344_s3 + $0x8] sm:$0xff] %v791_v53 }
 0x14f   : > { %798 = vst [vmem:[%s1344_s3 + $0x10] sm:$0xff] %v792_v54 }
 0x150   : > { %v770_v44 = vld [vmem:[#allocation2 + $0x20] sm:$0xff]  ;;  %799 = vst [vmem:[%s1344_s3 + $0x18] sm:$0xff] %v793_v55 }
 0x151   : > { %v771_v45 = vld [vmem:[#allocation2 + $0x28] sm:$0xff]  ;;  %v788_v50 = vadd.f32 %v777_v42, %v770_v44 }
 0x152   : > { %v789_v51 = vadd.f32 %v781_v43, %v771_v45 }
 0x153   : > { %v794_v56 = vmax.f32 %v788_v50, 0.0 }
 0x154   : > { %v795_v57 = vmax.f32 %v789_v51, 0.0 }
 0x155   : > { %800 = vst [vmem:[%s1344_s3 + $0x20] sm:$0xff] %v794_v56 }
 0x156   : > { %801 = vst [vmem:[%s1344_s3 + $0x28] sm:$0xff] %v795_v57 }
 0x157 PF: > { %s13_s16 = sadd.s32 1, %s1170_s16   ;;  %s1345_s12 = smov %s1158_s13 }
 0x158   : > { %p10_p12 = scmp.ge.s32.totalorder %s13_s16, 11   ;;  %s1346_s13 = smov %s1229_s20 }
 0x159   : > { %s1347_s14 = smov %s1166_s15  ;;  %s1348_s15 = smov %s1350_s17 }
 0x15a   :  { %12 = sbr.rel (!%p10_p12) target bundleno = 3 (0x3), region = 113 }

// kernel: _lambda_.12
= control target key start
LH: loop header
LB: loop body
LE: loop exit
PB: predicated region body
PF: predicated region fallthrough
CT: control target
= control target key end

     0   :  { %s1194_s12 = smov 0   ;;  %s1196_s13 = smov 0   ;;  %s1341_s0 = inlined_call_operand.vmem [shape: bf16[24,2304], index: 0, kind: input, shape index: {}]   ;;  %s1342_s1 = inlined_call_operand.vmem [shape: bf16[2304,256], index: 1, kind: input, shape index: {}]   ;;  %s1343_s2 = inlined_call_operand.vmem [shape: f32[1,256], index: 2, kind: input, shape index: {}]   ;;  %s1344_s3 = inlined_call_operand.vmem [shape: f32[24,256], index: 3, kind: output, shape index: {}]  }
   0x1   :  { %s1198_s14 = smov 0   ;;  %s1200_s15 = smov 0  }
   0x2   :  { %s1202_s16 = smov 0  }
   0x3 LB: > { %s25_s17 = sadd.s32 1, %s1166_s15  ;;  %p48_p1 = scmp.ne.s32.totalorder %s1158_s13, %s1154_s12  ;;  %s1170_s16 = sphi %s1202_s16, %s13_s16   ;;  %s1166_s15 = sphi %s1200_s15, %s1348_s15   ;;  %s1162_s14 = sphi %s1198_s14, %s1347_s14   ;;  %s1158_s13 = sphi %s1196_s13, %s1346_s13   ;;  %s1154_s12 = sphi %s1194_s12, %s1345_s12  }
   0x4   : > { %p26_p0 = scmp.ge.s32.totalorder %s25_s17, 6  ;;  %p49_p2 = scmp.eq.s32.totalorder %s1170_s16, 0 }
   0x5   : > { %s41_s19 = sadd.s32 1, %s1158_s13  ;;  %p932_p5 = scmp.ge.s32.totalorder %s1170_s16, 6 }
   0x6   : > { %s1350_s17 = smov (%p26_p0, %s25_s17), 0  ;;  %p50_p3 = por %p49_p2, %p48_p1 }
   0x7   : > { %s37_s18 = ssub.s32 %s1166_s15, %s1350_s17  ;;  %164 = sbr.rel (%p932_p5) target bundleno = 22 (0x16), region = 20 }
   0x8   : > { %p39_p4 = scmp.eq.s32.totalorder %s37_s18, 0 }
   0xa   : > { %s1229_s20 = scalar_select %p39_p4, %s1158_s13, %s41_s19  }
   0xe   : > { %167 = sbr.rel (!%p50_p3) target bundleno = 22 (0x16), region = 24  ;;  %s169_s21 = sand.u32 (%p50_p3), 1, %s1158_s13  }
   0xf   : > { %s1003_s22 = smul.u32 (%p50_p3), 12, %s1166_s15 }
  0x10   : > { %s1009_s23 = smul.u32 (%p50_p3), 36, %s169_s21 }
  0x11   : > { %s177_s26 = scalar_lea.vmem (%p50_p3), %s1341_s0, %s1003_s22 }
  0x12   : > { %v192_v0 = vld [vmem:[%s177_s26] sm:$0xff] (%p50_p3)  ;;  %v194_v1 = vld [vmem:[%s177_s26 + $0x48] sm:$0xff] (%p50_p3)  ;;  %v196_v2 = vld [vmem:[%s177_s26 + $0x90] sm:$0xff] (%p50_p3)  ;;  %s171_s27 = scalar_lea.vmem (%p50_p3), [#allocation3], %s1009_s23 }
  0x13   : > { %193 = vst [vmem:[%s171_s27] sm:$0xff] (%p50_p3), %v192_v0  ;;  %195 = vst [vmem:[%s171_s27 + $0xc] sm:$0xff] (%p50_p3), %v194_v1  ;;  %v934_v3 = vld [vmem:[%s177_s26 + $0x8] sm:$0xf] (%p50_p3)  ;;  %v936_v4 = vld [vmem:[%s177_s26 + $0x50] sm:$0xf] (%p50_p3) }
  0x14   : > { %197 = vst [vmem:[%s171_s27 + $0x18] sm:$0xff] (%p50_p3), %v196_v2  ;;  %v938_v5 = vld [vmem:[%s177_s26 + $0x98] sm:$0xf] (%p50_p3)  ;;  %935 = vst [vmem:[%s171_s27 + $0x8] sm:$0xf] (%p50_p3), %v934_v3 }
  0x15   : > { %937 = vst [vmem:[%s171_s27 + $0x14] sm:$0xf] %v936_v4  ;;  %939 = vst [vmem:[%s171_s27 + $0x20] sm:$0xf] %v938_v5 }
  0x16 PF: > { %p940_p6 = scmp.ge.s32.totalorder %s1170_s16, 1  ;;  %p230_p7 = scmp.lt.s32.totalorder %s1170_s16, 7 }
  0x18   : > { %p231_p8 = pnand %p940_p6, %p230_p7 }
  0x19   : > { %s237_s28 = sand.u32 (!%p231_p8), 1, %s1154_s12   ;;  %s281_s29 = smul.u32 (!%p231_p8), 48, %s1162_s14 }
  0x1a   : > { %234 = sbr.rel (%p231_p8) target bundleno = 343 (0x157), region = 54  ;;  %p943_p10 = scmp.ne.s32.totalorder (!%p231_p8), %s1162_s14, 0 }
  0x1b   : > { %s1010_s30 = smul.u32 (!%p231_p8), 36, %s237_s28  ;;  %p283_p9 = scmp.lt.s32.totalorder (!%p231_p8), %s281_s29, 287 }
  0x1d   : > { %s1246_s8 = scalar_lea.vmem (!%p231_p8), [#allocation3], %s1010_s30 }
  0x21   : > { %s1352_s29 = smov (!%p283_p9, %s281_s29), 287  ;;  %314 = sbr.rel (%p943_p10) target bundleno = 40 (0x28), region = 62 }
  0x22   : > { %s1004_s4 = sshll.u32 %s1352_s29, 3  ;;  %v1172_v6 = vmov (!%p943_p10), 0.0  }
  0x23   : > { %s1244_s7 = scalar_lea.vmem %s1342_s1, %s1004_s4  ;;  %315 = vst [vmem:[#allocation2] sm:$0xff] (!%p943_p10), %v1172_v6  ;;  %316 = vst [vmem:[#allocation2 + $0x8] sm:$0xff] (!%p943_p10), %v1172_v6 }
  0x24   : > { %317 = vst [vmem:[#allocation2 + $0x10] sm:$0xff] (!%p943_p10), %v1172_v6  ;;  %318 = vst [vmem:[#allocation2 + $0x18] sm:$0xff] (!%p943_p10), %v1172_v6 }
  0x25   : > { %319 = vst [vmem:[#allocation2 + $0x20] sm:$0xff] (!%p943_p10), %v1172_v6  ;;  %320 = vst [vmem:[#allocation2 + $0x28] sm:$0xff] (!%p943_p10), %v1172_v6 }
  0x28 PF: > { %v1053_v7 = vld [vmem:[%s1244_s7 + $0x4] ss:$8 sps:$4 sm:$0xff]   ;;  %v1055_v8 = vld [vmem:[%s1244_s7] ss:$8 sps:$4 sm:$0xff]   ;;  %v1173_v9 = vmov 0   ;;  %p998_p11 = scmp.ne.s32.totalorder %s1162_s14, 5 }
  0x29   : > { %731 = vmatprep.mubr.bf16.mxu0 %v1173_v9  ;;  %648 = vmatprep.subr.bf16.mxu1 %v1053_v7  ;;  %v1056_v10 = vld [vmem:[%s1244_s7 + $0x14] ss:$8 sps:$4 sm:$0xff]   ;;  %v1058_v11 = vld [vmem:[%s1244_s7 + $0x10] ss:$8 sps:$4 sm:$0xff]   ;;  %v1059_v12 = vld [vmem:[%s1244_s7 + $0x24] ss:$8 sps:$4 sm:$0xff]  }
  0x2a   : > { %649 = vmatpush1.bf16.msra.mxu1 %v1055_v8  ;;  %v1061_v13 = vld [vmem:[%s1244_s7 + $0x20] ss:$8 sps:$4 sm:$0xff]   ;;  %v1062_v14 = vld [vmem:[%s1244_s7 + $0x34] ss:$8 sps:$4 sm:$0xff]   ;;  %v1064_v15 = vld [vmem:[%s1244_s7 + $0x30] ss:$8 sps:$4 sm:$0xff]  }
  0x2b   : > { %650 = vmatprep.subr.bf16.mxu1 %v1056_v10  ;;  %v1077_v16 = vld [vmem:[%s1244_s7 + $0x104] ss:$8 sps:$4 sm:$0xff]   ;;  %v1079_v17 = vld [vmem:[%s1244_s7 + $0x100] ss:$8 sps:$4 sm:$0xff]   ;;  %v1083_v19 = vld [vmem:[%s1244_s7 + $0x114] ss:$8 sps:$4 sm:$0xff]  }
  0x2c   : > { %v1065_v18 = vld [vmem:[%s1244_s7 + $0x44] ss:$8 sps:$4 sm:$0xff]   ;;  %699 = vmatprep.subr.bf16.mxu0 %v1077_v16  ;;  %v1085_v20 = vld [vmem:[%s1244_s7 + $0x110] ss:$8 sps:$4 sm:$0xff]   ;;  %v1067_v21 = vld [vmem:[%s1244_s7 + $0x40] ss:$8 sps:$4 sm:$0xff]  }
  0x2d   : > { %700 = vmatpush1.bf16.msra.mxu0 %v1079_v17  ;;  %v1068_v22 = vld [vmem:[%s1244_s7 + $0x54] ss:$8 sps:$4 sm:$0xff]   ;;  %v1089_v23 = vld [vmem:[%s1244_s7 + $0x124] ss:$8 sps:$4 sm:$0xff]   ;;  %v1091_v24 = vld [vmem:[%s1244_s7 + $0x120] ss:$8 sps:$4 sm:$0xff]  }
  0x2e   : > { %651 = vmatpush1.bf16.msra.mxu1 %v1058_v11  ;;  %701 = vmatprep.subr.bf16.mxu0 %v1083_v19  ;;  %v1070_v25 = vld [vmem:[%s1244_s7 + $0x50] ss:$8 sps:$4 sm:$0xff]   ;;  %v1095_v26 = vld [vmem:[%s1244_s7 + $0x134] ss:$8 sps:$4 sm:$0xff]   ;;  %v1071_v27 = vld [vmem:[%s1244_s7 + $0x64] ss:$8 sps:$4 sm:$0xff]  }
  0x2f   : > { %652 = vmatprep.subr.bf16.mxu1 %v1059_v12  ;;  %v1097_v28 = vld [vmem:[%s1244_s7 + $0x130] ss:$8 sps:$4 sm:$0xff]   ;;  %v1073_v29 = vld [vmem:[%s1244_s7 + $0x60] ss:$8 sps:$4 sm:$0xff]   ;;  %v1101_v30 = vld [vmem:[%s1244_s7 + $0x144] ss:$8 sps:$4 sm:$0xff]  }
  0x30   : > { %v1074_v31 = vld [vmem:[%s1244_s7 + $0x74] ss:$8 sps:$4 sm:$0xff]   ;;  %v1103_v32 = vld [vmem:[%s1244_s7 + $0x140] ss:$8 sps:$4 sm:$0xff]   ;;  %v1076_v33 = vld [vmem:[%s1244_s7 + $0x70] ss:$8 sps:$4 sm:$0xff]  }
  0x31   : > { %702 = vmatpush1.bf16.msra.mxu0 %v1085_v20  ;;  %v1107_v34 = vld [vmem:[%s1244_s7 + $0x154] ss:$8 sps:$4 sm:$0xff]   ;;  %v1080_v35 = vld [vmem:[%s1244_s7 + $0x84] ss:$8 sps:$4 sm:$0xff]   ;;  %v1109_v36 = vld [vmem:[%s1244_s7 + $0x150] ss:$8 sps:$4 sm:$0xff]  }
  0x32   : > { %653 = vmatpush1.bf16.msra.mxu1 %v1061_v13  ;;  %703 = vmatprep.subr.bf16.mxu0 %v1089_v23  ;;  %v1082_v37 = vld [vmem:[%s1244_s7 + $0x80] ss:$8 sps:$4 sm:$0xff]   ;;  %v1113_v38 = vld [vmem:[%s1244_s7 + $0x164] ss:$8 sps:$4 sm:$0xff]   ;;  %v1086_v39 = vld [vmem:[%s1244_s7 + $0x94] ss:$8 sps:$4 sm:$0xff]  }
  0x33   : > { %654 = vmatprep.subr.bf16.mxu1 %v1062_v14  ;;  %v1115_v40 = vld [vmem:[%s1244_s7 + $0x160] ss:$8 sps:$4 sm:$0xff]   ;;  %v1088_v42 = vld [vmem:[%s1244_s7 + $0x90] ss:$8 sps:$4 sm:$0xff]   ;;  %v1119_v43 = vld [vmem:[%s1244_s7 + $0x174] ss:$8 sps:$4 sm:$0xff]  }
  0x34   : > { %v1128_v41 = vld [vmem:[%s1246_s8 + $0x4] ss:$12 sps:$4 sm:$0xff]   ;;  %v1125_v48 = vld [vmem:[%s1246_s8 + $0x8] ss:$12 sps:$4 sm:$0xff]   ;;  %v1129_v53 = vld [vmem:[%s1246_s8 + $0x20] ss:$0 sps:$4 sm:$0xff]  }
  0x35   : > { %704 = vmatpush1.bf16.msra.mxu0 %v1091_v24  ;;  %v1092_v44 = vld [vmem:[%s1244_s7 + $0xa4] ss:$8 sps:$4 sm:$0xff]   ;;  %680 = vmatprep.mubr.bf16.mxu1 %v1128_v41  ;;  %v1121_v45 = vld [vmem:[%s1244_s7 + $0x170] ss:$8 sps:$4 sm:$0xff]   ;;  %v1094_v46 = vld [vmem:[%s1244_s7 + $0xa0] ss:$8 sps:$4 sm:$0xff]  }
  0x36   : > { %655 = vmatpush1.bf16.msra.mxu1 %v1064_v15  ;;  %705 = vmatprep.subr.bf16.mxu0 %v1095_v26  ;;  %v1098_v47 = vld [vmem:[%s1244_s7 + $0xb4] ss:$8 sps:$4 sm:$0xff]   ;;  %v1100_v49 = vld [vmem:[%s1244_s7 + $0xb0] ss:$8 sps:$4 sm:$0xff]   ;;  %v1104_v50 = vld [vmem:[%s1244_s7 + $0xc4] ss:$8 sps:$4 sm:$0xff]  }
  0x37   : > { %656 = vmatprep.subr.bf16.mxu1 %v1065_v18  ;;  %v1106_v51 = vld [vmem:[%s1244_s7 + $0xc0] ss:$8 sps:$4 sm:$0xff]   ;;  %v1110_v52 = vld [vmem:[%s1244_s7 + $0xd4] ss:$8 sps:$4 sm:$0xff]   ;;  %v1112_v54 = vld [vmem:[%s1244_s7 + $0xd0] ss:$8 sps:$4 sm:$0xff]  }
  0x38   : > { %v1116_v55 = vld [vmem:[%s1244_s7 + $0xe4] ss:$8 sps:$4 sm:$0xff]   ;;  %v1118_v56 = vld [vmem:[%s1244_s7 + $0xe0] ss:$8 sps:$4 sm:$0xff]   ;;  %v1122_v57 = vld [vmem:[%s1244_s7 + $0xf4] ss:$8 sps:$4 sm:$0xff]  }
  0x39   : > { %706 = vmatpush1.bf16.msra.mxu0 %v1097_v28  ;;  %v1124_v58 = vld [vmem:[%s1244_s7 + $0xf0] ss:$8 sps:$4 sm:$0xff]   ;;  %v321_v7 = vld [vmem:[#allocation2] sm:$0xff]  ;;  %v322_v10 = vld [vmem:[#allocation2 + $0x8] sm:$0xff] }
  0x3a   : > { %657 = vmatpush1.bf16.msra.mxu1 %v1067_v21  ;;  %707 = vmatprep.subr.bf16.mxu0 %v1101_v30  ;;  %v331_v59 = vld [vmem:[%s1246_s8 + $0x18] sm:$0xff]  ;;  %v1126_v60 = vld [vmem:[%s1246_s8] ss:$12 sps:$4 sm:$0xff]  }
  0x3b   : > { %658 = vmatprep.subr.bf16.mxu1 %v1068_v22  ;;  %v948_v61 = vcombine.high %v331_v59, %v331_v59  ;;  %v947_v62 = vcombine.low %v331_v59, %v331_v59  ;;  %v323_v13 = vld [vmem:[#allocation2 + $0x10] sm:$0xff]  ;;  %v324_v17 = vld [vmem:[#allocation2 + $0x18] sm:$0xff]  ;;  %v325_v23 = vld [vmem:[#allocation2 + $0x20] sm:$0xff] }
  0x3c   : > { %v326_v26 = vld [vmem:[#allocation2 + $0x28] sm:$0xff] }
  0x3d   : > { %708 = vmatpush1.bf16.msra.mxu0 %v1103_v32 }
  0x3e   : > { %659 = vmatpush1.bf16.msra.mxu1 %v1070_v25  ;;  %709 = vmatprep.subr.bf16.mxu0 %v1107_v34 }
  0x3f   : > { %660 = vmatprep.subr.bf16.mxu1 %v1071_v27 }
  0x41   : > { %710 = vmatpush1.bf16.msra.mxu0 %v1109_v36 }
  0x42   : > { %661 = vmatpush1.bf16.msra.mxu1 %v1073_v29  ;;  %711 = vmatprep.subr.bf16.mxu0 %v1113_v38 }
  0x43   : > { %662 = vmatprep.subr.bf16.mxu1 %v1074_v31 }
  0x45   : > { %712 = vmatpush1.bf16.msra.mxu0 %v1115_v40 }
  0x46   : > { %663 = vmatpush1.bf16.msra.mxu1 %v1076_v33  ;;  %713 = vmatprep.subr.bf16.mxu0 %v1119_v43  ;;  %v774_v33 = vlaneseq (!%p998_p11) }
  0x47   : > { %664 = vmatprep.subr.bf16.mxu1 %v1080_v35  ;;  %v772_v35 = vld [vmem:[%s1343_s2] sm:$0x3] (!%p998_p11) }
  0x48   : > { %v775_v34 = vshrl.u32 (!%p998_p11), %v774_v33, 7 }
  0x49   : > { %714 = vmatpush1.bf16.msra.mxu0 %v1121_v45 }
  0x4a   : > { %665 = vmatpush1.bf16.msra.mxu1 %v1082_v37  ;;  %v776_v37 = vsub.s32 (!%p998_p11), 0, %v775_v34  ;;  %v780_v38 = vsub.s32 (!%p998_p11), 1, %v775_v34 }
  0x4b   : > { %666 = vmatprep.subr.bf16.mxu1 %v1086_v39 }
  0x4c   : > { %732 = vmatmul.mubr.bf16.vlgmr.msra.gmra.mrb[0].mxu0 %v1125_v48  ;;  %v781_v43 = vrot.slane (!%p998_p11), %v772_v35, %v780_v38 }
  0x4d   : > { %741 = vmatprep.mubr.bf16.mxu0 %v1173_v9 }
  0x4e   : > { %667 = vmatpush1.bf16.msra.mxu1 %v1088_v42  ;;  %v777_v42 = vrot.slane (!%p998_p11), %v772_v35, %v776_v37 }
  0x4f   : > { %668 = vmatprep.subr.bf16.mxu1 %v1092_v44 }
  0x52   : > { %669 = vmatpush1.bf16.msra.mxu1 %v1094_v46 }
  0x53   : > { %670 = vmatprep.subr.bf16.mxu1 %v1098_v47 }
  0x54   : > { %742 = vmatmul.mubr.bf16.gmra.mrb[4].mxu0 %v1129_v53 }
  0x56   : > { %671 = vmatpush1.bf16.msra.mxu1 %v1100_v49 }
  0x57   : > { %672 = vmatprep.subr.bf16.mxu1 %v1104_v50 }
  0x5a   : > { %673 = vmatpush1.bf16.msra.mxu1 %v1106_v51 }
  0x5b   : > { %674 = vmatprep.subr.bf16.mxu1 %v1110_v52 }
  0x5e   : > { %675 = vmatpush1.bf16.msra.mxu1 %v1112_v54 }
  0x5f   : > { %676 = vmatprep.subr.bf16.mxu1 %v1116_v55 }
  0x62   : > { %677 = vmatpush1.bf16.msra.mxu1 %v1118_v56 }
  0x63   : > { %678 = vmatprep.subr.bf16.mxu1 %v1122_v57 }
  0x66   : > { %679 = vmatpush1.bf16.msra.mxu1 %v1124_v58 }
  0x69   : > { %681 = vmatmul.mubr.bf16.vlgmr.msra.gmra.mrb[0].mxu1 %v1126_v60 }
  0x6a   : > { %690 = vmatprep.mubr.bf16.mxu1 %v948_v61 }
  0x71   : > { %691 = vmatmul.mubr.bf16.gmra.mrb[4].mxu1 %v947_v62 }
 0x11f   : > { %v733_v63 = vpop.f32.mrb[0].mxu0 }
 0x120   : > { %v735_v0 = vpop.f32.mrb[1].mxu0 }
 0x121   : > { %v737_v1 = vpop.f32.mrb[2].mxu0 }
 0x122   : > { %v739_v2 = vpop.f32.mrb[3].mxu0 }
 0x127   : > { %v743_v3 = vpop.f32.mrb[4].mxu0 }
 0x128   : > { %v745_v4 = vpop.f32.mrb[5].mxu0 }
 0x129   : > { %v747_v5 = vpop.f32.mrb[6].mxu0 }
 0x12a   : > { %v748_v6 = vpop.f32.mrb[7].mxu0 }
 0x13c   : > { %v682_v8 = vpop.f32.mrb[0].mxu1 }
 0x13d   : > { %v734_v9 = vadd.f32 %v733_v63, %v682_v8  ;;  %v684_v11 = vpop.f32.mrb[1].mxu1 }
 0x13e   : > { %v736_v12 = vadd.f32 %v735_v0, %v684_v11  ;;  %v686_v14 = vpop.f32.mrb[2].mxu1 }
 0x13f   : > { %v750_v15 = vadd.f32 %v734_v9, %v321_v7  ;;  %v738_v16 = vadd.f32 %v737_v1, %v686_v14  ;;  %v688_v18 = vpop.f32.mrb[3].mxu1 }
 0x140   : > { %v751_v19 = vadd.f32 %v736_v12, %v322_v10  ;;  %v740_v20 = vadd.f32 %v739_v2, %v688_v18 }
 0x141   : > { %756 = vst [vmem:[#allocation2] sm:$0xff] %v750_v15  ;;  %v752_v21 = vadd.f32 %v738_v16, %v323_v13 }
 0x142   : > { %757 = vst [vmem:[#allocation2 + $0x8] sm:$0xff] %v751_v19  ;;  %v753_v22 = vadd.f32 %v740_v20, %v324_v17 }
 0x143   : > { %758 = vst [vmem:[#allocation2 + $0x10] sm:$0xff] %v752_v21 }
 0x144   : > { %759 = vst [vmem:[#allocation2 + $0x18] sm:$0xff] %v753_v22  ;;  %v692_v24 = vpop.f32.mrb[4].mxu1  ;;  %765 = sbr.rel (%p998_p11) target bundleno = 343 (0x157), region = 66 }
 0x145   : > { %v744_v25 = vadd.f32 %v743_v3, %v692_v24  ;;  %v694_v27 = vpop.f32.mrb[5].mxu1 }
 0x146   : > { %v746_v28 = vadd.f32 %v745_v4, %v694_v27  ;;  %v696_v29 = vpop.f32.mrb[6].mxu1 }
 0x147   : > { %v754_v30 = vadd.f32 %v744_v25, %v325_v23  ;;  %v697_v31 = vpop.f32.mrb[7].mxu1 }
 0x148   : > { %v755_v32 = vadd.f32 %v746_v28, %v326_v26  ;;  %v766_v36 = vld [vmem:[#allocation2] sm:$0xff] (!%p998_p11) }
 0x149   : > { %760 = vst [vmem:[#allocation2 + $0x20] sm:$0xff] %v754_v30  ;;  %v767_v39 = vld [vmem:[#allocation2 + $0x8] sm:$0xff] (!%p998_p11)  ;;  %v784_v46 = vadd.f32 (!%p998_p11), %v777_v42, %v766_v36 }
 0x14a   : > { %761 = vst [vmem:[#allocation2 + $0x28] sm:$0xff] %v755_v32  ;;  %v768_v40 = vld [vmem:[#allocation2 + $0x10] sm:$0xff] (!%p998_p11)  ;;  %v785_v47 = vadd.f32 (!%p998_p11), %v781_v43, %v767_v39 }
 0x14b   : > { %v769_v41 = vld [vmem:[#allocation2 + $0x18] sm:$0xff]  ;;  %v786_v48 = vadd.f32 %v777_v42, %v768_v40  ;;  %v790_v52 = vmax.f32 %v784_v46, 0.0 }
 0x14c   : > { %v787_v49 = vadd.f32 %v781_v43, %v769_v41  ;;  %v791_v53 = vmax.f32 %v785_v47, 0.0 }
 0x14d   : > { %v792_v54 = vmax.f32 %v786_v48, 0.0  ;;  %796 = vst [vmem:[%s1344_s3] sm:$0xff] %v790_v52 }
 0x14e   : > { %v793_v55 = vmax.f32 %v787_v49, 0.0  ;;  %797 = vst [vmem:[%s1344_s3 + $0x8] sm:$0xff] %v791_v53 }
 0x14f   : > { %798 = vst [vmem:[%s1344_s3 + $0x10] sm:$0xff] %v792_v54 }
 0x150   : > { %v770_v44 = vld [vmem:[#allocation2 + $0x20] sm:$0xff]  ;;  %799 = vst [vmem:[%s1344_s3 + $0x18] sm:$0xff] %v793_v55 }
 0x151   : > { %v771_v45 = vld [vmem:[#allocation2 + $0x28] sm:$0xff]  ;;  %v788_v50 = vadd.f32 %v777_v42, %v770_v44 }
 0x152   : > { %v789_v51 = vadd.f32 %v781_v43, %v771_v45 }
 0x153   : > { %v794_v56 = vmax.f32 %v788_v50, 0.0 }
 0x154   : > { %v795_v57 = vmax.f32 %v789_v51, 0.0 }
 0x155   : > { %800 = vst [vmem:[%s1344_s3 + $0x20] sm:$0xff] %v794_v56 }
 0x156   : > { %801 = vst [vmem:[%s1344_s3 + $0x28] sm:$0xff] %v795_v57 }
 0x157 PF: > { %s13_s16 = sadd.s32 1, %s1170_s16   ;;  %s1345_s12 = smov %s1158_s13 }
 0x158   : > { %p10_p12 = scmp.ge.s32.totalorder %s13_s16, 8   ;;  %s1346_s13 = smov %s1229_s20 }
 0x159   : > { %s1347_s14 = smov %s1166_s15  ;;  %s1348_s15 = smov %s1350_s17 }
 0x15a   :  { %12 = sbr.rel (!%p10_p12) target bundleno = 3 (0x3), region = 113 }

// kernel: _lambda_.13
= control target key start
LH: loop header
LB: loop body
LE: loop exit
PB: predicated region body
PF: predicated region fallthrough
CT: control target
= control target key end

     0   :  { %s1347_s12 = smov 0   ;;  %s1349_s13 = smov 0   ;;  %s1622_s0 = inlined_call_operand.vmem [shape: bf16[8,256], index: 0, kind: input, shape index: {}]   ;;  %s1623_s1 = inlined_call_operand.vmem [shape: bf16[256,4096], index: 1, kind: input, shape index: {}]   ;;  %s1624_s2 = inlined_call_operand.vmem [shape: f32[1,4096], index: 2, kind: input, shape index: {}]   ;;  %s1625_s3 = inlined_call_operand.vmem [shape: f32[8,4096], index: 3, kind: output, shape index: {}]  }
   0x1   :  { %s1351_s14 = smov 0   ;;  %s1353_s15 = smov 0  }
   0x2   :  { %s1355_s16 = smov 0  }
   0x3 LB: > { %s28_s17 = sadd.s32 1, %s1321_s15  ;;  %p76_p1 = scmp.ne.s32.totalorder %s1313_s13, %s1309_s12  ;;  %s1325_s16 = sphi %s1355_s16, %s13_s16   ;;  %s1321_s15 = sphi %s1353_s15, %s1629_s15   ;;  %s1317_s14 = sphi %s1351_s14, %s1628_s14   ;;  %s1313_s13 = sphi %s1349_s13, %s1627_s13   ;;  %s1309_s12 = sphi %s1347_s12, %s1626_s12  }
   0x4   : > { %p30_p0 = scmp.ge.s32.totalorder %s28_s17, 8  ;;  %p77_p2 = scmp.eq.s32.totalorder %s1325_s16, 0 }
   0x5   : > { %s69_s19 = sadd.s32 1, %s1313_s13  ;;  %p1071_p5 = scmp.ge.s32.totalorder %s1325_s16, 8 }
   0x6   : > { %s1631_s17 = smov (%p30_p0, %s28_s17), 0  ;;  %p78_p3 = por %p77_p2, %p76_p1 }
   0x7   : > { %s65_s18 = ssub.s32 %s1321_s15, %s1631_s17  ;;  %169 = sbr.rel (%p1071_p5) target bundleno = 50 (0x32), region = 20 }
   0x8   : > { %p67_p4 = scmp.eq.s32.totalorder %s65_s18, 0 }
   0xa   : > { %s1382_s20 = scalar_select %p67_p4, %s1313_s13, %s69_s19  }
   0xe   : > { %172 = sbr.rel (!%p78_p3) target bundleno = 50 (0x32), region = 24  ;;  %s174_s21 = sand.u32 (%p78_p3), 1, %s1313_s13  }
   0xf   : > { %s1148_s22 = sshll.u32 (%p78_p3), %s1321_s15, 4  ;;  %s1072_s23 = sshll.u32 (%p78_p3), %s174_s21, 9 }
  0x10   : > { %s1390_s26 = scalar_lea.vmem (%p78_p3), %s1623_s1, %s1148_s22  ;;  %s1395_s27 = scalar_lea.vmem (%p78_p3), [#allocation3], %s1072_s23 }
  0x11   : > { %v195_v0 = vld [vmem:[%s1390_s26] sm:$0xff] (%p78_p3)  ;;  %v197_v1 = vld [vmem:[%s1390_s26 + $0x8] sm:$0xff] (%p78_p3) }
  0x12   : > { %v199_v2 = vld [vmem:[%s1390_s26 + $0x80] sm:$0xff] (%p78_p3)  ;;  %196 = vst [vmem:[%s1395_s27] sm:$0xff] (%p78_p3), %v195_v0  ;;  %198 = vst [vmem:[%s1395_s27 + $0x8] sm:$0xff] (%p78_p3), %v197_v1  ;;  %v201_v3 = vld [vmem:[%s1390_s26 + $0x88] sm:$0xff] (%p78_p3) }
  0x13   : > { %200 = vst [vmem:[%s1395_s27 + $0x10] sm:$0xff] (%p78_p3), %v199_v2  ;;  %v203_v4 = vld [vmem:[%s1390_s26 + $0x100] sm:$0xff] (%p78_p3)  ;;  %v205_v5 = vld [vmem:[%s1390_s26 + $0x108] sm:$0xff] (%p78_p3)  ;;  %202 = vst [vmem:[%s1395_s27 + $0x18] sm:$0xff] (%p78_p3), %v201_v3 }
  0x14   : > { %204 = vst [vmem:[%s1395_s27 + $0x20] sm:$0xff] (%p78_p3), %v203_v4  ;;  %206 = vst [vmem:[%s1395_s27 + $0x28] sm:$0xff] (%p78_p3), %v205_v5  ;;  %v207_v6 = vld [vmem:[%s1390_s26 + $0x180] sm:$0xff] (%p78_p3)  ;;  %v209_v7 = vld [vmem:[%s1390_s26 + $0x188] sm:$0xff] (%p78_p3) }
  0x15   : > { %v211_v8 = vld [vmem:[%s1390_s26 + $0x200] sm:$0xff]  ;;  %208 = vst [vmem:[%s1395_s27 + $0x30] sm:$0xff] %v207_v6  ;;  %210 = vst [vmem:[%s1395_s27 + $0x38] sm:$0xff] %v209_v7  ;;  %v213_v9 = vld [vmem:[%s1390_s26 + $0x208] sm:$0xff] }
  0x16   : > { %212 = vst [vmem:[%s1395_s27 + $0x40] sm:$0xff] %v211_v8  ;;  %v215_v10 = vld [vmem:[%s1390_s26 + $0x280] sm:$0xff]  ;;  %v217_v11 = vld [vmem:[%s1390_s26 + $0x288] sm:$0xff]  ;;  %214 = vst [vmem:[%s1395_s27 + $0x48] sm:$0xff] %v213_v9 }
  0x17   : > { %216 = vst [vmem:[%s1395_s27 + $0x50] sm:$0xff] %v215_v10  ;;  %218 = vst [vmem:[%s1395_s27 + $0x58] sm:$0xff] %v217_v11  ;;  %v219_v12 = vld [vmem:[%s1390_s26 + $0x300] sm:$0xff]  ;;  %v221_v13 = vld [vmem:[%s1390_s26 + $0x308] sm:$0xff] }
  0x18   : > { %v223_v14 = vld [vmem:[%s1390_s26 + $0x380] sm:$0xff]  ;;  %220 = vst [vmem:[%s1395_s27 + $0x60] sm:$0xff] %v219_v12  ;;  %222 = vst [vmem:[%s1395_s27 + $0x68] sm:$0xff] %v221_v13  ;;  %v225_v15 = vld [vmem:[%s1390_s26 + $0x388] sm:$0xff] }
  0x19   : > { %224 = vst [vmem:[%s1395_s27 + $0x70] sm:$0xff] %v223_v14  ;;  %v227_v16 = vld [vmem:[%s1390_s26 + $0x400] sm:$0xff]  ;;  %v229_v17 = vld [vmem:[%s1390_s26 + $0x408] sm:$0xff]  ;;  %226 = vst [vmem:[%s1395_s27 + $0x78] sm:$0xff] %v225_v15 }
  0x1a   : > { %228 = vst [vmem:[%s1395_s27 + $0x80] sm:$0xff] %v227_v16  ;;  %230 = vst [vmem:[%s1395_s27 + $0x88] sm:$0xff] %v229_v17  ;;  %v231_v18 = vld [vmem:[%s1390_s26 + $0x480] sm:$0xff]  ;;  %v233_v19 = vld [vmem:[%s1390_s26 + $0x488] sm:$0xff] }
  0x1b   : > { %v235_v20 = vld [vmem:[%s1390_s26 + $0x500] sm:$0xff]  ;;  %232 = vst [vmem:[%s1395_s27 + $0x90] sm:$0xff] %v231_v18  ;;  %234 = vst [vmem:[%s1395_s27 + $0x98] sm:$0xff] %v233_v19  ;;  %v237_v21 = vld [vmem:[%s1390_s26 + $0x508] sm:$0xff] }
  0x1c   : > { %236 = vst [vmem:[%s1395_s27 + $0xa0] sm:$0xff] %v235_v20  ;;  %v239_v22 = vld [vmem:[%s1390_s26 + $0x580] sm:$0xff]  ;;  %v241_v23 = vld [vmem:[%s1390_s26 + $0x588] sm:$0xff]  ;;  %238 = vst [vmem:[%s1395_s27 + $0xa8] sm:$0xff] %v237_v21 }
  0x1d   : > { %240 = vst [vmem:[%s1395_s27 + $0xb0] sm:$0xff] %v239_v22  ;;  %242 = vst [vmem:[%s1395_s27 + $0xb8] sm:$0xff] %v241_v23  ;;  %v243_v24 = vld [vmem:[%s1390_s26 + $0x600] sm:$0xff]  ;;  %v245_v25 = vld [vmem:[%s1390_s26 + $0x608] sm:$0xff] }
  0x1e   : > { %v247_v26 = vld [vmem:[%s1390_s26 + $0x680] sm:$0xff]  ;;  %244 = vst [vmem:[%s1395_s27 + $0xc0] sm:$0xff] %v243_v24  ;;  %246 = vst [vmem:[%s1395_s27 + $0xc8] sm:$0xff] %v245_v25  ;;  %v249_v27 = vld [vmem:[%s1390_s26 + $0x688] sm:$0xff] }
  0x1f   : > { %248 = vst [vmem:[%s1395_s27 + $0xd0] sm:$0xff] %v247_v26  ;;  %v251_v28 = vld [vmem:[%s1390_s26 + $0x700] sm:$0xff]  ;;  %v253_v29 = vld [vmem:[%s1390_s26 + $0x708] sm:$0xff]  ;;  %250 = vst [vmem:[%s1395_s27 + $0xd8] sm:$0xff] %v249_v27 }
  0x20   : > { %252 = vst [vmem:[%s1395_s27 + $0xe0] sm:$0xff] %v251_v28  ;;  %254 = vst [vmem:[%s1395_s27 + $0xe8] sm:$0xff] %v253_v29  ;;  %v255_v30 = vld [vmem:[%s1390_s26 + $0x780] sm:$0xff]  ;;  %v257_v31 = vld [vmem:[%s1390_s26 + $0x788] sm:$0xff] }
  0x21   : > { %v259_v32 = vld [vmem:[%s1390_s26 + $0x800] sm:$0xff]  ;;  %256 = vst [vmem:[%s1395_s27 + $0xf0] sm:$0xff] %v255_v30  ;;  %258 = vst [vmem:[%s1395_s27 + $0xf8] sm:$0xff] %v257_v31  ;;  %v261_v33 = vld [vmem:[%s1390_s26 + $0x808] sm:$0xff] }
  0x22   : > { %260 = vst [vmem:[%s1395_s27 + $0x100] sm:$0xff] %v259_v32  ;;  %v263_v34 = vld [vmem:[%s1390_s26 + $0x880] sm:$0xff]  ;;  %v265_v35 = vld [vmem:[%s1390_s26 + $0x888] sm:$0xff]  ;;  %262 = vst [vmem:[%s1395_s27 + $0x108] sm:$0xff] %v261_v33 }
  0x23   : > { %264 = vst [vmem:[%s1395_s27 + $0x110] sm:$0xff] %v263_v34  ;;  %266 = vst [vmem:[%s1395_s27 + $0x118] sm:$0xff] %v265_v35  ;;  %v267_v36 = vld [vmem:[%s1390_s26 + $0x900] sm:$0xff]  ;;  %v269_v37 = vld [vmem:[%s1390_s26 + $0x908] sm:$0xff] }
  0x24   : > { %v271_v38 = vld [vmem:[%s1390_s26 + $0x980] sm:$0xff]  ;;  %268 = vst [vmem:[%s1395_s27 + $0x120] sm:$0xff] %v267_v36  ;;  %270 = vst [vmem:[%s1395_s27 + $0x128] sm:$0xff] %v269_v37  ;;  %v273_v39 = vld [vmem:[%s1390_s26 + $0x988] sm:$0xff] }
  0x25   : > { %272 = vst [vmem:[%s1395_s27 + $0x130] sm:$0xff] %v271_v38  ;;  %v275_v40 = vld [vmem:[%s1390_s26 + $0xa00] sm:$0xff]  ;;  %v277_v41 = vld [vmem:[%s1390_s26 + $0xa08] sm:$0xff]  ;;  %274 = vst [vmem:[%s1395_s27 + $0x138] sm:$0xff] %v273_v39 }
  0x26   : > { %276 = vst [vmem:[%s1395_s27 + $0x140] sm:$0xff] %v275_v40  ;;  %278 = vst [vmem:[%s1395_s27 + $0x148] sm:$0xff] %v277_v41  ;;  %v279_v42 = vld [vmem:[%s1390_s26 + $0xa80] sm:$0xff]  ;;  %v281_v43 = vld [vmem:[%s1390_s26 + $0xa88] sm:$0xff] }
  0x27   : > { %v283_v44 = vld [vmem:[%s1390_s26 + $0xb00] sm:$0xff]  ;;  %280 = vst [vmem:[%s1395_s27 + $0x150] sm:$0xff] %v279_v42  ;;  %282 = vst [vmem:[%s1395_s27 + $0x158] sm:$0xff] %v281_v43  ;;  %v285_v45 = vld [vmem:[%s1390_s26 + $0xb08] sm:$0xff] }
  0x28   : > { %284 = vst [vmem:[%s1395_s27 + $0x160] sm:$0xff] %v283_v44  ;;  %v287_v46 = vld [vmem:[%s1390_s26 + $0xb80] sm:$0xff]  ;;  %v289_v47 = vld [vmem:[%s1390_s26 + $0xb88] sm:$0xff]  ;;  %286 = vst [vmem:[%s1395_s27 + $0x168] sm:$0xff] %v285_v45 }
  0x29   : > { %288 = vst [vmem:[%s1395_s27 + $0x170] sm:$0xff] %v287_v46  ;;  %290 = vst [vmem:[%s1395_s27 + $0x178] sm:$0xff] %v289_v47  ;;  %v291_v48 = vld [vmem:[%s1390_s26 + $0xc00] sm:$0xff]  ;;  %v293_v49 = vld [vmem:[%s1390_s26 + $0xc08] sm:$0xff] }
  0x2a   : > { %v295_v50 = vld [vmem:[%s1390_s26 + $0xc80] sm:$0xff]  ;;  %292 = vst [vmem:[%s1395_s27 + $0x180] sm:$0xff] %v291_v48  ;;  %294 = vst [vmem:[%s1395_s27 + $0x188] sm:$0xff] %v293_v49  ;;  %v297_v51 = vld [vmem:[%s1390_s26 + $0xc88] sm:$0xff] }
  0x2b   : > { %296 = vst [vmem:[%s1395_s27 + $0x190] sm:$0xff] %v295_v50  ;;  %v299_v52 = vld [vmem:[%s1390_s26 + $0xd00] sm:$0xff]  ;;  %v301_v53 = vld [vmem:[%s1390_s26 + $0xd08] sm:$0xff]  ;;  %298 = vst [vmem:[%s1395_s27 + $0x198] sm:$0xff] %v297_v51 }
  0x2c   : > { %300 = vst [vmem:[%s1395_s27 + $0x1a0] sm:$0xff] %v299_v52  ;;  %302 = vst [vmem:[%s1395_s27 + $0x1a8] sm:$0xff] %v301_v53  ;;  %v303_v54 = vld [vmem:[%s1390_s26 + $0xd80] sm:$0xff]  ;;  %v305_v55 = vld [vmem:[%s1390_s26 + $0xd88] sm:$0xff] }
  0x2d   : > { %v307_v56 = vld [vmem:[%s1390_s26 + $0xe00] sm:$0xff]  ;;  %304 = vst [vmem:[%s1395_s27 + $0x1b0] sm:$0xff] %v303_v54  ;;  %306 = vst [vmem:[%s1395_s27 + $0x1b8] sm:$0xff] %v305_v55  ;;  %v309_v57 = vld [vmem:[%s1390_s26 + $0xe08] sm:$0xff] }
  0x2e   : > { %308 = vst [vmem:[%s1395_s27 + $0x1c0] sm:$0xff] %v307_v56  ;;  %v311_v58 = vld [vmem:[%s1390_s26 + $0xe80] sm:$0xff]  ;;  %v313_v59 = vld [vmem:[%s1390_s26 + $0xe88] sm:$0xff]  ;;  %310 = vst [vmem:[%s1395_s27 + $0x1c8] sm:$0xff] %v309_v57 }
  0x2f   : > { %312 = vst [vmem:[%s1395_s27 + $0x1d0] sm:$0xff] %v311_v58  ;;  %314 = vst [vmem:[%s1395_s27 + $0x1d8] sm:$0xff] %v313_v59  ;;  %v315_v60 = vld [vmem:[%s1390_s26 + $0xf00] sm:$0xff]  ;;  %v317_v61 = vld [vmem:[%s1390_s26 + $0xf08] sm:$0xff] }
  0x30   : > { %v319_v62 = vld [vmem:[%s1390_s26 + $0xf80] sm:$0xff]  ;;  %316 = vst [vmem:[%s1395_s27 + $0x1e0] sm:$0xff] %v315_v60  ;;  %318 = vst [vmem:[%s1395_s27 + $0x1e8] sm:$0xff] %v317_v61  ;;  %v321_v63 = vld [vmem:[%s1390_s26 + $0xf88] sm:$0xff] }
  0x31   : > { %320 = vst [vmem:[%s1395_s27 + $0x1f0] sm:$0xff] %v319_v62  ;;  %322 = vst [vmem:[%s1395_s27 + $0x1f8] sm:$0xff] %v321_v63 }
  0x32 PF: > { %p1075_p6 = scmp.ge.s32.totalorder %s1325_s16, 1  ;;  %p335_p7 = scmp.lt.s32.totalorder %s1325_s16, 9 }
  0x34   : > { %p336_p8 = pnand %p1075_p6, %p335_p7 }
  0x35   : > { %s342_s28 = sand.u32 (!%p336_p8), 1, %s1309_s12   ;;  %v1528_v0 = vld [vmem:[%s1622_s0] sm:$0xff] (!%p336_p8)  ;;  %s1077_s6 = sshll.u32 (!%p336_p8), %s1317_s14, 2 }
  0x36   : > { %339 = sbr.rel (%p336_p8) target bundleno = 339 (0x153), region = 51  ;;  %s1076_s4 = sshll.u32 (!%p336_p8), %s342_s28, 9  ;;  %v1081_v1 = vcombine.high (!%p336_p8), %v1528_v0, %v1528_v0 }
  0x37   : > { %s1532_s5 = scalar_lea.vmem (!%p336_p8), [#allocation3], %s1076_s4  ;;  %p395_p9 = scmp.lt.s32.totalorder (!%p336_p8), %s1077_s6, 31 }
  0x38   : > { %v1189_v2 = vld [vmem:[%s1532_s5 + $0x4] ss:$16 sps:$4 sm:$0xff] (!%p336_p8)   ;;  %845 = vmatprep.mubr.bf16.mxu0 (!%p336_p8), %v1081_v1  ;;  %886 = vmatprep.mubr.bf16.mxu1 (!%p336_p8), %v1081_v1  ;;  %v1191_v3 = vld [vmem:[%s1532_s5 + $0xc] ss:$16 sps:$4 sm:$0xff] (!%p336_p8)   ;;  %v1193_v4 = vld [vmem:[%s1532_s5] ss:$16 sps:$4 sm:$0xff] (!%p336_p8)  }
  0x39   : > { %813 = vmatprep.subr.bf16.mxu0 (!%p336_p8), %v1189_v2  ;;  %v1194_v5 = vld [vmem:[%s1532_s5 + $0x8] ss:$16 sps:$4 sm:$0xff] (!%p336_p8)   ;;  %854 = vmatprep.subr.bf16.mxu1 (!%p336_p8), %v1191_v3  ;;  %v1195_v6 = vld [vmem:[%s1532_s5 + $0x24] ss:$16 sps:$4 sm:$0xff] (!%p336_p8)   ;;  %v1197_v7 = vld [vmem:[%s1532_s5 + $0x2c] ss:$16 sps:$4 sm:$0xff] (!%p336_p8)   ;;  %v1080_v3 = vcombine.low (!%p336_p8), %v1528_v0, %v1528_v0 }
  0x3a   : > { %814 = vmatpush1.bf16.msra.mxu0 (!%p336_p8), %v1193_v4  ;;  %855 = vmatpush1.bf16.msra.mxu1 (!%p336_p8), %v1194_v5  ;;  %v1199_v8 = vld [vmem:[%s1532_s5 + $0x20] ss:$16 sps:$4 sm:$0xff] (!%p336_p8)   ;;  %v1200_v9 = vld [vmem:[%s1532_s5 + $0x28] ss:$16 sps:$4 sm:$0xff] (!%p336_p8)   ;;  %v1201_v10 = vld [vmem:[%s1532_s5 + $0x44] ss:$16 sps:$4 sm:$0xff] (!%p336_p8)   ;;  %v912_v4 = vlaneseq (!%p336_p8) }
  0x3b   : > { %815 = vmatprep.subr.bf16.mxu0 (!%p336_p8), %v1195_v6  ;;  %856 = vmatprep.subr.bf16.mxu1 (!%p336_p8), %v1197_v7  ;;  %v1203_v11 = vld [vmem:[%s1532_s5 + $0x4c] ss:$16 sps:$4 sm:$0xff] (!%p336_p8)   ;;  %v1205_v12 = vld [vmem:[%s1532_s5 + $0x40] ss:$16 sps:$4 sm:$0xff] (!%p336_p8)   ;;  %v1206_v13 = vld [vmem:[%s1532_s5 + $0x48] ss:$16 sps:$4 sm:$0xff] (!%p336_p8)  }
  0x3c   : > { %v1207_v14 = vld [vmem:[%s1532_s5 + $0x64] ss:$16 sps:$4 sm:$0xff] (!%p336_p8)   ;;  %v1209_v15 = vld [vmem:[%s1532_s5 + $0x6c] ss:$16 sps:$4 sm:$0xff] (!%p336_p8)   ;;  %v1211_v16 = vld [vmem:[%s1532_s5 + $0x60] ss:$16 sps:$4 sm:$0xff] (!%p336_p8)  }
  0x3d   : > { %v1212_v17 = vld [vmem:[%s1532_s5 + $0x68] ss:$16 sps:$4 sm:$0xff]   ;;  %v1213_v18 = vld [vmem:[%s1532_s5 + $0x84] ss:$16 sps:$4 sm:$0xff]   ;;  %v1215_v19 = vld [vmem:[%s1532_s5 + $0x8c] ss:$16 sps:$4 sm:$0xff]  }
  0x3e   : > { %816 = vmatpush1.bf16.msra.mxu0 %v1199_v8  ;;  %857 = vmatpush1.bf16.msra.mxu1 %v1200_v9  ;;  %v1217_v20 = vld [vmem:[%s1532_s5 + $0x80] ss:$16 sps:$4 sm:$0xff]   ;;  %v1218_v21 = vld [vmem:[%s1532_s5 + $0x88] ss:$16 sps:$4 sm:$0xff]   ;;  %v1219_v22 = vld [vmem:[%s1532_s5 + $0xa4] ss:$16 sps:$4 sm:$0xff]  }
  0x3f   : > { %817 = vmatprep.subr.bf16.mxu0 %v1201_v10  ;;  %858 = vmatprep.subr.bf16.mxu1 %v1203_v11  ;;  %v1221_v23 = vld [vmem:[%s1532_s5 + $0xac] ss:$16 sps:$4 sm:$0xff]   ;;  %v1223_v24 = vld [vmem:[%s1532_s5 + $0xa0] ss:$16 sps:$4 sm:$0xff]   ;;  %v1224_v25 = vld [vmem:[%s1532_s5 + $0xa8] ss:$16 sps:$4 sm:$0xff]  }
  0x40   : > { %v1225_v26 = vld [vmem:[%s1532_s5 + $0xc4] ss:$16 sps:$4 sm:$0xff]   ;;  %v1227_v27 = vld [vmem:[%s1532_s5 + $0xcc] ss:$16 sps:$4 sm:$0xff]   ;;  %v1229_v28 = vld [vmem:[%s1532_s5 + $0xc0] ss:$16 sps:$4 sm:$0xff]  }
  0x41   : > { %v1230_v29 = vld [vmem:[%s1532_s5 + $0xc8] ss:$16 sps:$4 sm:$0xff]   ;;  %v1231_v30 = vld [vmem:[%s1532_s5 + $0xe4] ss:$16 sps:$4 sm:$0xff]   ;;  %v1233_v31 = vld [vmem:[%s1532_s5 + $0xec] ss:$16 sps:$4 sm:$0xff]  }
  0x42   : > { %818 = vmatpush1.bf16.msra.mxu0 %v1205_v12  ;;  %859 = vmatpush1.bf16.msra.mxu1 %v1206_v13  ;;  %v1235_v32 = vld [vmem:[%s1532_s5 + $0xe0] ss:$16 sps:$4 sm:$0xff]   ;;  %v1236_v33 = vld [vmem:[%s1532_s5 + $0xe8] ss:$16 sps:$4 sm:$0xff]   ;;  %v1237_v34 = vld [vmem:[%s1532_s5 + $0x104] ss:$16 sps:$4 sm:$0xff]  }
  0x43   : > { %819 = vmatprep.subr.bf16.mxu0 %v1207_v14  ;;  %860 = vmatprep.subr.bf16.mxu1 %v1209_v15  ;;  %v1239_v35 = vld [vmem:[%s1532_s5 + $0x10c] ss:$16 sps:$4 sm:$0xff]   ;;  %v1241_v36 = vld [vmem:[%s1532_s5 + $0x100] ss:$16 sps:$4 sm:$0xff]   ;;  %v1242_v37 = vld [vmem:[%s1532_s5 + $0x108] ss:$16 sps:$4 sm:$0xff]  }
  0x44   : > { %v1243_v38 = vld [vmem:[%s1532_s5 + $0x124] ss:$16 sps:$4 sm:$0xff]   ;;  %v1245_v39 = vld [vmem:[%s1532_s5 + $0x12c] ss:$16 sps:$4 sm:$0xff]   ;;  %v1247_v40 = vld [vmem:[%s1532_s5 + $0x120] ss:$16 sps:$4 sm:$0xff]  }
  0x45   : > { %v1248_v41 = vld [vmem:[%s1532_s5 + $0x128] ss:$16 sps:$4 sm:$0xff]   ;;  %v1249_v42 = vld [vmem:[%s1532_s5 + $0x144] ss:$16 sps:$4 sm:$0xff]   ;;  %v1251_v43 = vld [vmem:[%s1532_s5 + $0x14c] ss:$16 sps:$4 sm:$0xff]  }
  0x46   : > { %820 = vmatpush1.bf16.msra.mxu0 %v1211_v16  ;;  %861 = vmatpush1.bf16.msra.mxu1 %v1212_v17  ;;  %v1253_v44 = vld [vmem:[%s1532_s5 + $0x140] ss:$16 sps:$4 sm:$0xff]   ;;  %v1254_v45 = vld [vmem:[%s1532_s5 + $0x148] ss:$16 sps:$4 sm:$0xff]   ;;  %v1255_v46 = vld [vmem:[%s1532_s5 + $0x164] ss:$16 sps:$4 sm:$0xff]  }
  0x47   : > { %821 = vmatprep.subr.bf16.mxu0 %v1213_v18  ;;  %862 = vmatprep.subr.bf16.mxu1 %v1215_v19  ;;  %v1257_v47 = vld [vmem:[%s1532_s5 + $0x16c] ss:$16 sps:$4 sm:$0xff]   ;;  %v1259_v48 = vld [vmem:[%s1532_s5 + $0x160] ss:$16 sps:$4 sm:$0xff]   ;;  %v1260_v49 = vld [vmem:[%s1532_s5 + $0x168] ss:$16 sps:$4 sm:$0xff]  }
  0x48   : > { %v1261_v50 = vld [vmem:[%s1532_s5 + $0x184] ss:$16 sps:$4 sm:$0xff]   ;;  %v1263_v51 = vld [vmem:[%s1532_s5 + $0x18c] ss:$16 sps:$4 sm:$0xff]   ;;  %v1265_v52 = vld [vmem:[%s1532_s5 + $0x180] ss:$16 sps:$4 sm:$0xff]  }
  0x49   : > { %v1266_v53 = vld [vmem:[%s1532_s5 + $0x188] ss:$16 sps:$4 sm:$0xff]   ;;  %v1267_v54 = vld [vmem:[%s1532_s5 + $0x1a4] ss:$16 sps:$4 sm:$0xff]   ;;  %v1269_v55 = vld [vmem:[%s1532_s5 + $0x1ac] ss:$16 sps:$4 sm:$0xff]  }
  0x4a   : > { %822 = vmatpush1.bf16.msra.mxu0 %v1217_v20  ;;  %863 = vmatpush1.bf16.msra.mxu1 %v1218_v21  ;;  %v1271_v56 = vld [vmem:[%s1532_s5 + $0x1a0] ss:$16 sps:$4 sm:$0xff]   ;;  %v1272_v57 = vld [vmem:[%s1532_s5 + $0x1a8] ss:$16 sps:$4 sm:$0xff]   ;;  %v1273_v58 = vld [vmem:[%s1532_s5 + $0x1c4] ss:$16 sps:$4 sm:$0xff]  }
  0x4b   : > { %823 = vmatprep.subr.bf16.mxu0 %v1219_v22  ;;  %864 = vmatprep.subr.bf16.mxu1 %v1221_v23  ;;  %v1275_v59 = vld [vmem:[%s1532_s5 + $0x1cc] ss:$16 sps:$4 sm:$0xff]   ;;  %v1277_v60 = vld [vmem:[%s1532_s5 + $0x1c0] ss:$16 sps:$4 sm:$0xff]   ;;  %v1278_v61 = vld [vmem:[%s1532_s5 + $0x1c8] ss:$16 sps:$4 sm:$0xff]  }
  0x4c   : > { %v1279_v62 = vld [vmem:[%s1532_s5 + $0x1e4] ss:$16 sps:$4 sm:$0xff]   ;;  %v1281_v63 = vld [vmem:[%s1532_s5 + $0x1ec] ss:$16 sps:$4 sm:$0xff]   ;;  %v1283_v1 = vld [vmem:[%s1532_s5 + $0x1e0] ss:$16 sps:$4 sm:$0xff]  }
  0x4d   : > { %v1284_v2 = vld [vmem:[%s1532_s5 + $0x1e8] ss:$16 sps:$4 sm:$0xff]   ;;  %s1633_s6 = smov (!%p395_p9, %s1077_s6), 31  ;;  %v913_v5 = vshrl.u32 %v912_v4, 7 }
  0x4e   : > { %824 = vmatpush1.bf16.msra.mxu0 %v1223_v24  ;;  %865 = vmatpush1.bf16.msra.mxu1 %v1224_v25  ;;  %s397_s9 = scalar_lea.vmem %s1624_s2, %s1633_s6  ;;  %s1079_s10 = sshll.u32 %s1633_s6, 3 }
  0x4f   : > { %825 = vmatprep.subr.bf16.mxu0 %v1225_v26  ;;  %866 = vmatprep.subr.bf16.mxu1 %v1227_v27  ;;  %v914_v6 = vsub.s32 0, %v913_v5  ;;  %v922_v7 = vsub.s32 2, %v913_v5  ;;  %v910_v8 = vld [vmem:[%s397_s9] sm:$0xf]  ;;  %v918_v9 = vsub.s32 1, %v913_v5  ;;  %v926_v10 = vsub.s32 3, %v913_v5  ;;  %s407_s14 = scalar_lea.vmem %s1625_s3, %s1079_s10 }
  0x51   : > { %v915_v11 = vrot.slane %v910_v8, %v914_v6  ;;  %v923_v0 = vrot.slane %v910_v8, %v922_v7  ;;  %v919_v12 = vrot.slane %v910_v8, %v918_v9  ;;  %v927_v13 = vrot.slane %v910_v8, %v926_v10 }
  0x52   : > { %826 = vmatpush1.bf16.msra.mxu0 %v1229_v28  ;;  %867 = vmatpush1.bf16.msra.mxu1 %v1230_v29 }
  0x53   : > { %827 = vmatprep.subr.bf16.mxu0 %v1231_v30  ;;  %868 = vmatprep.subr.bf16.mxu1 %v1233_v31 }
  0x56   : > { %828 = vmatpush1.bf16.msra.mxu0 %v1235_v32  ;;  %869 = vmatpush1.bf16.msra.mxu1 %v1236_v33 }
  0x57   : > { %829 = vmatprep.subr.bf16.mxu0 %v1237_v34  ;;  %870 = vmatprep.subr.bf16.mxu1 %v1239_v35 }
  0x5a   : > { %830 = vmatpush1.bf16.msra.mxu0 %v1241_v36  ;;  %871 = vmatpush1.bf16.msra.mxu1 %v1242_v37 }
  0x5b   : > { %831 = vmatprep.subr.bf16.mxu0 %v1243_v38  ;;  %872 = vmatprep.subr.bf16.mxu1 %v1245_v39 }
  0x5e   : > { %832 = vmatpush1.bf16.msra.mxu0 %v1247_v40  ;;  %873 = vmatpush1.bf16.msra.mxu1 %v1248_v41 }
  0x5f   : > { %833 = vmatprep.subr.bf16.mxu0 %v1249_v42  ;;  %874 = vmatprep.subr.bf16.mxu1 %v1251_v43 }
  0x62   : > { %834 = vmatpush1.bf16.msra.mxu0 %v1253_v44  ;;  %875 = vmatpush1.bf16.msra.mxu1 %v1254_v45 }
  0x63   : > { %835 = vmatprep.subr.bf16.mxu0 %v1255_v46  ;;  %876 = vmatprep.subr.bf16.mxu1 %v1257_v47 }
  0x66   : > { %836 = vmatpush1.bf16.msra.mxu0 %v1259_v48  ;;  %877 = vmatpush1.bf16.msra.mxu1 %v1260_v49 }
  0x67   : > { %837 = vmatprep.subr.bf16.mxu0 %v1261_v50  ;;  %878 = vmatprep.subr.bf16.mxu1 %v1263_v51 }
  0x6a   : > { %838 = vmatpush1.bf16.msra.mxu0 %v1265_v52  ;;  %879 = vmatpush1.bf16.msra.mxu1 %v1266_v53 }
  0x6b   : > { %839 = vmatprep.subr.bf16.mxu0 %v1267_v54  ;;  %880 = vmatprep.subr.bf16.mxu1 %v1269_v55 }
  0x6e   : > { %840 = vmatpush1.bf16.msra.mxu0 %v1271_v56  ;;  %881 = vmatpush1.bf16.msra.mxu1 %v1272_v57 }
  0x6f   : > { %841 = vmatprep.subr.bf16.mxu0 %v1273_v58  ;;  %882 = vmatprep.subr.bf16.mxu1 %v1275_v59 }
  0x72   : > { %842 = vmatpush1.bf16.msra.mxu0 %v1277_v60  ;;  %883 = vmatpush1.bf16.msra.mxu1 %v1278_v61 }
  0x73   : > { %843 = vmatprep.subr.bf16.mxu0 %v1279_v62  ;;  %884 = vmatprep.subr.bf16.mxu1 %v1281_v63 }
  0x76   : > { %844 = vmatpush1.bf16.msra.mxu0 %v1283_v1  ;;  %885 = vmatpush1.bf16.msra.mxu1 %v1284_v2 }
  0x79   : > { %846 = vmatmul.mubr.bf16.vlgmr.msra.gmra.mrb[0].mxu0 %v1080_v3  ;;  %887 = vmatmul.mubr.bf16.vlgmr.msra.gmra.mrb[0].mxu1 %v1080_v3 }
 0x14c   : > { %v847_v14 = vpop.f32.mrb[0].mxu0  ;;  %v888_v15 = vpop.f32.mrb[0].mxu1 }
 0x14d   : > { %v932_v16 = vadd.f32 %v915_v11, %v847_v14  ;;  %v934_v17 = vadd.f32 %v923_v0, %v888_v15  ;;  %v849_v18 = vpop.f32.mrb[1].mxu0  ;;  %v890_v19 = vpop.f32.mrb[1].mxu1 }
 0x14e   : > { %v933_v20 = vadd.f32 %v919_v12, %v849_v18  ;;  %v935_v21 = vadd.f32 %v927_v13, %v890_v19  ;;  %v851_v22 = vpop.f32.mrb[2].mxu0  ;;  %v892_v23 = vpop.f32.mrb[2].mxu1 }
 0x14f   : > { %v936_v24 = vmax.f32 %v932_v16, 0.0  ;;  %v938_v25 = vmax.f32 %v934_v17, 0.0  ;;  %v852_v26 = vpop.f32.mrb[3].mxu0  ;;  %v893_v27 = vpop.f32.mrb[3].mxu1 }
 0x150   : > { %v937_v28 = vmax.f32 %v933_v20, 0.0  ;;  %v939_v29 = vmax.f32 %v935_v21, 0.0 }
 0x151   : > { %940 = vst [vmem:[%s407_s14] sm:$0xff] %v936_v24  ;;  %942 = vst [vmem:[%s407_s14 + $0x10] sm:$0xff] %v938_v25 }
 0x152   : > { %941 = vst [vmem:[%s407_s14 + $0x8] sm:$0xff] %v937_v28  ;;  %943 = vst [vmem:[%s407_s14 + $0x18] sm:$0xff] %v939_v29 }
 0x153 PF: > { %s13_s16 = sadd.s32 1, %s1325_s16   ;;  %s1626_s12 = smov %s1313_s13 }
 0x154   : > { %p10_p10 = scmp.ge.s32.totalorder %s13_s16, 10   ;;  %s1627_s13 = smov %s1382_s20 }
 0x155   : > { %s1628_s14 = smov %s1321_s15  ;;  %s1629_s15 = smov %s1631_s17 }
 0x156   :  { %12 = sbr.rel (!%p10_p10) target bundleno = 3 (0x3), region = 104 }

// kernel: _lambda_.14
= control target key start
LH: loop header
LB: loop body
LE: loop exit
PB: predicated region body
PF: predicated region fallthrough
CT: control target
= control target key end

     0   :  { %s3129_s0 = inlined_call_operand.hbm [shape: bf16[8,4096], index: 0, kind: input, shape index: {}]   ;;  %s3130_s1 = inlined_call_operand.vmem [shape: bf16[4096,4096], index: 1, kind: input, shape index: {}]   ;;  %s3131_s2 = inlined_call_operand.hbm [shape: f32[1,4096], index: 2, kind: input, shape index: {}]   ;;  %s3132_s3 = inlined_call_operand.hbm [shape: f32[8,4096], index: 3, kind: output, shape index: {}]  }
   0x1   :  { %3146 = sst [smem:[#allocation22_spill]] %s3132_s3 }
   0x2   :  { %8 = vsyncpa [#allocation4], 0 }
   0x3   :  { %10 = vsyncpa [#allocation4 + $0x1], 0 }
   0x4   :  { %11 = vsyncpa [#allocation8], 0 }
   0x5   :  { %13 = vsyncpa [#allocation8 + $0x1], 0 }
   0x6   :  { %14 = vsyncpa [#allocation5], 0 }
   0x7   :  { %16 = vsyncpa [#allocation5 + $0x1], 0  ;;  %s2414_s12 = smov 0   ;;  %s2416_s13 = smov 0  }
   0x8   :  { %s2418_s14 = smov 0   ;;  %s2420_s15 = smov 0  }
   0x9   :  { %s2422_s16 = smov 0   ;;  %s2424_s17 = smov 0  }
   0xa   :  { %s2426_s18 = smov 0   ;;  %s2428_s19 = smov 0  }
   0xb   :  { %s2430_s20 = smov 0   ;;  %s2432_s21 = smov 0  }
   0xc   :  { %s2434_s22 = smov 0   ;;  %s2436_s23 = smov 0  }
   0xd   :  { %s2438_s24 = smov 0  }
   0xe LB: > { %3147 = sst [smem:[#allocation13_spill]] %s2340_s12  ;;  %s3133_s25 = sadd.s32 4294967295, %s2388_s24   ;;  %s2388_s24 = sphi %s2438_s24, %s22_s24   ;;  %s2384_s23 = sphi %s2436_s23, %s3193_s23   ;;  %s2380_s22 = sphi %s2434_s22, %s3192_s22   ;;  %s2376_s21 = sphi %s2432_s21, %s3191_s21   ;;  %s2372_s20 = sphi %s2430_s20, %s3190_s20   ;;  %s2368_s19 = sphi %s2428_s19, %s3180_s19   ;;  %s2364_s18 = sphi %s2426_s18, %s3189_s18   ;;  %s2360_s17 = sphi %s2424_s17, %s3188_s17   ;;  %s2356_s16 = sphi %s2422_s16, %s3187_s16   ;;  %s2352_s15 = sphi %s2420_s15, %s3186_s15   ;;  %s2348_s14 = sphi %s2418_s14, %s3185_s14   ;;  %s2344_s13 = sphi %s2416_s13, %s3184_s13   ;;  %s2340_s12 = sphi %s2414_s12, %s3183_s12  }
   0xf   : > { %3148 = sst [smem:[#allocation14_spill]] %s2368_s19  ;;  %s34_s27 = sadd.s32 1, %s2380_s22 }
  0x10   : > { %s37_s28 = sadd.s32 1, %s2384_s23  ;;  %p35_p0 = scmp.ge.s32.totalorder %s34_s27, 8 }
  0x11   : > { %s50_s29 = sadd.s32 1, %s2368_s19  ;;  %p57_p1 = scmp.ne.s32.totalorder %s2368_s19, %s2364_s18 }
  0x12   : > { %p58_p2 = scmp.eq.s32.totalorder %s2388_s24, 0  ;;  %s3195_s27 = smov (%p35_p0, %s34_s27), 0 }
  0x13   : > { %3149 = sst [smem:[#allocation15_spill]] %s3195_s27  ;;  %s3197_s28 = smov (!%p35_p0, %s37_s28), %s2384_s23 }
  0x14   : > { %s46_s30 = ssub.s32 %s2380_s22, %s3195_s27  ;;  %p2492_p3 = por %p58_p2, %p57_p1 }
  0x15   : > { %p39_p4 = scmp.ge.s32.totalorder %s3197_s28, 8  ;;  %p48_p5 = scmp.eq.s32.totalorder %s46_s30, 0 }
  0x16   : > { %p63_p6 = scmp.ne.s32.totalorder %s2364_s18, %s2360_s17  ;;  %p2499_p7 = scmp.eq.s32.totalorder %s3133_s25, 0 }
  0x17   : > { %s3199_s28 = smov (%p39_p4, %s3197_s28), 0  ;;  %s78_s10 = sadd.s32 1, %s2356_s16 }
  0x18   : > { %3152 = sst [smem:[#allocation16_spill]] %s3199_s28  ;;  %p2510_p8 = por %p2499_p7, %p63_p6 }
  0x19   : > { %s2506_s6 = scalar_select %p48_p5, %s2368_s19, %s50_s29  }
  0x1a   : > { %s3154_s7 = scalar_select %p2510_p8, 1, 0 }
  0x1b   : > { %3153 = sst [smem:[#allocation17_spill]] %s2506_s6  ;;  %s74_s8 = ssub.s32 %s2384_s23, %s3199_s28 }
  0x1c   : > { %s75_s9 = sor.u32 %s74_s8, %s46_s30  ;;  %p85_p10 = scmp.ne.s32.totalorder %s2356_s16, %s2352_s15 }
  0x1d   : > { %p76_p9 = scmp.eq.s32.totalorder %s75_s9, 0  ;;  %p102_p11 = scmp.eq.s32.totalorder %s74_s8, 0 }
  0x1e   : > { %s104_s11 = sadd.s32 1, %s2348_s14  ;;  %p2525_p12 = por %p85_p10, %p58_p2 }
  0x1f   : > { %s2521_s17 = scalar_select %p76_p9, %s2356_s16, %s78_s10  }
  0x20   : > { %s3156_s29 = scalar_select %p2525_p12, 1, 0 }
  0x21   : > { %3155 = sst [smem:[#allocation18_spill]] %s2521_s17  ;;  %p111_p13 = scmp.ne.s32.totalorder %s2348_s14, %s2344_s13 }
  0x22   : > { %s2532_s26 = scalar_select %p102_p11, %s2348_s14, %s104_s11  }
  0x23   : > { %p2536_p0 = por %p111_p13, %p58_p2  ;;  %p117_p1 = scmp.ne.s32.totalorder %s2344_s13, %s2340_s12 }
  0x24   : > { %3157 = sst [smem:[#allocation19_spill]] %s2532_s26  ;;  %s3159_s30 = sadd.s32 4294967295, %s2388_s24  }
  0x25   : > { %s3158_s25 = scalar_select %p2536_p0, 1, 0 }
  0x26   : > { %p143_p4 = scmp.eq.s32.totalorder %s3159_s30, 63  ;;  %s3160_s8 = sadd.s32 4294967294, %s2388_s24  }
  0x27   : > { %p149_p5 = scmp.eq.s32.totalorder %s3160_s8, 63  ;;  %p2548_p6 = por %p117_p1, %p2499_p7 }
  0x28   : > { %p2552_p9 = por %p143_p4, %p111_p13  ;;  %p1718_p2 = scmp.ge.s32.totalorder %s2388_s24, 64 }
  0x29   : > { %s3161_s9 = scalar_select %p2548_p6, 1, 0 }
  0x2a   : > { %s3162_s10 = scalar_select %p2552_p9, 1, 0 }
  0x2b   : > { %p2556_p10 = por %p149_p5, %p117_p1  ;;  %165 = sbr.rel (%p1718_p2) target bundleno = 169 (0xa9), region = 16 }
  0x2c   : > { %3163 = sst [smem:[#allocation20_spill]] %s3162_s10  ;;  %s169_s30 = sand.u32 (!%p1718_p2), 1, %s2368_s19  }
  0x2d   : > { %s3164_s11 = scalar_select %p2556_p10, 1, 0 }
  0x2e   : > { %s1874_s5 = sshll.u32 (!%p1718_p2), %s2380_s22, 8  ;;  %s1719_s8 = sshll.u32 (!%p1718_p2), %s169_s30, 4 }
  0x2f   : > { %3165 = sst [smem:[#allocation21_spill]] %s3164_s11  ;;  %s2566_s6 = scalar_lea.hbm (!%p1718_p2), %s3129_s0, %s1874_s5 }
  0x30   : > { %s173_s17 = scalar_lea.vmem (!%p1718_p2), [#allocation3], %s1719_s8  ;;  %s170_s11 = scalar_lea.sflag (!%p1718_p2), [#allocation4], %s169_s30 }
  0x31   : > { %s183_s26 = sshll.u32 (!%p1718_p2), %s173_s17, 4  ;;  %s2190_s12 = scalar_lea.hbm (!%p1718_p2), %s2566_s6, 256  ;;  %s184_s26 = int_to_ptr.vmem [resolvable:$true] %s183_s26 }
  0x32   : > { %p2191_p7 = scmp.ne.s32.totalorder %s2566_s6, %s2190_s12  ;;  %s2194_s10 = scalar_lea.hbm %s3129_s0, 2048 }
  0x33   : > { %p2195_p1 = scmp.lt.u32.totalorder %s2566_s6, %s3129_s0  ;;  %p2196_p4 = scmp.lt.u32.totalorder %s2194_s10, %s2190_s12 }
  0x34   : > { %p2192_p11 = pnand %p2191_p7, %p2492_p3  ;;  %p2198_p2 = scmp.lt.u32.totalorder %s2190_s12, %s2566_s6 }
  0x35   : > { %p2197_p5 = por %p2196_p4, %p2195_p1 }
  0x36   : > { %p2193_p13 = pneg %p2192_p11 }
  0x37   : > { %p2199_p10 = por %p2198_p2, %p2197_p5 }
  0x39   : > { %p2200_p9 = pnand %p2199_p10, %p2193_p13 }
  0x3b   : > { %2203 = shalt.err (!%p2200_p9)
}
  0x3c   : > { %s2204_s17 = scalar_lea.vmem %s184_s26, 256  ;;  %s2390_s30 = smov [#allocation3]  }
  0x3d   : > { %p2205_p6 = scmp.ne.s32.totalorder %s184_s26, %s2204_s17  ;;  %s2208_s5 = sshll.u32 %s2390_s30, 4  ;;  %s2209_s5 = int_to_ptr.vmem [resolvable:$false] %s2208_s5 }
  0x3e   : > { %s2210_s3 = scalar_lea.vmem %s2209_s5, 512  ;;  %p2211_p8 = scmp.lt.s32.totalorder %s184_s26, %s2209_s5 }
  0x3f   : > { %p2206_p7 = pnand %p2205_p6, %p2492_p3  ;;  %p2212_p0 = scmp.lt.s32.totalorder %s2210_s3, %s2204_s17 }
  0x41   : > { %p2207_p11 = pneg %p2206_p7  ;;  %p2213_p12 = por %p2212_p0, %p2211_p8 }
  0x43   : > { %p2214_p1 = pnand %p2213_p12, %p2207_p11 }
  0x45   : > { %2217 = shalt.err (!%p2214_p1)
}
  0x46   : > { %1878 = dma.hbm_to_vmem [thread:$0]  (%p2492_p3), %s2566_s6, 256, %s184_s26, %s170_s11  }
  0x47   : > { %p3166_p9 = scmp.ne.s32.totalorder %s3156_s29, 0 }
  0x48   : > { %s191_s12 = sand.u32 (%p3166_p9), 1, %s2356_s16   ;;  %s1724_s19 = sshll.u32 (%p3166_p9), %s2384_s23, 2 }
  0x49   : > { %189 = sbr.rel (!%p3166_p9) target bundleno = 143 (0x8f), region = 24  ;;  %s1722_s10 = sshll.u32 (%p3166_p9), %s191_s12, 10 }
  0x4a   : > { %s1875_s8 = sshll.u32 (%p3166_p9), %s2380_s22, 11  ;;  %s2598_s26 = scalar_lea.vmem (%p3166_p9), [#allocation6], %s1722_s10 }
  0x4b   : > { %s197_s27 = sadd.s32 (%p3166_p9), %s1875_s8, %s1724_s19 }
  0x4c   : > { %s1726_s28 = sshll.u32 (%p3166_p9), %s197_s27, 2 }
  0x4d   : > { %s2593_s5 = scalar_lea.vmem (%p3166_p9), %s3130_s1, %s1726_s28 }
  0x4e   : > { %v212_v0 = vld [vmem:[%s2593_s5] sm:$0xff] (%p3166_p9)  ;;  %v214_v1 = vld [vmem:[%s2593_s5 + $0x8] sm:$0xff] (%p3166_p9) }
  0x4f   : > { %v216_v2 = vld [vmem:[%s2593_s5 + $0x80] sm:$0xff] (%p3166_p9)  ;;  %213 = vst [vmem:[%s2598_s26] sm:$0xff] (%p3166_p9), %v212_v0  ;;  %215 = vst [vmem:[%s2598_s26 + $0x8] sm:$0xff] (%p3166_p9), %v214_v1  ;;  %v218_v3 = vld [vmem:[%s2593_s5 + $0x88] sm:$0xff] (%p3166_p9) }
  0x50   : > { %217 = vst [vmem:[%s2598_s26 + $0x10] sm:$0xff] %v216_v2  ;;  %v220_v4 = vld [vmem:[%s2593_s5 + $0x100] sm:$0xff]  ;;  %v222_v5 = vld [vmem:[%s2593_s5 + $0x108] sm:$0xff]  ;;  %219 = vst [vmem:[%s2598_s26 + $0x18] sm:$0xff] %v218_v3 }
  0x51   : > { %221 = vst [vmem:[%s2598_s26 + $0x20] sm:$0xff] %v220_v4  ;;  %223 = vst [vmem:[%s2598_s26 + $0x28] sm:$0xff] %v222_v5  ;;  %v224_v6 = vld [vmem:[%s2593_s5 + $0x180] sm:$0xff]  ;;  %v226_v7 = vld [vmem:[%s2593_s5 + $0x188] sm:$0xff] }
  0x52   : > { %v228_v8 = vld [vmem:[%s2593_s5 + $0x200] sm:$0xff]  ;;  %225 = vst [vmem:[%s2598_s26 + $0x30] sm:$0xff] %v224_v6  ;;  %227 = vst [vmem:[%s2598_s26 + $0x38] sm:$0xff] %v226_v7  ;;  %v230_v9 = vld [vmem:[%s2593_s5 + $0x208] sm:$0xff] }
  0x53   : > { %229 = vst [vmem:[%s2598_s26 + $0x40] sm:$0xff] %v228_v8  ;;  %v232_v10 = vld [vmem:[%s2593_s5 + $0x280] sm:$0xff]  ;;  %v234_v11 = vld [vmem:[%s2593_s5 + $0x288] sm:$0xff]  ;;  %231 = vst [vmem:[%s2598_s26 + $0x48] sm:$0xff] %v230_v9 }
  0x54   : > { %233 = vst [vmem:[%s2598_s26 + $0x50] sm:$0xff] %v232_v10  ;;  %235 = vst [vmem:[%s2598_s26 + $0x58] sm:$0xff] %v234_v11  ;;  %v236_v12 = vld [vmem:[%s2593_s5 + $0x300] sm:$0xff]  ;;  %v238_v13 = vld [vmem:[%s2593_s5 + $0x308] sm:$0xff] }
  0x55   : > { %v240_v14 = vld [vmem:[%s2593_s5 + $0x380] sm:$0xff]  ;;  %237 = vst [vmem:[%s2598_s26 + $0x60] sm:$0xff] %v236_v12  ;;  %239 = vst [vmem:[%s2598_s26 + $0x68] sm:$0xff] %v238_v13  ;;  %v242_v15 = vld [vmem:[%s2593_s5 + $0x388] sm:$0xff] }
  0x56   : > { %241 = vst [vmem:[%s2598_s26 + $0x70] sm:$0xff] %v240_v14  ;;  %v244_v16 = vld [vmem:[%s2593_s5 + $0x400] sm:$0xff]  ;;  %v246_v17 = vld [vmem:[%s2593_s5 + $0x408] sm:$0xff]  ;;  %243 = vst [vmem:[%s2598_s26 + $0x78] sm:$0xff] %v242_v15 }
  0x57   : > { %245 = vst [vmem:[%s2598_s26 + $0x80] sm:$0xff] %v244_v16  ;;  %247 = vst [vmem:[%s2598_s26 + $0x88] sm:$0xff] %v246_v17  ;;  %v248_v18 = vld [vmem:[%s2593_s5 + $0x480] sm:$0xff]  ;;  %v250_v19 = vld [vmem:[%s2593_s5 + $0x488] sm:$0xff] }
  0x58   : > { %v252_v20 = vld [vmem:[%s2593_s5 + $0x500] sm:$0xff]  ;;  %249 = vst [vmem:[%s2598_s26 + $0x90] sm:$0xff] %v248_v18  ;;  %251 = vst [vmem:[%s2598_s26 + $0x98] sm:$0xff] %v250_v19  ;;  %v254_v21 = vld [vmem:[%s2593_s5 + $0x508] sm:$0xff] }
  0x59   : > { %253 = vst [vmem:[%s2598_s26 + $0xa0] sm:$0xff] %v252_v20  ;;  %v256_v22 = vld [vmem:[%s2593_s5 + $0x580] sm:$0xff]  ;;  %v258_v23 = vld [vmem:[%s2593_s5 + $0x588] sm:$0xff]  ;;  %255 = vst [vmem:[%s2598_s26 + $0xa8] sm:$0xff] %v254_v21 }
  0x5a   : > { %257 = vst [vmem:[%s2598_s26 + $0xb0] sm:$0xff] %v256_v22  ;;  %259 = vst [vmem:[%s2598_s26 + $0xb8] sm:$0xff] %v258_v23  ;;  %v260_v24 = vld [vmem:[%s2593_s5 + $0x600] sm:$0xff]  ;;  %v262_v25 = vld [vmem:[%s2593_s5 + $0x608] sm:$0xff] }
  0x5b   : > { %v264_v26 = vld [vmem:[%s2593_s5 + $0x680] sm:$0xff]  ;;  %261 = vst [vmem:[%s2598_s26 + $0xc0] sm:$0xff] %v260_v24  ;;  %263 = vst [vmem:[%s2598_s26 + $0xc8] sm:$0xff] %v262_v25  ;;  %v266_v27 = vld [vmem:[%s2593_s5 + $0x688] sm:$0xff] }
  0x5c   : > { %265 = vst [vmem:[%s2598_s26 + $0xd0] sm:$0xff] %v264_v26  ;;  %v268_v28 = vld [vmem:[%s2593_s5 + $0x700] sm:$0xff]  ;;  %v270_v29 = vld [vmem:[%s2593_s5 + $0x708] sm:$0xff]  ;;  %267 = vst [vmem:[%s2598_s26 + $0xd8] sm:$0xff] %v266_v27 }
  0x5d   : > { %269 = vst [vmem:[%s2598_s26 + $0xe0] sm:$0xff] %v268_v28  ;;  %271 = vst [vmem:[%s2598_s26 + $0xe8] sm:$0xff] %v270_v29  ;;  %v272_v30 = vld [vmem:[%s2593_s5 + $0x780] sm:$0xff]  ;;  %v274_v31 = vld [vmem:[%s2593_s5 + $0x788] sm:$0xff] }
  0x5e   : > { %v276_v32 = vld [vmem:[%s2593_s5 + $0x800] sm:$0xff]  ;;  %273 = vst [vmem:[%s2598_s26 + $0xf0] sm:$0xff] %v272_v30  ;;  %275 = vst [vmem:[%s2598_s26 + $0xf8] sm:$0xff] %v274_v31  ;;  %v278_v33 = vld [vmem:[%s2593_s5 + $0x808] sm:$0xff] }
  0x5f   : > { %277 = vst [vmem:[%s2598_s26 + $0x100] sm:$0xff] %v276_v32  ;;  %v280_v34 = vld [vmem:[%s2593_s5 + $0x880] sm:$0xff]  ;;  %v282_v35 = vld [vmem:[%s2593_s5 + $0x888] sm:$0xff]  ;;  %279 = vst [vmem:[%s2598_s26 + $0x108] sm:$0xff] %v278_v33 }
  0x60   : > { %281 = vst [vmem:[%s2598_s26 + $0x110] sm:$0xff] %v280_v34  ;;  %283 = vst [vmem:[%s2598_s26 + $0x118] sm:$0xff] %v282_v35  ;;  %v284_v36 = vld [vmem:[%s2593_s5 + $0x900] sm:$0xff]  ;;  %v286_v37 = vld [vmem:[%s2593_s5 + $0x908] sm:$0xff] }
  0x61   : > { %v288_v38 = vld [vmem:[%s2593_s5 + $0x980] sm:$0xff]  ;;  %285 = vst [vmem:[%s2598_s26 + $0x120] sm:$0xff] %v284_v36  ;;  %287 = vst [vmem:[%s2598_s26 + $0x128] sm:$0xff] %v286_v37  ;;  %v290_v39 = vld [vmem:[%s2593_s5 + $0x988] sm:$0xff] }
  0x62   : > { %289 = vst [vmem:[%s2598_s26 + $0x130] sm:$0xff] %v288_v38  ;;  %v292_v40 = vld [vmem:[%s2593_s5 + $0xa00] sm:$0xff]  ;;  %v294_v41 = vld [vmem:[%s2593_s5 + $0xa08] sm:$0xff]  ;;  %291 = vst [vmem:[%s2598_s26 + $0x138] sm:$0xff] %v290_v39 }
  0x63   : > { %293 = vst [vmem:[%s2598_s26 + $0x140] sm:$0xff] %v292_v40  ;;  %295 = vst [vmem:[%s2598_s26 + $0x148] sm:$0xff] %v294_v41  ;;  %v296_v42 = vld [vmem:[%s2593_s5 + $0xa80] sm:$0xff]  ;;  %v298_v43 = vld [vmem:[%s2593_s5 + $0xa88] sm:$0xff] }
  0x64   : > { %v300_v44 = vld [vmem:[%s2593_s5 + $0xb00] sm:$0xff]  ;;  %297 = vst [vmem:[%s2598_s26 + $0x150] sm:$0xff] %v296_v42  ;;  %299 = vst [vmem:[%s2598_s26 + $0x158] sm:$0xff] %v298_v43  ;;  %v302_v45 = vld [vmem:[%s2593_s5 + $0xb08] sm:$0xff] }
  0x65   : > { %301 = vst [vmem:[%s2598_s26 + $0x160] sm:$0xff] %v300_v44  ;;  %v304_v46 = vld [vmem:[%s2593_s5 + $0xb80] sm:$0xff]  ;;  %v306_v47 = vld [vmem:[%s2593_s5 + $0xb88] sm:$0xff]  ;;  %303 = vst [vmem:[%s2598_s26 + $0x168] sm:$0xff] %v302_v45 }
  0x66   : > { %305 = vst [vmem:[%s2598_s26 + $0x170] sm:$0xff] %v304_v46  ;;  %307 = vst [vmem:[%s2598_s26 + $0x178] sm:$0xff] %v306_v47  ;;  %v308_v48 = vld [vmem:[%s2593_s5 + $0xc00] sm:$0xff]  ;;  %v310_v49 = vld [vmem:[%s2593_s5 + $0xc08] sm:$0xff] }
  0x67   : > { %v312_v50 = vld [vmem:[%s2593_s5 + $0xc80] sm:$0xff]  ;;  %309 = vst [vmem:[%s2598_s26 + $0x180] sm:$0xff] %v308_v48  ;;  %311 = vst [vmem:[%s2598_s26 + $0x188] sm:$0xff] %v310_v49  ;;  %v314_v51 = vld [vmem:[%s2593_s5 + $0xc88] sm:$0xff] }
  0x68   : > { %313 = vst [vmem:[%s2598_s26 + $0x190] sm:$0xff] %v312_v50  ;;  %v316_v52 = vld [vmem:[%s2593_s5 + $0xd00] sm:$0xff]  ;;  %v318_v53 = vld [vmem:[%s2593_s5 + $0xd08] sm:$0xff]  ;;  %315 = vst [vmem:[%s2598_s26 + $0x198] sm:$0xff] %v314_v51 }
  0x69   : > { %317 = vst [vmem:[%s2598_s26 + $0x1a0] sm:$0xff] %v316_v52  ;;  %319 = vst [vmem:[%s2598_s26 + $0x1a8] sm:$0xff] %v318_v53  ;;  %v320_v54 = vld [vmem:[%s2593_s5 + $0xd80] sm:$0xff]  ;;  %v322_v55 = vld [vmem:[%s2593_s5 + $0xd88] sm:$0xff] }
  0x6a   : > { %v324_v56 = vld [vmem:[%s2593_s5 + $0xe00] sm:$0xff]  ;;  %321 = vst [vmem:[%s2598_s26 + $0x1b0] sm:$0xff] %v320_v54  ;;  %323 = vst [vmem:[%s2598_s26 + $0x1b8] sm:$0xff] %v322_v55  ;;  %v326_v57 = vld [vmem:[%s2593_s5 + $0xe08] sm:$0xff] }
  0x6b   : > { %325 = vst [vmem:[%s2598_s26 + $0x1c0] sm:$0xff] %v324_v56  ;;  %v328_v58 = vld [vmem:[%s2593_s5 + $0xe80] sm:$0xff]  ;;  %v330_v59 = vld [vmem:[%s2593_s5 + $0xe88] sm:$0xff]  ;;  %327 = vst [vmem:[%s2598_s26 + $0x1c8] sm:$0xff] %v326_v57 }
  0x6c   : > { %329 = vst [vmem:[%s2598_s26 + $0x1d0] sm:$0xff] %v328_v58  ;;  %331 = vst [vmem:[%s2598_s26 + $0x1d8] sm:$0xff] %v330_v59  ;;  %v332_v60 = vld [vmem:[%s2593_s5 + $0xf00] sm:$0xff]  ;;  %v334_v61 = vld [vmem:[%s2593_s5 + $0xf08] sm:$0xff] }
  0x6d   : > { %v336_v62 = vld [vmem:[%s2593_s5 + $0xf80] sm:$0xff]  ;;  %333 = vst [vmem:[%s2598_s26 + $0x1e0] sm:$0xff] %v332_v60  ;;  %335 = vst [vmem:[%s2598_s26 + $0x1e8] sm:$0xff] %v334_v61  ;;  %v338_v63 = vld [vmem:[%s2593_s5 + $0xf88] sm:$0xff] }
  0x6e   : > { %337 = vst [vmem:[%s2598_s26 + $0x1f0] sm:$0xff] %v336_v62  ;;  %v340_v0 = vld [vmem:[%s2593_s5 + $0x1000] sm:$0xff]  ;;  %v342_v1 = vld [vmem:[%s2593_s5 + $0x1008] sm:$0xff]  ;;  %339 = vst [vmem:[%s2598_s26 + $0x1f8] sm:$0xff] %v338_v63 }
  0x6f   : > { %341 = vst [vmem:[%s2598_s26 + $0x200] sm:$0xff] %v340_v0  ;;  %343 = vst [vmem:[%s2598_s26 + $0x208] sm:$0xff] %v342_v1  ;;  %v344_v2 = vld [vmem:[%s2593_s5 + $0x1080] sm:$0xff]  ;;  %v346_v3 = vld [vmem:[%s2593_s5 + $0x1088] sm:$0xff] }
  0x70   : > { %v348_v4 = vld [vmem:[%s2593_s5 + $0x1100] sm:$0xff]  ;;  %345 = vst [vmem:[%s2598_s26 + $0x210] sm:$0xff] %v344_v2  ;;  %347 = vst [vmem:[%s2598_s26 + $0x218] sm:$0xff] %v346_v3  ;;  %v350_v5 = vld [vmem:[%s2593_s5 + $0x1108] sm:$0xff] }
  0x71   : > { %349 = vst [vmem:[%s2598_s26 + $0x220] sm:$0xff] %v348_v4  ;;  %v352_v6 = vld [vmem:[%s2593_s5 + $0x1180] sm:$0xff]  ;;  %v354_v7 = vld [vmem:[%s2593_s5 + $0x1188] sm:$0xff]  ;;  %351 = vst [vmem:[%s2598_s26 + $0x228] sm:$0xff] %v350_v5 }
  0x72   : > { %353 = vst [vmem:[%s2598_s26 + $0x230] sm:$0xff] %v352_v6  ;;  %355 = vst [vmem:[%s2598_s26 + $0x238] sm:$0xff] %v354_v7  ;;  %v356_v8 = vld [vmem:[%s2593_s5 + $0x1200] sm:$0xff]  ;;  %v358_v9 = vld [vmem:[%s2593_s5 + $0x1208] sm:$0xff] }
  0x73   : > { %v360_v10 = vld [vmem:[%s2593_s5 + $0x1280] sm:$0xff]  ;;  %357 = vst [vmem:[%s2598_s26 + $0x240] sm:$0xff] %v356_v8  ;;  %359 = vst [vmem:[%s2598_s26 + $0x248] sm:$0xff] %v358_v9  ;;  %v362_v11 = vld [vmem:[%s2593_s5 + $0x1288] sm:$0xff] }
  0x74   : > { %361 = vst [vmem:[%s2598_s26 + $0x250] sm:$0xff] %v360_v10  ;;  %v364_v12 = vld [vmem:[%s2593_s5 + $0x1300] sm:$0xff]  ;;  %v366_v13 = vld [vmem:[%s2593_s5 + $0x1308] sm:$0xff]  ;;  %363 = vst [vmem:[%s2598_s26 + $0x258] sm:$0xff] %v362_v11 }
  0x75   : > { %365 = vst [vmem:[%s2598_s26 + $0x260] sm:$0xff] %v364_v12  ;;  %367 = vst [vmem:[%s2598_s26 + $0x268] sm:$0xff] %v366_v13  ;;  %v368_v14 = vld [vmem:[%s2593_s5 + $0x1380] sm:$0xff]  ;;  %v370_v15 = vld [vmem:[%s2593_s5 + $0x1388] sm:$0xff] }
  0x76   : > { %v372_v16 = vld [vmem:[%s2593_s5 + $0x1400] sm:$0xff]  ;;  %369 = vst [vmem:[%s2598_s26 + $0x270] sm:$0xff] %v368_v14  ;;  %371 = vst [vmem:[%s2598_s26 + $0x278] sm:$0xff] %v370_v15  ;;  %v374_v17 = vld [vmem:[%s2593_s5 + $0x1408] sm:$0xff] }
  0x77   : > { %373 = vst [vmem:[%s2598_s26 + $0x280] sm:$0xff] %v372_v16  ;;  %v376_v18 = vld [vmem:[%s2593_s5 + $0x1480] sm:$0xff]  ;;  %v378_v19 = vld [vmem:[%s2593_s5 + $0x1488] sm:$0xff]  ;;  %375 = vst [vmem:[%s2598_s26 + $0x288] sm:$0xff] %v374_v17 }
  0x78   : > { %377 = vst [vmem:[%s2598_s26 + $0x290] sm:$0xff] %v376_v18  ;;  %379 = vst [vmem:[%s2598_s26 + $0x298] sm:$0xff] %v378_v19  ;;  %v380_v20 = vld [vmem:[%s2593_s5 + $0x1500] sm:$0xff]  ;;  %v382_v21 = vld [vmem:[%s2593_s5 + $0x1508] sm:$0xff] }
  0x79   : > { %v384_v22 = vld [vmem:[%s2593_s5 + $0x1580] sm:$0xff]  ;;  %381 = vst [vmem:[%s2598_s26 + $0x2a0] sm:$0xff] %v380_v20  ;;  %383 = vst [vmem:[%s2598_s26 + $0x2a8] sm:$0xff] %v382_v21  ;;  %v386_v23 = vld [vmem:[%s2593_s5 + $0x1588] sm:$0xff] }
  0x7a   : > { %385 = vst [vmem:[%s2598_s26 + $0x2b0] sm:$0xff] %v384_v22  ;;  %v388_v24 = vld [vmem:[%s2593_s5 + $0x1600] sm:$0xff]  ;;  %v390_v25 = vld [vmem:[%s2593_s5 + $0x1608] sm:$0xff]  ;;  %387 = vst [vmem:[%s2598_s26 + $0x2b8] sm:$0xff] %v386_v23 }
  0x7b   : > { %389 = vst [vmem:[%s2598_s26 + $0x2c0] sm:$0xff] %v388_v24  ;;  %391 = vst [vmem:[%s2598_s26 + $0x2c8] sm:$0xff] %v390_v25  ;;  %v392_v26 = vld [vmem:[%s2593_s5 + $0x1680] sm:$0xff]  ;;  %v394_v27 = vld [vmem:[%s2593_s5 + $0x1688] sm:$0xff] }
  0x7c   : > { %v396_v28 = vld [vmem:[%s2593_s5 + $0x1700] sm:$0xff]  ;;  %393 = vst [vmem:[%s2598_s26 + $0x2d0] sm:$0xff] %v392_v26  ;;  %395 = vst [vmem:[%s2598_s26 + $0x2d8] sm:$0xff] %v394_v27  ;;  %v398_v29 = vld [vmem:[%s2593_s5 + $0x1708] sm:$0xff] }
  0x7d   : > { %397 = vst [vmem:[%s2598_s26 + $0x2e0] sm:$0xff] %v396_v28  ;;  %v400_v30 = vld [vmem:[%s2593_s5 + $0x1780] sm:$0xff]  ;;  %v402_v31 = vld [vmem:[%s2593_s5 + $0x1788] sm:$0xff]  ;;  %399 = vst [vmem:[%s2598_s26 + $0x2e8] sm:$0xff] %v398_v29 }
  0x7e   : > { %401 = vst [vmem:[%s2598_s26 + $0x2f0] sm:$0xff] %v400_v30  ;;  %403 = vst [vmem:[%s2598_s26 + $0x2f8] sm:$0xff] %v402_v31  ;;  %v404_v32 = vld [vmem:[%s2593_s5 + $0x1800] sm:$0xff]  ;;  %v406_v33 = vld [vmem:[%s2593_s5 + $0x1808] sm:$0xff] }
  0x7f   : > { %v408_v34 = vld [vmem:[%s2593_s5 + $0x1880] sm:$0xff]  ;;  %405 = vst [vmem:[%s2598_s26 + $0x300] sm:$0xff] %v404_v32  ;;  %407 = vst [vmem:[%s2598_s26 + $0x308] sm:$0xff] %v406_v33  ;;  %v410_v35 = vld [vmem:[%s2593_s5 + $0x1888] sm:$0xff] }
  0x80   : > { %409 = vst [vmem:[%s2598_s26 + $0x310] sm:$0xff] %v408_v34  ;;  %v412_v36 = vld [vmem:[%s2593_s5 + $0x1900] sm:$0xff]  ;;  %v414_v37 = vld [vmem:[%s2593_s5 + $0x1908] sm:$0xff]  ;;  %411 = vst [vmem:[%s2598_s26 + $0x318] sm:$0xff] %v410_v35 }
  0x81   : > { %413 = vst [vmem:[%s2598_s26 + $0x320] sm:$0xff] %v412_v36  ;;  %415 = vst [vmem:[%s2598_s26 + $0x328] sm:$0xff] %v414_v37  ;;  %v416_v38 = vld [vmem:[%s2593_s5 + $0x1980] sm:$0xff]  ;;  %v418_v39 = vld [vmem:[%s2593_s5 + $0x1988] sm:$0xff] }
  0x82   : > { %v420_v40 = vld [vmem:[%s2593_s5 + $0x1a00] sm:$0xff]  ;;  %417 = vst [vmem:[%s2598_s26 + $0x330] sm:$0xff] %v416_v38  ;;  %419 = vst [vmem:[%s2598_s26 + $0x338] sm:$0xff] %v418_v39  ;;  %v422_v41 = vld [vmem:[%s2593_s5 + $0x1a08] sm:$0xff] }
  0x83   : > { %421 = vst [vmem:[%s2598_s26 + $0x340] sm:$0xff] %v420_v40  ;;  %v424_v42 = vld [vmem:[%s2593_s5 + $0x1a80] sm:$0xff]  ;;  %v426_v43 = vld [vmem:[%s2593_s5 + $0x1a88] sm:$0xff]  ;;  %423 = vst [vmem:[%s2598_s26 + $0x348] sm:$0xff] %v422_v41 }
  0x84   : > { %425 = vst [vmem:[%s2598_s26 + $0x350] sm:$0xff] %v424_v42  ;;  %427 = vst [vmem:[%s2598_s26 + $0x358] sm:$0xff] %v426_v43  ;;  %v428_v44 = vld [vmem:[%s2593_s5 + $0x1b00] sm:$0xff]  ;;  %v430_v45 = vld [vmem:[%s2593_s5 + $0x1b08] sm:$0xff] }
  0x85   : > { %v432_v46 = vld [vmem:[%s2593_s5 + $0x1b80] sm:$0xff]  ;;  %429 = vst [vmem:[%s2598_s26 + $0x360] sm:$0xff] %v428_v44  ;;  %431 = vst [vmem:[%s2598_s26 + $0x368] sm:$0xff] %v430_v45  ;;  %v434_v47 = vld [vmem:[%s2593_s5 + $0x1b88] sm:$0xff] }
  0x86   : > { %433 = vst [vmem:[%s2598_s26 + $0x370] sm:$0xff] %v432_v46  ;;  %v436_v48 = vld [vmem:[%s2593_s5 + $0x1c00] sm:$0xff]  ;;  %v438_v49 = vld [vmem:[%s2593_s5 + $0x1c08] sm:$0xff]  ;;  %435 = vst [vmem:[%s2598_s26 + $0x378] sm:$0xff] %v434_v47 }
  0x87   : > { %437 = vst [vmem:[%s2598_s26 + $0x380] sm:$0xff] %v436_v48  ;;  %439 = vst [vmem:[%s2598_s26 + $0x388] sm:$0xff] %v438_v49  ;;  %v440_v50 = vld [vmem:[%s2593_s5 + $0x1c80] sm:$0xff]  ;;  %v442_v51 = vld [vmem:[%s2593_s5 + $0x1c88] sm:$0xff] }
  0x88   : > { %v444_v52 = vld [vmem:[%s2593_s5 + $0x1d00] sm:$0xff]  ;;  %441 = vst [vmem:[%s2598_s26 + $0x390] sm:$0xff] %v440_v50  ;;  %443 = vst [vmem:[%s2598_s26 + $0x398] sm:$0xff] %v442_v51  ;;  %v446_v53 = vld [vmem:[%s2593_s5 + $0x1d08] sm:$0xff] }
  0x89   : > { %445 = vst [vmem:[%s2598_s26 + $0x3a0] sm:$0xff] %v444_v52  ;;  %v448_v54 = vld [vmem:[%s2593_s5 + $0x1d80] sm:$0xff]  ;;  %v450_v55 = vld [vmem:[%s2593_s5 + $0x1d88] sm:$0xff]  ;;  %447 = vst [vmem:[%s2598_s26 + $0x3a8] sm:$0xff] %v446_v53 }
  0x8a   : > { %449 = vst [vmem:[%s2598_s26 + $0x3b0] sm:$0xff] %v448_v54  ;;  %451 = vst [vmem:[%s2598_s26 + $0x3b8] sm:$0xff] %v450_v55  ;;  %v452_v56 = vld [vmem:[%s2593_s5 + $0x1e00] sm:$0xff]  ;;  %v454_v57 = vld [vmem:[%s2593_s5 + $0x1e08] sm:$0xff] }
  0x8b   : > { %v456_v58 = vld [vmem:[%s2593_s5 + $0x1e80] sm:$0xff]  ;;  %453 = vst [vmem:[%s2598_s26 + $0x3c0] sm:$0xff] %v452_v56  ;;  %455 = vst [vmem:[%s2598_s26 + $0x3c8] sm:$0xff] %v454_v57  ;;  %v458_v59 = vld [vmem:[%s2593_s5 + $0x1e88] sm:$0xff] }
  0x8c   : > { %457 = vst [vmem:[%s2598_s26 + $0x3d0] sm:$0xff] %v456_v58  ;;  %v460_v60 = vld [vmem:[%s2593_s5 + $0x1f00] sm:$0xff]  ;;  %v462_v61 = vld [vmem:[%s2593_s5 + $0x1f08] sm:$0xff]  ;;  %459 = vst [vmem:[%s2598_s26 + $0x3d8] sm:$0xff] %v458_v59 }
  0x8d   : > { %461 = vst [vmem:[%s2598_s26 + $0x3e0] sm:$0xff] %v460_v60  ;;  %463 = vst [vmem:[%s2598_s26 + $0x3e8] sm:$0xff] %v462_v61  ;;  %v464_v62 = vld [vmem:[%s2593_s5 + $0x1f80] sm:$0xff]  ;;  %v466_v63 = vld [vmem:[%s2593_s5 + $0x1f88] sm:$0xff] }
  0x8e   : > { %465 = vst [vmem:[%s2598_s26 + $0x3f0] sm:$0xff] %v464_v62  ;;  %467 = vst [vmem:[%s2598_s26 + $0x3f8] sm:$0xff] %v466_v63 }
  0x8f PF: > { %s474_s4 = sand.u32 1, %s2348_s14   ;;  %s1876_s6 = sshll.u32 %s2384_s23, 6 }
  0x90   : > { %s1727_s29 = sshll.u32 %s474_s4, 2  ;;  %s2858_s12 = scalar_lea.hbm %s3131_s2, %s1876_s6 }
  0x91   : > { %s478_s19 = scalar_lea.vmem [#allocation7], %s1727_s29  ;;  %s475_s8 = scalar_lea.sflag [#allocation8], %s474_s4 }
  0x92   : > { %s486_s10 = sshll.u32 %s478_s19, 4  ;;  %s2218_s27 = scalar_lea.hbm %s2858_s12, 64  ;;  %s487_s10 = int_to_ptr.vmem [resolvable:$true] %s486_s10 }
  0x93   : > { %p2219_p3 = scmp.ne.s32.totalorder %s2858_s12, %s2218_s27  ;;  %p3167_p8 = scmp.ne.s32.totalorder %s3158_s25, 0 }
  0x94   : > { %s2222_s30 = scalar_lea.hbm %s3131_s2, 512  ;;  %p2223_p6 = scmp.lt.u32.totalorder %s2858_s12, %s3131_s2 }
  0x95   : > { %p2220_p12 = pnand %p2219_p3, %p3167_p8  ;;  %p2224_p10 = scmp.lt.u32.totalorder %s2222_s30, %s2218_s27 }
  0x96   : > { %p2226_p4 = scmp.lt.u32.totalorder %s2218_s27, %s2858_s12 }
  0x97   : > { %p2221_p0 = pneg %p2220_p12  ;;  %p2225_p13 = por %p2224_p10, %p2223_p6 }
  0x99   : > { %p2227_p5 = por %p2226_p4, %p2225_p13 }
  0x9b   : > { %p2228_p2 = pnand %p2227_p5, %p2221_p0 }
  0x9d   : > { %2231 = shalt.err (!%p2228_p2)
}
  0x9e   : > { %s2232_s4 = scalar_lea.vmem %s487_s10, 64  ;;  %s2391_s6 = smov [#allocation7]  }
  0x9f   : > { %p2233_p7 = scmp.ne.s32.totalorder %s487_s10, %s2232_s4  ;;  %s2236_s29 = sshll.u32 %s2391_s6, 4  ;;  %s2237_s29 = int_to_ptr.vmem [resolvable:$false] %s2236_s29 }
  0xa0   : > { %s2238_s11 = scalar_lea.vmem %s2237_s29, 128  ;;  %p2239_p9 = scmp.lt.s32.totalorder %s487_s10, %s2237_s29 }
  0xa1   : > { %p2234_p11 = pnand %p2233_p7, %p3167_p8  ;;  %p2240_p3 = scmp.lt.s32.totalorder %s2238_s11, %s2232_s4 }
  0xa3   : > { %p2235_p1 = pneg %p2234_p11  ;;  %p2241_p12 = por %p2240_p3, %p2239_p9 }
  0xa5   : > { %p2242_p6 = pnand %p2241_p12, %p2235_p1 }
  0xa7   : > { %2245 = shalt.err (!%p2242_p6)
}
  0xa8   : > { %1879 = dma.hbm_to_vmem [thread:$0]  (%p3167_p8), %s2858_s12, 64, %s487_s10, %s475_s8  }
  0xa9 PF: > { %p1730_p0 = scmp.ge.s32.totalorder %s2388_s24, 1  ;;  %p491_p10 = scmp.lt.s32.totalorder %s2388_s24, 65 }
  0xab   : > { %p492_p13 = pnand %p1730_p0, %p491_p10 }
  0xac   : > { %s497_s3 = sand.u32 (!%p492_p13), 1, %s2364_s18   ;;  %p3168_p4 = scmp.ne.s32.totalorder (!%p492_p13), %s3154_s7, 0 }
  0xad   : > { %495 = sbr.rel (%p492_p13) target bundleno = 583 (0x247), region = 51  ;;  %s2880_s19 = sshll.u32 (!%p492_p13), %s497_s3, 4 }
  0xae   : > { %s498_s27 = scalar_lea.sflag (!%p492_p13), [#allocation4], %s497_s3  ;;  %s501_s28 = scalar_lea.vmem (!%p492_p13), [#allocation3], %s2880_s19 }
  0xb4   : > { %2327 = dma.done.wait (%p3168_p4), %s498_s27, 256  }
  0xb5   : > { %2329 = vsyncadd (%p3168_p4), %s498_s27, 4294967040  ;;  %s507_s25 = sand.u32 1, %s2352_s15   ;;  %s2889_s12 = sand.u32 1, %s2344_s13  }
  0xb6   : > { %s1732_s10 = sshll.u32 %s507_s25, 10  ;;  %s1733_s8 = sshll.u32 %s2889_s12, 2 }
  0xb7   : > { %s2892_s17 = scalar_lea.vmem [#allocation6], %s1732_s10  ;;  %s514_s30 = scalar_lea.sflag [#allocation8], %s2889_s12 }
  0xb8   : > { %s2895_s5 = scalar_lea.vmem [#allocation7], %s1733_s8  ;;  %p3169_p8 = scmp.ne.s32.totalorder %s3161_s9, 0 }
  0xba   : > { %2331 = dma.done.wait (%p3169_p8), %s514_s30, 64  }
  0xbb   : > { %2333 = vsyncadd (%p3169_p8), %s514_s30, 4294967232  ;;  %s1734_s7 = sshll.u32 %s2889_s12, 5  ;;  %p1735_p5 = scmp.ne.s32.totalorder %s2372_s20, 0 }
  0xbc   : > { %s2902_s26 = scalar_lea.vmem [#allocation9], %s1734_s7  ;;  %v2392_v0 = vmov (!%p1735_p5), 0.0  }
  0xbd   : > { %557 = sbr.rel (%p1735_p5) target bundleno = 196 (0xc4), region = 67  ;;  %558 = vst [vmem:[#allocation2] sm:$0xff] (!%p1735_p5), %v2392_v0  ;;  %559 = vst [vmem:[#allocation2 + $0x8] sm:$0xff] (!%p1735_p5), %v2392_v0 }
  0xbe   : > { %560 = vst [vmem:[#allocation2 + $0x10] sm:$0xff] (!%p1735_p5), %v2392_v0  ;;  %561 = vst [vmem:[#allocation2 + $0x18] sm:$0xff] (!%p1735_p5), %v2392_v0 }
  0xc4 PF: > { %v1994_v1 = vld [vmem:[%s2892_s17 + $0x4] ss:$16 sps:$4 sm:$0xff]   ;;  %v1998_v3 = vld [vmem:[%s2892_s17] ss:$16 sps:$4 sm:$0xff]   ;;  %v567_v49 = vld [vmem:[%s501_s28 + $0x8] sm:$0xff]  ;;  %p1868_p2 = scmp.ne.s32.totalorder %s2372_s20, 7 }
  0xc5   : > { %v1996_v2 = vld [vmem:[%s2892_s17 + $0x204] ss:$16 sps:$4 sm:$0xff]   ;;  %1350 = vmatprep.subr.bf16.mxu0 %v1994_v1  ;;  %v1999_v4 = vld [vmem:[%s2892_s17 + $0x200] ss:$16 sps:$4 sm:$0xff]   ;;  %v1739_v52 = vcombine.high %v567_v49, %v567_v49 }
  0xc6   : > { %1391 = vmatprep.subr.bf16.mxu1 %v1996_v2  ;;  %v2000_v5 = vld [vmem:[%s2892_s17 + $0x24] ss:$16 sps:$4 sm:$0xff]   ;;  %1351 = vmatpush1.bf16.msra.mxu0 %v1998_v3  ;;  %v2004_v7 = vld [vmem:[%s2892_s17 + $0x20] ss:$16 sps:$4 sm:$0xff]  }
  0xc7   : > { %1392 = vmatpush1.bf16.msra.mxu1 %v1999_v4  ;;  %v2002_v6 = vld [vmem:[%s2892_s17 + $0x224] ss:$16 sps:$4 sm:$0xff]   ;;  %1352 = vmatprep.subr.bf16.mxu0 %v2000_v5  ;;  %v2005_v8 = vld [vmem:[%s2892_s17 + $0x220] ss:$16 sps:$4 sm:$0xff]   ;;  %v2096_v5 = vld [vmem:[%s2892_s17 + $0xc] ss:$16 sps:$4 sm:$0xff]  }
  0xc8   : > { %1393 = vmatprep.subr.bf16.mxu1 %v2002_v6  ;;  %v2006_v9 = vld [vmem:[%s2892_s17 + $0x44] ss:$16 sps:$4 sm:$0xff]   ;;  %v2010_v11 = vld [vmem:[%s2892_s17 + $0x40] ss:$16 sps:$4 sm:$0xff]   ;;  %1423 = vmatprep.mubr.bf16.mxu1 %v1739_v52  ;;  %v2099_v6 = vld [vmem:[%s2892_s17 + $0x20c] ss:$16 sps:$4 sm:$0xff]  }
  0xc9   : > { %v2008_v10 = vld [vmem:[%s2892_s17 + $0x244] ss:$16 sps:$4 sm:$0xff]   ;;  %v2011_v12 = vld [vmem:[%s2892_s17 + $0x240] ss:$16 sps:$4 sm:$0xff]  }
  0xca   : > { %1353 = vmatpush1.bf16.msra.mxu0 %v2004_v7  ;;  %v2012_v13 = vld [vmem:[%s2892_s17 + $0x64] ss:$16 sps:$4 sm:$0xff]   ;;  %v2016_v15 = vld [vmem:[%s2892_s17 + $0x60] ss:$16 sps:$4 sm:$0xff]  }
  0xcb   : > { %1394 = vmatpush1.bf16.msra.mxu1 %v2005_v8  ;;  %1354 = vmatprep.subr.bf16.mxu0 %v2006_v9  ;;  %v2014_v14 = vld [vmem:[%s2892_s17 + $0x264] ss:$16 sps:$4 sm:$0xff]   ;;  %v2017_v16 = vld [vmem:[%s2892_s17 + $0x260] ss:$16 sps:$4 sm:$0xff]   ;;  %v2980_v8 = vcombine.low %v567_v49, %v567_v49  ;;  %v2094_v9 = vld [vmem:[%s2892_s17 + $0x8] ss:$16 sps:$4 sm:$0xff]  }
  0xcc   : > { %1395 = vmatprep.subr.bf16.mxu1 %v2008_v10  ;;  %v2018_v17 = vld [vmem:[%s2892_s17 + $0x84] ss:$16 sps:$4 sm:$0xff]   ;;  %v2022_v19 = vld [vmem:[%s2892_s17 + $0x80] ss:$16 sps:$4 sm:$0xff]   ;;  %v2097_v10 = vld [vmem:[%s2892_s17 + $0x208] ss:$16 sps:$4 sm:$0xff]  }
  0xcd   : > { %v2020_v18 = vld [vmem:[%s2892_s17 + $0x284] ss:$16 sps:$4 sm:$0xff]   ;;  %v2023_v20 = vld [vmem:[%s2892_s17 + $0x280] ss:$16 sps:$4 sm:$0xff]   ;;  %v2154_v49 = vld [vmem:[%s2892_s17 + $0x148] ss:$16 sps:$4 sm:$0xff]  }
  0xce   : > { %1355 = vmatpush1.bf16.msra.mxu0 %v2010_v11  ;;  %v2024_v21 = vld [vmem:[%s2892_s17 + $0xa4] ss:$16 sps:$4 sm:$0xff]   ;;  %v2028_v23 = vld [vmem:[%s2892_s17 + $0xa0] ss:$16 sps:$4 sm:$0xff]   ;;  %v2102_v11 = vld [vmem:[%s2892_s17 + $0x2c] ss:$16 sps:$4 sm:$0xff]  }
  0xcf   : > { %1396 = vmatpush1.bf16.msra.mxu1 %v2011_v12  ;;  %1356 = vmatprep.subr.bf16.mxu0 %v2012_v13  ;;  %v2026_v22 = vld [vmem:[%s2892_s17 + $0x2a4] ss:$16 sps:$4 sm:$0xff]   ;;  %v2029_v24 = vld [vmem:[%s2892_s17 + $0x2a0] ss:$16 sps:$4 sm:$0xff]   ;;  %v2105_v12 = vld [vmem:[%s2892_s17 + $0x22c] ss:$16 sps:$4 sm:$0xff]  }
  0xd0   : > { %1397 = vmatprep.subr.bf16.mxu1 %v2014_v14  ;;  %v2030_v25 = vld [vmem:[%s2892_s17 + $0xc4] ss:$16 sps:$4 sm:$0xff]   ;;  %v2034_v27 = vld [vmem:[%s2892_s17 + $0xc0] ss:$16 sps:$4 sm:$0xff]   ;;  %v2100_v13 = vld [vmem:[%s2892_s17 + $0x28] ss:$16 sps:$4 sm:$0xff]  }
  0xd1   : > { %v2032_v26 = vld [vmem:[%s2892_s17 + $0x2c4] ss:$16 sps:$4 sm:$0xff]   ;;  %v2035_v28 = vld [vmem:[%s2892_s17 + $0x2c0] ss:$16 sps:$4 sm:$0xff]   ;;  %v2103_v14 = vld [vmem:[%s2892_s17 + $0x228] ss:$16 sps:$4 sm:$0xff]  }
  0xd2   : > { %1357 = vmatpush1.bf16.msra.mxu0 %v2016_v15  ;;  %v2036_v29 = vld [vmem:[%s2892_s17 + $0xe4] ss:$16 sps:$4 sm:$0xff]   ;;  %v2040_v31 = vld [vmem:[%s2892_s17 + $0xe0] ss:$16 sps:$4 sm:$0xff]   ;;  %v2108_v15 = vld [vmem:[%s2892_s17 + $0x4c] ss:$16 sps:$4 sm:$0xff]  }
  0xd3   : > { %1398 = vmatpush1.bf16.msra.mxu1 %v2017_v16  ;;  %1358 = vmatprep.subr.bf16.mxu0 %v2018_v17  ;;  %v2038_v30 = vld [vmem:[%s2892_s17 + $0x2e4] ss:$16 sps:$4 sm:$0xff]   ;;  %v2041_v32 = vld [vmem:[%s2892_s17 + $0x2e0] ss:$16 sps:$4 sm:$0xff]   ;;  %v2111_v16 = vld [vmem:[%s2892_s17 + $0x24c] ss:$16 sps:$4 sm:$0xff]  }
  0xd4   : > { %1399 = vmatprep.subr.bf16.mxu1 %v2020_v18  ;;  %v2042_v33 = vld [vmem:[%s2892_s17 + $0x104] ss:$16 sps:$4 sm:$0xff]   ;;  %v2046_v35 = vld [vmem:[%s2892_s17 + $0x100] ss:$16 sps:$4 sm:$0xff]   ;;  %v2106_v17 = vld [vmem:[%s2892_s17 + $0x48] ss:$16 sps:$4 sm:$0xff]  }
  0xd5   : > { %v2044_v34 = vld [vmem:[%s2892_s17 + $0x304] ss:$16 sps:$4 sm:$0xff]   ;;  %v2047_v36 = vld [vmem:[%s2892_s17 + $0x300] ss:$16 sps:$4 sm:$0xff]   ;;  %v2109_v18 = vld [vmem:[%s2892_s17 + $0x248] ss:$16 sps:$4 sm:$0xff]  }
  0xd6   : > { %1359 = vmatpush1.bf16.msra.mxu0 %v2022_v19  ;;  %v2048_v37 = vld [vmem:[%s2892_s17 + $0x124] ss:$16 sps:$4 sm:$0xff]   ;;  %v2052_v39 = vld [vmem:[%s2892_s17 + $0x120] ss:$16 sps:$4 sm:$0xff]   ;;  %v2114_v19 = vld [vmem:[%s2892_s17 + $0x6c] ss:$16 sps:$4 sm:$0xff]  }
  0xd7   : > { %1400 = vmatpush1.bf16.msra.mxu1 %v2023_v20  ;;  %1360 = vmatprep.subr.bf16.mxu0 %v2024_v21  ;;  %v2050_v38 = vld [vmem:[%s2892_s17 + $0x324] ss:$16 sps:$4 sm:$0xff]   ;;  %v2053_v40 = vld [vmem:[%s2892_s17 + $0x320] ss:$16 sps:$4 sm:$0xff]   ;;  %v2117_v20 = vld [vmem:[%s2892_s17 + $0x26c] ss:$16 sps:$4 sm:$0xff]  }
  0xd8   : > { %1401 = vmatprep.subr.bf16.mxu1 %v2026_v22  ;;  %v2054_v41 = vld [vmem:[%s2892_s17 + $0x144] ss:$16 sps:$4 sm:$0xff]   ;;  %v2058_v43 = vld [vmem:[%s2892_s17 + $0x140] ss:$16 sps:$4 sm:$0xff]   ;;  %v2112_v21 = vld [vmem:[%s2892_s17 + $0x68] ss:$16 sps:$4 sm:$0xff]  }
  0xd9   : > { %v2056_v42 = vld [vmem:[%s2892_s17 + $0x344] ss:$16 sps:$4 sm:$0xff]   ;;  %v2059_v44 = vld [vmem:[%s2892_s17 + $0x340] ss:$16 sps:$4 sm:$0xff]   ;;  %v2115_v22 = vld [vmem:[%s2892_s17 + $0x268] ss:$16 sps:$4 sm:$0xff]  }
  0xda   : > { %1361 = vmatpush1.bf16.msra.mxu0 %v2028_v23  ;;  %v2060_v45 = vld [vmem:[%s2892_s17 + $0x164] ss:$16 sps:$4 sm:$0xff]   ;;  %v2064_v50 = vld [vmem:[%s2892_s17 + $0x160] ss:$16 sps:$4 sm:$0xff]   ;;  %v2120_v23 = vld [vmem:[%s2892_s17 + $0x8c] ss:$16 sps:$4 sm:$0xff]  }
  0xdb   : > { %1402 = vmatpush1.bf16.msra.mxu1 %v2029_v24  ;;  %1362 = vmatprep.subr.bf16.mxu0 %v2030_v25  ;;  %v2062_v46 = vld [vmem:[%s2892_s17 + $0x364] ss:$16 sps:$4 sm:$0xff]   ;;  %v2065_v51 = vld [vmem:[%s2892_s17 + $0x360] ss:$16 sps:$4 sm:$0xff]   ;;  %v2123_v24 = vld [vmem:[%s2892_s17 + $0x28c] ss:$16 sps:$4 sm:$0xff]  }
  0xdc   : > { %1403 = vmatprep.subr.bf16.mxu1 %v2032_v26  ;;  %v566_v47 = vld [vmem:[%s501_s28] sm:$0xff]  ;;  %v2118_v25 = vld [vmem:[%s2892_s17 + $0x88] ss:$16 sps:$4 sm:$0xff]  }
  0xdd   : > { %v2953_v48 = vcombine.high %v566_v47, %v566_v47  ;;  %v2066_v53 = vld [vmem:[%s2892_s17 + $0x184] ss:$16 sps:$4 sm:$0xff]   ;;  %v2070_v55 = vld [vmem:[%s2892_s17 + $0x180] ss:$16 sps:$4 sm:$0xff]   ;;  %v2978_v7 = vcombine.low %v566_v47, %v566_v47  ;;  %v2121_v26 = vld [vmem:[%s2892_s17 + $0x288] ss:$16 sps:$4 sm:$0xff]  }
  0xde   : > { %1363 = vmatpush1.bf16.msra.mxu0 %v2034_v27  ;;  %v2068_v54 = vld [vmem:[%s2892_s17 + $0x384] ss:$16 sps:$4 sm:$0xff]   ;;  %v2071_v56 = vld [vmem:[%s2892_s17 + $0x380] ss:$16 sps:$4 sm:$0xff]   ;;  %v2126_v27 = vld [vmem:[%s2892_s17 + $0xac] ss:$16 sps:$4 sm:$0xff]  }
  0xdf   : > { %1404 = vmatpush1.bf16.msra.mxu1 %v2035_v28  ;;  %1364 = vmatprep.subr.bf16.mxu0 %v2036_v29  ;;  %v2072_v57 = vld [vmem:[%s2892_s17 + $0x1a4] ss:$16 sps:$4 sm:$0xff]   ;;  %v2076_v59 = vld [vmem:[%s2892_s17 + $0x1a0] ss:$16 sps:$4 sm:$0xff]   ;;  %v2129_v28 = vld [vmem:[%s2892_s17 + $0x2ac] ss:$16 sps:$4 sm:$0xff]  }
  0xe0   : > { %1405 = vmatprep.subr.bf16.mxu1 %v2038_v30  ;;  %1382 = vmatprep.mubr.bf16.mxu0 %v2953_v48  ;;  %v2074_v58 = vld [vmem:[%s2892_s17 + $0x3a4] ss:$16 sps:$4 sm:$0xff]   ;;  %v2077_v60 = vld [vmem:[%s2892_s17 + $0x3a0] ss:$16 sps:$4 sm:$0xff]   ;;  %v2124_v29 = vld [vmem:[%s2892_s17 + $0xa8] ss:$16 sps:$4 sm:$0xff]  }
  0xe1   : > { %v2078_v61 = vld [vmem:[%s2892_s17 + $0x1c4] ss:$16 sps:$4 sm:$0xff]   ;;  %v2082_v63 = vld [vmem:[%s2892_s17 + $0x1c0] ss:$16 sps:$4 sm:$0xff]   ;;  %v2127_v30 = vld [vmem:[%s2892_s17 + $0x2a8] ss:$16 sps:$4 sm:$0xff]  }
  0xe2   : > { %1365 = vmatpush1.bf16.msra.mxu0 %v2040_v31  ;;  %v2080_v62 = vld [vmem:[%s2892_s17 + $0x3c4] ss:$16 sps:$4 sm:$0xff]   ;;  %v2083_v0 = vld [vmem:[%s2892_s17 + $0x3c0] ss:$16 sps:$4 sm:$0xff]   ;;  %v2132_v31 = vld [vmem:[%s2892_s17 + $0xcc] ss:$16 sps:$4 sm:$0xff]  }
  0xe3   : > { %1406 = vmatpush1.bf16.msra.mxu1 %v2041_v32  ;;  %1366 = vmatprep.subr.bf16.mxu0 %v2042_v33  ;;  %v2084_v1 = vld [vmem:[%s2892_s17 + $0x1e4] ss:$16 sps:$4 sm:$0xff]   ;;  %v2088_v3 = vld [vmem:[%s2892_s17 + $0x1e0] ss:$16 sps:$4 sm:$0xff]   ;;  %v2135_v32 = vld [vmem:[%s2892_s17 + $0x2cc] ss:$16 sps:$4 sm:$0xff]  }
  0xe4   : > { %1407 = vmatprep.subr.bf16.mxu1 %v2044_v34  ;;  %v2086_v2 = vld [vmem:[%s2892_s17 + $0x3e4] ss:$16 sps:$4 sm:$0xff]   ;;  %v2089_v4 = vld [vmem:[%s2892_s17 + $0x3e0] ss:$16 sps:$4 sm:$0xff]   ;;  %v2130_v33 = vld [vmem:[%s2892_s17 + $0xc8] ss:$16 sps:$4 sm:$0xff]  }
  0xe5   : > { %v2133_v34 = vld [vmem:[%s2892_s17 + $0x2c8] ss:$16 sps:$4 sm:$0xff]   ;;  %v2156_v47 = vld [vmem:[%s2892_s17 + $0x14c] ss:$16 sps:$4 sm:$0xff]  }
  0xe6   : > { %1367 = vmatpush1.bf16.msra.mxu0 %v2046_v35  ;;  %v2138_v35 = vld [vmem:[%s2892_s17 + $0xec] ss:$16 sps:$4 sm:$0xff]  }
  0xe7   : > { %1408 = vmatpush1.bf16.msra.mxu1 %v2047_v36  ;;  %1368 = vmatprep.subr.bf16.mxu0 %v2048_v37  ;;  %v2141_v36 = vld [vmem:[%s2892_s17 + $0x2ec] ss:$16 sps:$4 sm:$0xff]   ;;  %v2136_v37 = vld [vmem:[%s2892_s17 + $0xe8] ss:$16 sps:$4 sm:$0xff]  }
  0xe8   : > { %1409 = vmatprep.subr.bf16.mxu1 %v2050_v38  ;;  %v2139_v38 = vld [vmem:[%s2892_s17 + $0x2e8] ss:$16 sps:$4 sm:$0xff]  }
  0xea   : > { %1369 = vmatpush1.bf16.msra.mxu0 %v2052_v39  ;;  %v2144_v39 = vld [vmem:[%s2892_s17 + $0x10c] ss:$16 sps:$4 sm:$0xff]  }
  0xeb   : > { %1410 = vmatpush1.bf16.msra.mxu1 %v2053_v40  ;;  %1370 = vmatprep.subr.bf16.mxu0 %v2054_v41  ;;  %v2147_v40 = vld [vmem:[%s2892_s17 + $0x30c] ss:$16 sps:$4 sm:$0xff]   ;;  %v2142_v41 = vld [vmem:[%s2892_s17 + $0x108] ss:$16 sps:$4 sm:$0xff]  }
  0xec   : > { %1411 = vmatprep.subr.bf16.mxu1 %v2056_v42  ;;  %v2145_v42 = vld [vmem:[%s2892_s17 + $0x308] ss:$16 sps:$4 sm:$0xff]  }
  0xee   : > { %1371 = vmatpush1.bf16.msra.mxu0 %v2058_v43  ;;  %v2150_v43 = vld [vmem:[%s2892_s17 + $0x12c] ss:$16 sps:$4 sm:$0xff]  }
  0xef   : > { %1412 = vmatpush1.bf16.msra.mxu1 %v2059_v44  ;;  %1372 = vmatprep.subr.bf16.mxu0 %v2060_v45  ;;  %v2153_v44 = vld [vmem:[%s2892_s17 + $0x32c] ss:$16 sps:$4 sm:$0xff]   ;;  %v2148_v45 = vld [vmem:[%s2892_s17 + $0x128] ss:$16 sps:$4 sm:$0xff]  }
  0xf0   : > { %1413 = vmatprep.subr.bf16.mxu1 %v2062_v46  ;;  %v2151_v46 = vld [vmem:[%s2892_s17 + $0x328] ss:$16 sps:$4 sm:$0xff]  }
  0xf2   : > { %1373 = vmatpush1.bf16.msra.mxu0 %v2064_v50  ;;  %v2157_v50 = vld [vmem:[%s2892_s17 + $0x348] ss:$16 sps:$4 sm:$0xff]  }
  0xf3   : > { %1414 = vmatpush1.bf16.msra.mxu1 %v2065_v51  ;;  %1374 = vmatprep.subr.bf16.mxu0 %v2066_v53  ;;  %v2162_v51 = vld [vmem:[%s2892_s17 + $0x16c] ss:$16 sps:$4 sm:$0xff]   ;;  %v2160_v53 = vld [vmem:[%s2892_s17 + $0x168] ss:$16 sps:$4 sm:$0xff]  }
  0xf4   : > { %1415 = vmatprep.subr.bf16.mxu1 %v2068_v54  ;;  %v2163_v54 = vld [vmem:[%s2892_s17 + $0x368] ss:$16 sps:$4 sm:$0xff]  }
  0xf6   : > { %1375 = vmatpush1.bf16.msra.mxu0 %v2070_v55  ;;  %v2168_v55 = vld [vmem:[%s2892_s17 + $0x18c] ss:$16 sps:$4 sm:$0xff]  }
  0xf7   : > { %1416 = vmatpush1.bf16.msra.mxu1 %v2071_v56  ;;  %1376 = vmatprep.subr.bf16.mxu0 %v2072_v57  ;;  %v2171_v56 = vld [vmem:[%s2892_s17 + $0x38c] ss:$16 sps:$4 sm:$0xff]   ;;  %v2166_v57 = vld [vmem:[%s2892_s17 + $0x188] ss:$16 sps:$4 sm:$0xff]  }
  0xf8   : > { %1417 = vmatprep.subr.bf16.mxu1 %v2074_v58  ;;  %v2169_v58 = vld [vmem:[%s2892_s17 + $0x388] ss:$16 sps:$4 sm:$0xff]  }
  0xfa   : > { %1377 = vmatpush1.bf16.msra.mxu0 %v2076_v59  ;;  %v2174_v59 = vld [vmem:[%s2892_s17 + $0x1ac] ss:$16 sps:$4 sm:$0xff]  }
  0xfb   : > { %1418 = vmatpush1.bf16.msra.mxu1 %v2077_v60  ;;  %1378 = vmatprep.subr.bf16.mxu0 %v2078_v61  ;;  %v2177_v60 = vld [vmem:[%s2892_s17 + $0x3ac] ss:$16 sps:$4 sm:$0xff]   ;;  %v2172_v61 = vld [vmem:[%s2892_s17 + $0x1a8] ss:$16 sps:$4 sm:$0xff]  }
  0xfc   : > { %1419 = vmatprep.subr.bf16.mxu1 %v2080_v62  ;;  %v2175_v62 = vld [vmem:[%s2892_s17 + $0x3a8] ss:$16 sps:$4 sm:$0xff]  }
  0xfe   : > { %1379 = vmatpush1.bf16.msra.mxu0 %v2082_v63  ;;  %v2180_v63 = vld [vmem:[%s2892_s17 + $0x1cc] ss:$16 sps:$4 sm:$0xff]  }
  0xff   : > { %1420 = vmatpush1.bf16.msra.mxu1 %v2083_v0  ;;  %1380 = vmatprep.subr.bf16.mxu0 %v2084_v1  ;;  %v2183_v0 = vld [vmem:[%s2892_s17 + $0x3cc] ss:$16 sps:$4 sm:$0xff]   ;;  %v2178_v1 = vld [vmem:[%s2892_s17 + $0x1c8] ss:$16 sps:$4 sm:$0xff]  }
 0x100   : > { %1421 = vmatprep.subr.bf16.mxu1 %v2086_v2  ;;  %v2181_v2 = vld [vmem:[%s2892_s17 + $0x3c8] ss:$16 sps:$4 sm:$0xff]  }
 0x102   : > { %1381 = vmatpush1.bf16.msra.mxu0 %v2088_v3  ;;  %v2186_v3 = vld [vmem:[%s2892_s17 + $0x1ec] ss:$16 sps:$4 sm:$0xff]  }
 0x103   : > { %1422 = vmatpush1.bf16.msra.mxu1 %v2089_v4  ;;  %1432 = vmatprep.subr.bf16.mxu0 %v2096_v5  ;;  %v2189_v4 = vld [vmem:[%s2892_s17 + $0x3ec] ss:$16 sps:$4 sm:$0xff]   ;;  %v2184_v5 = vld [vmem:[%s2892_s17 + $0x1e8] ss:$16 sps:$4 sm:$0xff]  }
 0x104   : > { %1473 = vmatprep.subr.bf16.mxu1 %v2099_v6  ;;  %v2187_v6 = vld [vmem:[%s2892_s17 + $0x3e8] ss:$16 sps:$4 sm:$0xff]  }
 0x105   : > { %1383 = vmatmul.mubr.bf16.vlgmr.msra.gmra.mrb[0].mxu0 %v2978_v7 }
 0x106   : > { %1424 = vmatmul.mubr.bf16.vlgmr.msra.gmra.mrb[0].mxu1 %v2980_v8  ;;  %1433 = vmatpush1.bf16.msra.mxu0 %v2094_v9 }
 0x107   : > { %1474 = vmatpush1.bf16.msra.mxu1 %v2097_v10  ;;  %1434 = vmatprep.subr.bf16.mxu0 %v2102_v11  ;;  %v562_v10 = vld [vmem:[#allocation2] sm:$0xff] }
 0x108   : > { %1475 = vmatprep.subr.bf16.mxu1 %v2105_v12  ;;  %1464 = vmatprep.mubr.bf16.mxu0 %v2953_v48  ;;  %v2159_v48 = vld [vmem:[%s2892_s17 + $0x34c] ss:$16 sps:$4 sm:$0xff]  }
 0x109   : > { %1505 = vmatprep.mubr.bf16.mxu1 %v1739_v52  ;;  %v2165_v52 = vld [vmem:[%s2892_s17 + $0x36c] ss:$16 sps:$4 sm:$0xff]  }
 0x10a   : > { %1435 = vmatpush1.bf16.msra.mxu0 %v2100_v13 }
 0x10b   : > { %1476 = vmatpush1.bf16.msra.mxu1 %v2103_v14  ;;  %1436 = vmatprep.subr.bf16.mxu0 %v2108_v15  ;;  %v563_v14 = vld [vmem:[#allocation2 + $0x8] sm:$0xff] }
 0x10c   : > { %1477 = vmatprep.subr.bf16.mxu1 %v2111_v16 }
 0x10e   : > { %1437 = vmatpush1.bf16.msra.mxu0 %v2106_v17 }
 0x10f   : > { %1478 = vmatpush1.bf16.msra.mxu1 %v2109_v18  ;;  %1438 = vmatprep.subr.bf16.mxu0 %v2114_v19 }
 0x110   : > { %1479 = vmatprep.subr.bf16.mxu1 %v2117_v20 }
 0x112   : > { %1439 = vmatpush1.bf16.msra.mxu0 %v2112_v21 }
 0x113   : > { %1480 = vmatpush1.bf16.msra.mxu1 %v2115_v22  ;;  %1440 = vmatprep.subr.bf16.mxu0 %v2120_v23 }
 0x114   : > { %1481 = vmatprep.subr.bf16.mxu1 %v2123_v24 }
 0x116   : > { %1441 = vmatpush1.bf16.msra.mxu0 %v2118_v25 }
 0x117   : > { %1482 = vmatpush1.bf16.msra.mxu1 %v2121_v26  ;;  %1442 = vmatprep.subr.bf16.mxu0 %v2126_v27  ;;  %v565_v26 = vld [vmem:[#allocation2 + $0x18] sm:$0xff] }
 0x118   : > { %1483 = vmatprep.subr.bf16.mxu1 %v2129_v28 }
 0x11a   : > { %1443 = vmatpush1.bf16.msra.mxu0 %v2124_v29 }
 0x11b   : > { %1484 = vmatpush1.bf16.msra.mxu1 %v2127_v30  ;;  %1444 = vmatprep.subr.bf16.mxu0 %v2132_v31 }
 0x11c   : > { %1485 = vmatprep.subr.bf16.mxu1 %v2135_v32 }
 0x11e   : > { %1445 = vmatpush1.bf16.msra.mxu0 %v2130_v33 }
 0x11f   : > { %1486 = vmatpush1.bf16.msra.mxu1 %v2133_v34  ;;  %1446 = vmatprep.subr.bf16.mxu0 %v2138_v35  ;;  %v1532_v35 = vlaneseq (!%p1868_p2) }
 0x120   : > { %1487 = vmatprep.subr.bf16.mxu1 %v2141_v36 }
 0x121   : > { %v1533_v36 = vshrl.u32 (!%p1868_p2), %v1532_v35, 7 }
 0x122   : > { %1447 = vmatpush1.bf16.msra.mxu0 %v2136_v37  ;;  %v1530_v37 = vld [vmem:[%s2895_s5] sm:$0xf] (!%p1868_p2) }
 0x123   : > { %1488 = vmatpush1.bf16.msra.mxu1 %v2139_v38  ;;  %1448 = vmatprep.subr.bf16.mxu0 %v2144_v39  ;;  %v1534_v39 = vsub.s32 (!%p1868_p2), 0, %v1533_v36 }
 0x124   : > { %1489 = vmatprep.subr.bf16.mxu1 %v2147_v40  ;;  %v1538_v40 = vsub.s32 (!%p1868_p2), 1, %v1533_v36 }
 0x126   : > { %1449 = vmatpush1.bf16.msra.mxu0 %v2142_v41  ;;  %v1542_v41 = vsub.s32 (!%p1868_p2), 2, %v1533_v36 }
 0x127   : > { %1490 = vmatpush1.bf16.msra.mxu1 %v2145_v42  ;;  %1450 = vmatprep.subr.bf16.mxu0 %v2150_v43  ;;  %v1546_v42 = vsub.s32 (!%p1868_p2), 3, %v1533_v36 }
 0x128   : > { %1491 = vmatprep.subr.bf16.mxu1 %v2153_v44 }
 0x12a   : > { %1451 = vmatpush1.bf16.msra.mxu0 %v2148_v45 }
 0x12b   : > { %1492 = vmatpush1.bf16.msra.mxu1 %v2151_v46  ;;  %1452 = vmatprep.subr.bf16.mxu0 %v2156_v47  ;;  %v1535_v46 = vrot.slane (!%p1868_p2), %v1530_v37, %v1534_v39  ;;  %v1539_v47 = vrot.slane (!%p1868_p2), %v1530_v37, %v1538_v40 }
 0x12c   : > { %1493 = vmatprep.subr.bf16.mxu1 %v2159_v48  ;;  %v1543_v48 = vrot.slane (!%p1868_p2), %v1530_v37, %v1542_v41 }
 0x12e   : > { %1453 = vmatpush1.bf16.msra.mxu0 %v2154_v49  ;;  %v1547_v49 = vrot.slane (!%p1868_p2), %v1530_v37, %v1546_v42 }
 0x12f   : > { %1494 = vmatpush1.bf16.msra.mxu1 %v2157_v50  ;;  %1454 = vmatprep.subr.bf16.mxu0 %v2162_v51 }
 0x130   : > { %1495 = vmatprep.subr.bf16.mxu1 %v2165_v52 }
 0x132   : > { %1455 = vmatpush1.bf16.msra.mxu0 %v2160_v53 }
 0x133   : > { %1496 = vmatpush1.bf16.msra.mxu1 %v2163_v54  ;;  %1456 = vmatprep.subr.bf16.mxu0 %v2168_v55 }
 0x134   : > { %1497 = vmatprep.subr.bf16.mxu1 %v2171_v56 }
 0x136   : > { %1457 = vmatpush1.bf16.msra.mxu0 %v2166_v57 }
 0x137   : > { %1498 = vmatpush1.bf16.msra.mxu1 %v2169_v58  ;;  %1458 = vmatprep.subr.bf16.mxu0 %v2174_v59 }
 0x138   : > { %1499 = vmatprep.subr.bf16.mxu1 %v2177_v60 }
 0x13a   : > { %1459 = vmatpush1.bf16.msra.mxu0 %v2172_v61 }
 0x13b   : > { %1500 = vmatpush1.bf16.msra.mxu1 %v2175_v62  ;;  %1460 = vmatprep.subr.bf16.mxu0 %v2180_v63 }
 0x13c   : > { %1501 = vmatprep.subr.bf16.mxu1 %v2183_v0 }
 0x13e   : > { %1461 = vmatpush1.bf16.msra.mxu0 %v2178_v1 }
 0x13f   : > { %1502 = vmatpush1.bf16.msra.mxu1 %v2181_v2  ;;  %1462 = vmatprep.subr.bf16.mxu0 %v2186_v3 }
 0x140   : > { %1503 = vmatprep.subr.bf16.mxu1 %v2189_v4 }
 0x142   : > { %1463 = vmatpush1.bf16.msra.mxu0 %v2184_v5 }
 0x143   : > { %1504 = vmatpush1.bf16.msra.mxu1 %v2187_v6 }
 0x145   : > { %1465 = vmatmul.mubr.bf16.vlgmr.msra.gmra.mrb[4].mxu0 %v2978_v7  ;;  %v564_v7 = vld [vmem:[#allocation2 + $0x10] sm:$0xff] }
 0x146   : > { %1506 = vmatmul.mubr.bf16.vlgmr.msra.gmra.mrb[4].mxu1 %v2980_v8 }
 0x1d8   : > { %v1384_v9 = vpop.f32.mrb[0].mxu0 }
 0x1d9   : > { %v1425_v11 = vpop.f32.mrb[0].mxu1  ;;  %v1386_v13 = vpop.f32.mrb[1].mxu0 }
 0x1da   : > { %v1426_v12 = vadd.f32 %v1425_v11, %v1384_v9  ;;  %v1427_v15 = vpop.f32.mrb[1].mxu1  ;;  %v1388_v17 = vpop.f32.mrb[2].mxu0 }
 0x1db   : > { %v1428_v16 = vadd.f32 %v1427_v15, %v1386_v13  ;;  %v1429_v18 = vpop.f32.mrb[2].mxu1  ;;  %v1389_v20 = vpop.f32.mrb[3].mxu0 }
 0x1dc   : > { %v1514_v19 = vadd.f32 %v1426_v12, %v562_v10  ;;  %v1430_v21 = vpop.f32.mrb[3].mxu1 }
 0x1dd   : > { %v1515_v22 = vadd.f32 %v1428_v16, %v563_v14 }
 0x1de   : > { %1518 = vst [vmem:[#allocation2] sm:$0xff] %v1514_v19 }
 0x1df   : > { %1519 = vst [vmem:[#allocation2 + $0x8] sm:$0xff] %v1515_v22 }
 0x1e5   : > { %v1526_v38 = vld [vmem:[#allocation2] sm:$0xff] (!%p1868_p2) }
 0x1e6   : > { %v1527_v43 = vld [vmem:[#allocation2 + $0x8] sm:$0xff] (!%p1868_p2)  ;;  %v1552_v50 = vadd.f32 (!%p1868_p2), %v1535_v46, %v1526_v38 }
 0x1e7   : > { %v1553_v51 = vadd.f32 (!%p1868_p2), %v1539_v47, %v1527_v43 }
 0x1e8   : > { %v1556_v54 = vmax.f32 (!%p1868_p2), %v1552_v50, 0.0 }
 0x1e9   : > { %v1557_v55 = vmax.f32 (!%p1868_p2), %v1553_v51, 0.0 }
 0x1ea   : > { %1560 = vst [vmem:[%s2902_s26] sm:$0xff] (!%p1868_p2), %v1556_v54 }
 0x1eb   : > { %1561 = vst [vmem:[%s2902_s26 + $0x8] sm:$0xff] (!%p1868_p2), %v1557_v55 }
 0x218   : > { %v1466_v23 = vpop.f32.mrb[4].mxu0 }
 0x219   : > { %v1507_v24 = vpop.f32.mrb[4].mxu1  ;;  %v1468_v25 = vpop.f32.mrb[5].mxu0  ;;  %1525 = sbr.rel (%p1868_p2) target bundleno = 556 (0x22c), region = 71 }
 0x21a   : > { %v1508_v8 = vadd.f32 %v1507_v24, %v1466_v23  ;;  %v1509_v27 = vpop.f32.mrb[5].mxu1  ;;  %v1470_v29 = vpop.f32.mrb[6].mxu0 }
 0x21b   : > { %v1510_v28 = vadd.f32 %v1509_v27, %v1468_v25  ;;  %v1511_v30 = vpop.f32.mrb[6].mxu1  ;;  %v1471_v32 = vpop.f32.mrb[7].mxu0 }
 0x21c   : > { %v1516_v31 = vadd.f32 %v1508_v8, %v564_v7  ;;  %v1512_v33 = vpop.f32.mrb[7].mxu1 }
 0x21d   : > { %v1517_v34 = vadd.f32 %v1510_v28, %v565_v26 }
 0x21e   : > { %1520 = vst [vmem:[#allocation2 + $0x10] sm:$0xff] %v1516_v31 }
 0x21f   : > { %1521 = vst [vmem:[#allocation2 + $0x18] sm:$0xff] %v1517_v34 }
 0x225   : > { %v1528_v44 = vld [vmem:[#allocation2 + $0x10] sm:$0xff] }
 0x226   : > { %v1529_v45 = vld [vmem:[#allocation2 + $0x18] sm:$0xff]  ;;  %v1554_v52 = vadd.f32 %v1543_v48, %v1528_v44 }
 0x227   : > { %v1555_v53 = vadd.f32 %v1547_v49, %v1529_v45 }
 0x228   : > { %v1558_v56 = vmax.f32 %v1554_v52, 0.0 }
 0x229   : > { %v1559_v57 = vmax.f32 %v1555_v53, 0.0 }
 0x22a   : > { %1562 = vst [vmem:[%s2902_s26 + $0x10] sm:$0xff] %v1558_v56 }
 0x22b   : > { %1563 = vst [vmem:[%s2902_s26 + $0x18] sm:$0xff] %v1559_v57 }
 0x22c PF: > { %s3170_s15 = sld [smem:[#allocation20_spill]]  ;;  %s1877_s20 = sshll.u32 %s2376_s21, 9 }
 0x22d   : > { %s3171_s6 = sld [smem:[#allocation22_spill]]  ;;  %s1581_s11 = sshll.u32 %s2902_s26, 4  ;;  %s1582_s11 = int_to_ptr.vmem [resolvable:$true] %s1581_s11 }
 0x22e   : > { %s1565_s3 = scalar_lea.sflag [#allocation5], %s2889_s12  ;;  %s2246_s19 = scalar_lea.vmem %s1582_s11, 512 }
 0x22f   : > { %p2247_p7 = scmp.ne.s32.totalorder %s1582_s11, %s2246_s19  ;;  %s2393_s27 = smov [#allocation9]  }
 0x230   : > { %s2250_s28 = sshll.u32 %s2393_s27, 4  ;;  %s2251_s28 = int_to_ptr.vmem [resolvable:$false] %s2250_s28 }
 0x231   : > { %s2252_s25 = scalar_lea.vmem %s2251_s28, 1024  ;;  %p2253_p3 = scmp.lt.s32.totalorder %s1582_s11, %s2251_s28 }
 0x232   : > { %p3172_p11 = scmp.ne.s32.totalorder %s3170_s15, 0  ;;  %p2254_p12 = scmp.lt.s32.totalorder %s2252_s25, %s2246_s19 }
 0x233   : > { %s3059_s29 = scalar_lea.hbm %s3171_s6, %s1877_s20 }
 0x234   : > { %p2248_p1 = pnand %p2247_p7, %p3172_p11  ;;  %p2255_p6 = por %p2254_p12, %p2253_p3 }
 0x236   : > { %p2249_p9 = pneg %p2248_p1 }
 0x238   : > { %p2256_p0 = pnand %p2255_p6, %p2249_p9 }
 0x23a   : > { %2259 = shalt.err (!%p2256_p0)
}
 0x23b   : > { %s2260_s21 = scalar_lea.hbm %s3059_s29, 512  ;;  %s2264_s8 = scalar_lea.hbm %s3171_s6, 4096 }
 0x23c   : > { %p2261_p10 = scmp.ne.s32.totalorder %s3059_s29, %s2260_s21  ;;  %p2265_p8 = scmp.lt.u32.totalorder %s3059_s29, %s3171_s6 }
 0x23d   : > { %p2266_p5 = scmp.lt.u32.totalorder %s2264_s8, %s2260_s21  ;;  %p2268_p7 = scmp.lt.u32.totalorder %s2260_s21, %s3059_s29 }
 0x23e   : > { %p2262_p13 = pnand %p2261_p10, %p3172_p11 }
 0x23f   : > { %p2267_p2 = por %p2266_p5, %p2265_p8 }
 0x240   : > { %p2263_p4 = pneg %p2262_p13 }
 0x241   : > { %p2269_p1 = por %p2268_p7, %p2267_p2 }
 0x243   : > { %p2270_p9 = pnand %p2269_p1, %p2263_p4 }
 0x245   : > { %2273 = shalt.err (!%p2270_p9)
}
 0x246   : > { %1882 = dma.vmem_to_hbm [thread:$0]  (%p3172_p11), %s1582_s11, 512, %s3059_s29, %s1565_s3  }
 0x247 PF: > { %s3173_s5 = sld [smem:[#allocation13_spill]]  ;;  %s3174_s7 = sld [smem:[#allocation21_spill]] }
 0x248   : > { %p1888_p3 = scmp.ge.s32.totalorder %s2388_s24, 2 }
 0x24d   : > { %s1593_s26 = sand.u32 1, %s3173_s5   ;;  %p3175_p12 = scmp.ne.s32.totalorder %s3174_s7, 0 }
 0x24e   : > { %s1594_s20 = scalar_lea.sflag [#allocation5], %s1593_s26 }
 0x24f   : > { %p1885_p6 = pnand %p1888_p3, %p3175_p12 }
 0x251   : > { %2335 = dma.done.wait (!%p1885_p6), %s1594_s20, 512  }
 0x252   : > { %2337 = vsyncadd (!%p1885_p6), %s1594_s20, 4294966784  ;;  %s22_s24 = sadd.s32 1, %s2388_s24   ;;  %s3177_s15 = sld [smem:[#allocation19_spill]] }
 0x253   : > { %p3085_p0 = scmp.ge.s32.totalorder %s22_s24, 66   ;;  %s3178_s4 = sld [smem:[#allocation18_spill]] }
 0x254   : > { %s3179_s29 = sld [smem:[#allocation14_spill]]  ;;  %s3180_s19 = sld [smem:[#allocation17_spill]] }
 0x255   : > { %s3181_s11 = sld [smem:[#allocation15_spill]]  ;;  %s3182_s3 = sld [smem:[#allocation16_spill]] }
 0x256   : > { %s3183_s12 = smov %s2344_s13  ;;  %s3184_s13 = smov %s2348_s14 }
 0x257   : > { %s3188_s17 = smov %s2364_s18  ;;  %s3190_s20 = smov %s2380_s22 }
 0x258   : > { %s3185_s14 = smov %s3177_s15  ;;  %s3186_s15 = smov %s2356_s16 }
 0x259   : > { %s3187_s16 = smov %s3178_s4  ;;  %s3191_s21 = smov %s2384_s23 }
 0x25a   : > { %s3189_s18 = smov %s3179_s29  ;;  %21 = sbr.rel (!%p3085_p0) target bundleno = 14 (0xe), region = 129 }
 0x25b   : > { %s3192_s22 = smov %s3181_s11  ;;  %s3193_s23 = smov %s3182_s3 }
 0x261   :  { %1599 = vsyncpa [#allocation4], 1 }
 0x262   :  { %1601 = vsyncpa [#allocation4 + $0x1], 1 }
 0x263   :  { %1602 = vsyncpa [#allocation8], 1 }
 0x264   :  { %1604 = vsyncpa [#allocation8 + $0x1], 1 }
 0x265   :  { %1605 = vsyncpa [#allocation5], 1 }
 0x266   :  { %1607 = vsyncpa [#allocation5 + $0x1], 1 }

// kernel: _lambda_.15
= control target key start
LH: loop header
LB: loop body
LE: loop exit
PB: predicated region body
PF: predicated region fallthrough
CT: control target
= control target key end

     0   :  { %8 = vsyncpa [#allocation4], 0  ;;  %s1321_s0 = inlined_call_operand.vmem [shape: bf16[8,4096], index: 0, kind: input, shape index: {}]   ;;  %s1322_s1 = inlined_call_operand.hbm [shape: bf16[4096,128], index: 1, kind: input, shape index: {}]   ;;  %s1323_s2 = inlined_call_operand.hbm [shape: f32[1,128], index: 2, kind: input, shape index: {}]   ;;  %s1324_s3 = inlined_call_operand.vmem [shape: f32[8,128], index: 3, kind: output, shape index: {}]  }
   0x1   :  { %10 = vsyncpa [#allocation4 + $0x1], 0 }
   0x2   :  { %11 = vsyncpa [#allocation6], 0  ;;  %s1109_s12 = smov 0   ;;  %s1111_s13 = smov 0  }
   0x3   :  { %s1113_s14 = smov 0   ;;  %s1115_s15 = smov 0  }
   0x4   :  { %s1117_s16 = smov 0   ;;  %s1119_s17 = smov 0  }
   0x5 LB: > { %s766_s18 = sadd.s32 4294967295, %s1082_s17   ;;  %s73_s19 = sadd.s32 1, %s1070_s14  ;;  %s1082_s17 = sphi %s1119_s17, %s17_s17   ;;  %s1078_s16 = sphi %s1117_s16, %s1345_s16   ;;  %s1074_s15 = sphi %s1115_s15, %s1344_s15   ;;  %s1070_s14 = sphi %s1113_s14, %s1343_s14   ;;  %s1066_s13 = sphi %s1111_s13, %s1342_s13   ;;  %s1062_s12 = sphi %s1109_s12, %s1341_s12  }
   0x6   : > { %p80_p0 = scmp.ne.s32.totalorder %s1070_s14, %s1066_s13  ;;  %p81_p1 = scmp.eq.s32.totalorder %s1082_s17, 0 }
   0x7   : > { %p86_p2 = scmp.ne.s32.totalorder %s1066_s13, %s1062_s12  ;;  %p1143_p3 = scmp.eq.s32.totalorder %s766_s18, 0 }
   0x8   : > { %p82_p4 = por %p81_p1, %p80_p0  ;;  %p767_p5 = scmp.ge.s32.totalorder %s1082_s17, 1 }
   0x9   : > { %s1330_s20 = scalar_select %p1143_p3, 1, 0 }
   0xa   : > { %p1150_p6 = por %p1143_p3, %p86_p2  ;;  %p151_p7 = scmp.lt.s32.totalorder %s1082_s17, 9 }
   0xb   : > { %s1084_s23 = smov [#allocation5]   ;;  %p880_p10 = scmp.lt.s32.totalorder %s1082_s17, 8 }
   0xc   : > { %s1331_s21 = scalar_select %p1150_p6, 1, 0 }
   0xd   : > { %p1155_p8 = pnand %p767_p5, %p151_p7  ;;  %s166_s24 = sshll.u32 %s1084_s23, 4  ;;  %s167_s24 = int_to_ptr.vmem [resolvable:$true] %s166_s24 }
   0xe   : > { %s190_s25 = sand.u32 1, %s1070_s14   ;;  %p1169_p12 = pnand %p880_p10, %p82_p4 }
   0xf   : > { %s1332_s22 = scalar_select %p1155_p8, 1, 0 }
  0x10   : > { %p871_p9 = pneg %p1155_p8  ;;  %s970_s30 = scalar_lea.hbm %s1323_s2, 16 }
  0x11   : > { %s1334_s27 = scalar_select %p1169_p12, 1, 0 }
  0x12   : > { %p1165_p11 = pnand %p871_p9, %p1143_p3  ;;  %p971_p13 = scmp.ne.s32.totalorder %s1323_s2, %s970_s30 }
  0x13   : > { %p977_p5 = scmp.lt.u32.totalorder %s970_s30, %s1323_s2 }
  0x14   : > { %p972_p0 = pneg %p1165_p11 }
  0x16   : > { %p973_p1 = pnand %p972_p0, %p971_p13 }
  0x18   : > { %p974_p2 = pneg %p973_p1 }
  0x1a   : > { %p979_p4 = pnand %p977_p5, %p974_p2 }
  0x1c   : > { %982 = shalt.err (!%p979_p4)
}
  0x1d   : > { %s983_s8 = scalar_lea.vmem %s167_s24, 16  ;;  %s990_s9 = scalar_lea.vmem %s167_s24, 32 }
  0x1e   : > { %p984_p7 = scmp.ne.s32.totalorder %s167_s24, %s983_s8  ;;  %p991_p3 = scmp.lt.s32.totalorder %s167_s24, %s167_s24 }
  0x1f   : > { %p992_p6 = scmp.lt.s32.totalorder %s990_s9, %s983_s8 }
  0x20   : > { %p986_p9 = pnand %p984_p7, %p972_p0 }
  0x21   : > { %p993_p8 = por %p992_p6, %p991_p3 }
  0x22   : > { %p987_p10 = pneg %p986_p9 }
  0x24   : > { %p994_p12 = pnand %p993_p8, %p987_p10 }
  0x26   : > { %997 = shalt.err (!%p994_p12)
}
  0x27   : > { %874 = dma.hbm_to_vmem [thread:$0]  (!%p1165_p11), %s1323_s2, 16, %s167_s24, [#allocation6]  }
  0x28   : > { %s29_s12 = sadd.s32 1, %s1078_s16  ;;  %s770_s18 = sshll.u32 %s190_s25, 8 }
  0x29   : > { %p30_p13 = scmp.ge.s32.totalorder %s29_s12, 8  ;;  %s820_s23 = sshll.u32 %s1078_s16, 12 }
  0x2a   : > { %s194_s28 = scalar_lea.vmem [#allocation3], %s770_s18  ;;  %s1198_s4 = scalar_lea.hbm %s1322_s1, %s820_s23 }
  0x2b   : > { %s202_s29 = sshll.u32 %s194_s28, 4  ;;  %s1347_s12 = smov (%p30_p13, %s29_s12), 0  ;;  %s1200_s29 = int_to_ptr.vmem [resolvable:$true] %s202_s29 }
  0x2c   : > { %s68_s24 = ssub.s32 %s1078_s16, %s1347_s12  ;;  %s1210_s6 = scalar_lea.sflag [#allocation4], %s190_s25 }
  0x2d   : > { %p1204_p3 = scmp.eq.s32.totalorder %s68_s24, 0  ;;  %s998_s7 = scalar_lea.hbm %s1198_s4, 4096 }
  0x2e   : > { %p999_p6 = scmp.ne.s32.totalorder %s1198_s4, %s998_s7  ;;  %p1336_p8 = scmp.ne.s32.totalorder %s1334_s27, 0 }
  0x2f   : > { %s1003_s10 = scalar_lea.hbm %s1322_s1, 32768  ;;  %p1004_p1 = scmp.lt.u32.totalorder %s1198_s4, %s1322_s1 }
  0x30   : > { %p1000_p11 = pneg %p1336_p8  ;;  %p1005_p2 = scmp.lt.u32.totalorder %s1003_s10, %s998_s7 }
  0x31   : > { %p1007_p4 = scmp.lt.u32.totalorder %s998_s7, %s1198_s4 }
  0x32   : > { %p1001_p12 = pnand %p1000_p11, %p999_p6  ;;  %p1006_p5 = por %p1005_p2, %p1004_p1 }
  0x34   : > { %p1002_p0 = pneg %p1001_p12  ;;  %p1008_p7 = por %p1007_p4, %p1006_p5 }
  0x36   : > { %p1009_p9 = pnand %p1008_p7, %p1002_p0 }
  0x38   : > { %1012 = shalt.err (!%p1009_p9)
}
  0x39   : > { %s1013_s25 = scalar_lea.vmem %s1200_s29, 4096  ;;  %s1085_s23 = smov [#allocation3]  }
  0x3a   : > { %p1014_p10 = scmp.ne.s32.totalorder %s1200_s29, %s1013_s25  ;;  %s1018_s28 = sshll.u32 %s1085_s23, 4  ;;  %s1019_s28 = int_to_ptr.vmem [resolvable:$false] %s1018_s28 }
  0x3b   : > { %s1020_s26 = scalar_lea.vmem %s1019_s28, 8192  ;;  %p1021_p12 = scmp.lt.s32.totalorder %s1200_s29, %s1019_s28 }
  0x3c   : > { %p1016_p13 = pnand %p1014_p10, %p1000_p11  ;;  %p1022_p1 = scmp.lt.s32.totalorder %s1020_s26, %s1013_s25 }
  0x3e   : > { %p1017_p6 = pneg %p1016_p13  ;;  %p1023_p2 = por %p1022_p1, %p1021_p12 }
  0x40   : > { %p1024_p5 = pnand %p1023_p2, %p1017_p6 }
  0x42   : > { %1027 = shalt.err (!%p1024_p5)
}
  0x43   : > { %s1086_s30 = smov 64   ;;  %s1087_s24 = smov 4  }
  0x44   : > { %878 = dma.hbm_to_vmem [thread:$0]  (!%p1336_p8), %s1198_s4, 4096, %s1200_s29, %s1210_s6, %s1086_s30, %s1086_s30, %s1087_s24  }
  0x45   : > { %s1243_s7 = scalar_select %p1204_p3, %s1070_s14, %s73_s19  }
  0x46   : > { %p1337_p11 = scmp.ne.s32.totalorder %s1332_s22, 0 }
  0x47   : > { %s216_s8 = sand.u32 (!%p1337_p11), 1, %s1066_s13   ;;  %p1338_p0 = scmp.ne.s32.totalorder (!%p1337_p11), %s1331_s21, 0 }
  0x48   : > { %214 = sbr.rel (%p1337_p11) target bundleno = 357 (0x165), region = 32  ;;  %s774_s9 = sshll.u32 (!%p1337_p11), %s216_s8, 8 }
  0x49   : > { %s217_s10 = scalar_lea.sflag (!%p1337_p11), [#allocation4], %s216_s8  ;;  %s1248_s11 = scalar_lea.vmem (!%p1337_p11), [#allocation3], %s774_s9 }
  0x4f   : > { %1053 = dma.done.wait (%p1338_p0), %s217_s10, 4096  }
  0x50   : > { %1055 = vsyncadd (%p1338_p0), %s217_s10, 4294963200  ;;  %p1339_p8 = scmp.ne.s32.totalorder %s1330_s20, 0 }
  0x52   : > { %1057 = dma.done.wait (%p1339_p8), [#allocation6], 16  }
  0x53   : > { %1059 = vsyncadd (%p1339_p8), [#allocation6], 4294967280  ;;  %s776_s19 = sshll.u32 %s1074_s15, 2  ;;  %p778_p4 = scmp.ne.s32.totalorder %s1074_s15, 0 }
  0x54   : > { %p261_p3 = scmp.lt.s32.totalorder %s776_s19, 31  ;;  %v1088_v0 = vmov (!%p778_p4), 0.0  }
  0x55   : > { %280 = sbr.rel (%p778_p4) target bundleno = 92 (0x5c), region = 44  ;;  %281 = vst [vmem:[#allocation2] sm:$0xff] (!%p778_p4), %v1088_v0 }
  0x56   : > { %s1349_s19 = smov (!%p261_p3, %s776_s19), 31 }
  0x57   : > { %s777_s22 = sshll.u32 %s1349_s19, 2 }
  0x58   : > { %s1262_s4 = scalar_lea.vmem %s1321_s0, %s777_s22 }
  0x5c PF: > { %v934_v1 = vld [vmem:[%s1248_s11 + $0x40] sm:$0xff]   ;;  %v938_v5 = vld [vmem:[%s1248_s11 + $0x48] sm:$0xff]   ;;  %v942_v9 = vld [vmem:[%s1248_s11 + $0x50] sm:$0xff]   ;;  %p815_p7 = scmp.ne.s32.totalorder %s1074_s15, 7 }
  0x5d   : > { %v935_v2 = vld [vmem:[%s1248_s11 + $0xc0] sm:$0xff]   ;;  %821 = vmatprep.subr.bf16.mxu0 %v934_v1  ;;  %v939_v6 = vld [vmem:[%s1248_s11 + $0xc8] sm:$0xff]   ;;  %v943_v10 = vld [vmem:[%s1248_s11 + $0xd0] sm:$0xff]  }
  0x5e   : > { %v936_v3 = vld [vmem:[%s1248_s11] sm:$0xff]   ;;  %843 = vmatprep.subr.bf16.mxu1 %v935_v2  ;;  %v940_v7 = vld [vmem:[%s1248_s11 + $0x8] sm:$0xff]   ;;  %v944_v11 = vld [vmem:[%s1248_s11 + $0x10] sm:$0xff]  }
  0x5f   : > { %v937_v4 = vld [vmem:[%s1248_s11 + $0x80] sm:$0xff]   ;;  %822 = vmatpush3.bf16.msra.mxu0 %v936_v3  ;;  %v941_v8 = vld [vmem:[%s1248_s11 + $0x88] sm:$0xff]   ;;  %v945_v12 = vld [vmem:[%s1248_s11 + $0x90] sm:$0xff]  }
  0x60   : > { %844 = vmatpush3.bf16.msra.mxu1 %v937_v4  ;;  %823 = vmatprep.subr.bf16.mxu0 %v938_v5  ;;  %v946_v13 = vld [vmem:[%s1248_s11 + $0x58] sm:$0xff]   ;;  %v950_v17 = vld [vmem:[%s1248_s11 + $0x60] sm:$0xff]   ;;  %v954_v21 = vld [vmem:[%s1248_s11 + $0x68] sm:$0xff]  }
  0x61   : > { %845 = vmatprep.subr.bf16.mxu1 %v939_v6  ;;  %v947_v14 = vld [vmem:[%s1248_s11 + $0xd8] sm:$0xff]   ;;  %v951_v18 = vld [vmem:[%s1248_s11 + $0xe0] sm:$0xff]   ;;  %v955_v22 = vld [vmem:[%s1248_s11 + $0xe8] sm:$0xff]  }
  0x62   : > { %v948_v15 = vld [vmem:[%s1248_s11 + $0x18] sm:$0xff]   ;;  %v952_v19 = vld [vmem:[%s1248_s11 + $0x20] sm:$0xff]   ;;  %v956_v23 = vld [vmem:[%s1248_s11 + $0x28] sm:$0xff]  }
  0x63   : > { %824 = vmatpush3.bf16.msra.mxu0 %v940_v7  ;;  %v949_v16 = vld [vmem:[%s1248_s11 + $0x98] sm:$0xff]   ;;  %v953_v20 = vld [vmem:[%s1248_s11 + $0xa0] sm:$0xff]   ;;  %v957_v24 = vld [vmem:[%s1248_s11 + $0xa8] sm:$0xff]  }
  0x64   : > { %846 = vmatpush3.bf16.msra.mxu1 %v941_v8  ;;  %825 = vmatprep.subr.bf16.mxu0 %v942_v9  ;;  %v958_v25 = vld [vmem:[%s1248_s11 + $0x70] sm:$0xff]   ;;  %v962_v29 = vld [vmem:[%s1248_s11 + $0x78] sm:$0xff]   ;;  %v284_v34 = vld [vmem:[%s1262_s4 + $0x8] sm:$0xff] }
  0x65   : > { %847 = vmatprep.subr.bf16.mxu1 %v943_v10  ;;  %v959_v26 = vld [vmem:[%s1248_s11 + $0xf0] sm:$0xff]   ;;  %v963_v30 = vld [vmem:[%s1248_s11 + $0xf8] sm:$0xff]   ;;  %v781_v37 = vcombine.low %v284_v34, %v284_v34  ;;  %v782_v38 = vcombine.high %v284_v34, %v284_v34  ;;  %v816_v53 = vld [vmem:[#allocation5] ss:$0 sm:$0xff] (!%p815_p7) }
  0x66   : > { %v960_v27 = vld [vmem:[%s1248_s11 + $0x30] sm:$0xff]   ;;  %v964_v31 = vld [vmem:[%s1248_s11 + $0x38] sm:$0xff]  }
  0x67   : > { %826 = vmatpush3.bf16.msra.mxu0 %v944_v11  ;;  %v961_v28 = vld [vmem:[%s1248_s11 + $0xb0] sm:$0xff]   ;;  %v965_v32 = vld [vmem:[%s1248_s11 + $0xb8] sm:$0xff]   ;;  %627 = vmatprep.mubr.bf16.mxu1 %v782_v38 }
  0x68   : > { %848 = vmatpush3.bf16.msra.mxu1 %v945_v12  ;;  %827 = vmatprep.subr.bf16.mxu0 %v946_v13  ;;  %v283_v33 = vld [vmem:[%s1262_s4] sm:$0xff] }
  0x69   : > { %849 = vmatprep.subr.bf16.mxu1 %v947_v14  ;;  %v779_v35 = vcombine.low %v283_v33, %v283_v33  ;;  %v780_v36 = vcombine.high %v283_v33, %v283_v33  ;;  %v282_v47 = vld [vmem:[#allocation2] sm:$0xff] }
  0x6b   : > { %828 = vmatpush3.bf16.msra.mxu0 %v948_v15  ;;  %587 = vmatprep.mubr.bf16.mxu0 %v780_v36 }
  0x6c   : > { %850 = vmatpush3.bf16.msra.mxu1 %v949_v16  ;;  %829 = vmatprep.subr.bf16.mxu0 %v950_v17 }
  0x6d   : > { %851 = vmatprep.subr.bf16.mxu1 %v951_v18 }
  0x6f   : > { %830 = vmatpush3.bf16.msra.mxu0 %v952_v19 }
  0x70   : > { %852 = vmatpush3.bf16.msra.mxu1 %v953_v20  ;;  %831 = vmatprep.subr.bf16.mxu0 %v954_v21 }
  0x71   : > { %853 = vmatprep.subr.bf16.mxu1 %v955_v22 }
  0x73   : > { %832 = vmatpush3.bf16.msra.mxu0 %v956_v23 }
  0x74   : > { %854 = vmatpush3.bf16.msra.mxu1 %v957_v24  ;;  %833 = vmatprep.subr.bf16.mxu0 %v958_v25 }
  0x75   : > { %855 = vmatprep.subr.bf16.mxu1 %v959_v26 }
  0x77   : > { %834 = vmatpush3.bf16.msra.mxu0 %v960_v27 }
  0x78   : > { %856 = vmatpush3.bf16.msra.mxu1 %v961_v28  ;;  %835 = vmatprep.subr.bf16.mxu0 %v962_v29 }
  0x79   : > { %857 = vmatprep.subr.bf16.mxu1 %v963_v30 }
  0x7b   : > { %836 = vmatpush3.bf16.msra.mxu0 %v964_v31 }
  0x7c   : > { %858 = vmatpush3.bf16.msra.mxu1 %v965_v32 }
  0x7e   : > { %588 = vmatmul.mubr.bf16.vlgmr.msra.gmra.mrb[0].mxu0 %v779_v35 }
  0x7f   : > { %628 = vmatmul.mubr.bf16.vlgmr.msra.gmra.mrb[0].mxu1 %v781_v37 }
 0x151   : > { %v837_v39 = vpop.f32.mrb[0].mxu0 }
 0x152   : > { %v859_v40 = vpop.f32.mrb[0].mxu1  ;;  %v838_v41 = vpop.f32.mrb[1].mxu0 }
 0x153   : > { %v860_v42 = vpop.f32.mrb[1].mxu1  ;;  %v839_v43 = vadd.f32 %v838_v41, %v837_v39  ;;  %v840_v45 = vpop.f32.mrb[2].mxu0 }
 0x154   : > { %v861_v44 = vadd.f32 %v860_v42, %v859_v40  ;;  %v862_v46 = vpop.f32.mrb[2].mxu1  ;;  %v841_v48 = vpop.f32.mrb[3].mxu0  ;;  %640 = sbr.rel (%p815_p7) target bundleno = 357 (0x165), region = 48 }
 0x155   : > { %v863_v49 = vpop.f32.mrb[3].mxu1 }
 0x156   : > { %v630_v50 = vadd.f32 %v861_v44, %v839_v43 }
 0x158   : > { %v635_v51 = vadd.f32 %v630_v50, %v282_v47 }
 0x15a   : > { %636 = vst [vmem:[#allocation2] sm:$0xff] %v635_v51 }
 0x161   : > { %v641_v52 = vld [vmem:[#allocation2] sm:$0xff] }
 0x162   : > { %v649_v54 = vadd.f32 %v816_v53, %v641_v52 }
 0x164   : > { %650 = vst [vmem:[%s1324_s3] sm:$0xff] %v649_v54 }
 0x165 PF: > { %s17_s17 = sadd.s32 1, %s1082_s17   ;;  %s1340_s5 = smov %s1347_s12 }
 0x166   : > { %p14_p9 = scmp.ge.s32.totalorder %s17_s17, 10   ;;  %s1341_s12 = smov %s1066_s13 }
 0x167   : > { %s1342_s13 = smov %s1070_s14  ;;  %s1343_s14 = smov %s1243_s7 }
 0x168   : > { %s1344_s15 = smov %s1078_s16  ;;  %s1345_s16 = smov %s1340_s5 }
 0x169   :  { %16 = sbr.rel (!%p14_p9) target bundleno = 5 (0x5), region = 88 }
 0x170   :  { %676 = vsyncpa [#allocation4], 1 }
 0x171   :  { %678 = vsyncpa [#allocation4 + $0x1], 1 }
 0x172   :  { %679 = vsyncpa [#allocation6], 1 }

</bundles_post_ra>
